<compile_context>
chip_gen: v6e
topology: v6e:2x2x1
jax: 0.10.0
libtpu: 0.0.40
codegen_flags: <defaults>
</compile_context>

<pallas_src>
import functools

import jax
import jax.numpy as jnp
from jax import lax
from jax.experimental import pallas as pl
from jax.experimental.pallas import tpu as pltpu


_VMEM_LIMIT = 56 * 1024 * 1024  # <= v7x physical 64 MiB; ample headroom on v5e/v6e.


def _round_up(x, m):
    return ((x + m - 1) // m) * m


def _pick_row_tile(h, need_even, max_tile=32):
    """Largest divisor of h that is <= max_tile (even when pooling is fused)."""
    for th in range(min(h, max_tile), 0, -1):
        if h % th == 0 and (not need_even or th % 2 == 0):
            return th
    return h


# ----------------------------- Normalization ------------------------------ #
def _norm_kernel(x_ref, mean_ref, istd_ref, o_ref):
    o_ref[...] = ((x_ref[...] - mean_ref[...]) * istd_ref[...]).astype(o_ref.dtype)


def normalization(x, mean, std):
    """Standalone (x - mean) / std.  Only used when a norm layer is NOT
    immediately followed by a conv; otherwise it is fused into the conv."""
    N, H, W, C = x.shape
    m = jnp.asarray(mean, jnp.float32).reshape(1, 1, 1, C)
    s = (1.0 / jnp.asarray(std, jnp.float32)).reshape(1, 1, 1, C)
    return pl.pallas_call(
        _norm_kernel,
        out_shape=jax.ShapeDtypeStruct((N, H, W, C), x.dtype),
        grid=(N,),
        in_specs=[
            pl.BlockSpec((1, H, W, C), lambda n: (n, 0, 0, 0)),
            pl.BlockSpec((1, 1, 1, C), lambda n: (0, 0, 0, 0)),
            pl.BlockSpec((1, 1, 1, C), lambda n: (0, 0, 0, 0)),
        ],
        out_specs=pl.BlockSpec((1, H, W, C), lambda n: (n, 0, 0, 0)),
        compiler_params=pltpu.CompilerParams(dimension_semantics=("parallel",)),
    )(x, m, s)


# --------------- Conv 3x3 (pad=1) + ReLU (+ fused norm / pool) ------------- #
def _conv_kernel(*refs, TH, W, Wp, has_norm, emit_norm, fuse_pool):
    x_ref, top_ref, bot_ref, w_ref, b_ref = refs[:5]
    idx = 5
    mean_ref = istd_ref = None
    if has_norm:
        mean_ref, istd_ref = refs[idx], refs[idx + 1]
        idx += 2
    main_ref = refs[idx]
    idx += 1
    norm_ref = refs[idx] if emit_norm else None
    xp_ref = refs[-1]

    f32 = jnp.float32
    Cin = x_ref.shape[3]
    Cout = w_ref.shape[3]
    i = pl.program_id(1)
    n_tiles = pl.num_programs(1)

    # Load (and normalize, for the first conv) the interior rows of this tile.
    x_blk = x_ref[0].astype(f32)                         # (TH, W, Cin)
    if has_norm:
        mean = mean_ref[0, 0]                            # (1, Cin)
        istd = istd_ref[0, 0]                            # (1, Cin)
        x_blk = (x_blk - mean) * istd
    if emit_norm:
        norm_ref[0] = x_blk.astype(norm_ref.dtype)

    # ---- assemble the zero-padded tile in VMEM scratch --------------------
    # Only halo / alignment padding is filled; the interior is fully rewritten.
    xp_ref[:, 0:1, :] = jnp.zeros((TH + 3, 1, Cin), f32)              # left pad
    xp_ref[:, W + 1:, :] = jnp.zeros((TH + 3, Wp - W - 1, Cin), f32)  # right pad
    xp_ref[TH + 2:TH + 3, 1:W + 1, :] = jnp.zeros((1, W, Cin), f32)   # tail row
    xp_ref[1:TH + 1, 1:W + 1, :] = x_blk                              # interior
    # TODO(synk): DMA the activation rows straight from HBM (memory_space=pl.ANY)
    # into the padded scratch to drop this VMEM->VMEM relocation pass.

    zero_row = jnp.zeros((1, W, Cin), f32)

    @pl.when(i == 0)
    def _():
        xp_ref[0:1, 1:W + 1, :] = zero_row

    @pl.when(i > 0)
    def _():
        t = top_ref[0].astype(f32)                       # (1, W, Cin)
        if has_norm:
            t = (t - mean) * istd
        xp_ref[0:1, 1:W + 1, :] = t

    @pl.when(i == n_tiles - 1)
    def _():
        xp_ref[TH + 1:TH + 2, 1:W + 1, :] = zero_row

    @pl.when(i < n_tiles - 1)
    def _():
        bt = bot_ref[0].astype(f32)
        if has_norm:
            bt = (bt - mean) * istd
        xp_ref[TH + 1:TH + 2, 1:W + 1, :] = bt

    # ---- 3x3 conv: 9 MXU matmuls on a flat view of the padded tile --------
    # Wp % 8 == 0 keeps the flatten layout-preserving; every tap becomes a
    # contiguous (TH*Wp, Cin) slice (extra Wp-W junk columns are discarded).
    xf = xp_ref[...].reshape((TH + 3) * Wp, Cin)
    acc = jnp.zeros((TH * Wp, Cout), jnp.float32)
    for dy in range(3):
        for dx in range(3):
            off = dy * Wp + dx
            tap = xf[off:off + TH * Wp, :]
            acc = acc + jnp.dot(tap, w_ref[dy, dx],
                                preferred_element_type=jnp.float32)
    # TODO(synk): fuse the 9 taps into one (TH*Wp, 9*Cin) im2col matmul and run
    # the MXU in bf16 (with a lane-dense out_spec) once tolerances allow.

    accr = acc.reshape(TH, Wp, Cout)
    val = jnp.maximum(accr[:, :W, :] + b_ref[...], 0.0)  # bias + ReLU, (TH, W, Cout)

    if fuse_pool:
        # 2x2/stride-2 max-pool epilogue (the un-pooled activation is unused).
        rows = val.reshape(TH // 2, 2, W, Cout)
        rowmax = jnp.maximum(rows[:, 0], rows[:, 1])          # (TH//2, W, Cout)
        cols = rowmax.reshape(TH // 2, W // 2, 2, Cout)
        pooled = jnp.maximum(cols[:, :, 0, :], cols[:, :, 1, :])
        main_ref[0] = pooled.astype(main_ref.dtype)
    else:
        main_ref[0] = val.astype(main_ref.dtype)


def conv3x3_relu(x, w, b, *, mean=None, std=None, emit_norm=False, fuse_pool=False):
    """NHWC conv3x3 (padding=1) + ReLU.
    Optionally fuses an input normalization (mean/std) and/or a trailing
    2x2 maxpool.  Returns (main_output, normalized_input_or_None)."""
    N, H, W, Cin = x.shape
    Cout = w.shape[-1]
    has_norm = mean is not None
    assert not (emit_norm and not has_norm)
    if fuse_pool:
        assert H % 2 == 0 and W % 2 == 0, "fused maxpool needs even H and W"

    TH = _pick_row_tile(H, need_even=fuse_pool)
    n_tiles = H // TH
    Wp = _round_up(W + 2, 8)

    b2 = b.reshape(1, Cout).astype(jnp.float32)

    def main_map(n, i):          # rows [i*TH, (i+1)*TH)
        return (n, i, 0, 0)

    def top_map(n, i):           # halo row above the tile (clamped at i == 0)
        return (n, jnp.maximum(i * TH - 1, 0), 0, 0)

    def bot_map(n, i):           # halo row below the tile (clamped at last tile)
        return (n, jnp.minimum((i + 1) * TH, H - 1), 0, 0)

    in_specs = [
        pl.BlockSpec((1, TH, W, Cin), main_map),
        pl.BlockSpec((1, 1, W, Cin), top_map),
        pl.BlockSpec((1, 1, W, Cin), bot_map),
        pl.BlockSpec((3, 3, Cin, Cout), lambda n, i: (0, 0, 0, 0)),
        pl.BlockSpec((1, Cout), lambda n, i: (0, 0)),
    ]
    args = [x, x, x, w, b2]
    if has_norm:
        m2 = jnp.asarray(mean, jnp.float32).reshape(1, 1, 1, Cin)
        is2 = (1.0 / jnp.asarray(std, jnp.float32)).reshape(1, 1, 1, Cin)
        in_specs.append(pl.BlockSpec((1, 1, 1, Cin), lambda n, i: (0, 0, 0, 0)))
        in_specs.append(pl.BlockSpec((1, 1, 1, Cin), lambda n, i: (0, 0, 0, 0)))
        args += [m2, is2]

    out_shapes = []
    out_specs = []
    if fuse_pool:
        out_shapes.append(jax.ShapeDtypeStruct((N, H // 2, W // 2, Cout), x.dtype))
        out_specs.append(pl.BlockSpec((1, TH // 2, W // 2, Cout),
                                      lambda n, i: (n, i, 0, 0)))
    else:
        out_shapes.append(jax.ShapeDtypeStruct((N, H, W, Cout), x.dtype))
        out_specs.append(pl.BlockSpec((1, TH, W, Cout), lambda n, i: (n, i, 0, 0)))
    if emit_norm:
        out_shapes.append(jax.ShapeDtypeStruct((N, H, W, Cin), x.dtype))
        out_specs.append(pl.BlockSpec((1, TH, W, Cin), lambda n, i: (n, i, 0, 0)))

    kernel = functools.partial(_conv_kernel, TH=TH, W=W, Wp=Wp,
                               has_norm=has_norm, emit_norm=emit_norm,
                               fuse_pool=fuse_pool)

    single_out = len(out_shapes) == 1
    res = pl.pallas_call(
        kernel,
        out_shape=out_shapes[0] if single_out else tuple(out_shapes),
        grid=(N, n_tiles),
        in_specs=in_specs,
        out_specs=out_specs[0] if single_out else tuple(out_specs),
        scratch_shapes=[pltpu.VMEM((TH + 3, Wp, Cin), jnp.float32)],
        compiler_params=pltpu.CompilerParams(
            dimension_semantics=("parallel", "parallel"),
            vmem_limit_bytes=_VMEM_LIMIT),
    )(*args)

    if emit_norm:
        return res[0], res[1]
    return res, None


# ------------------------------ MaxPool 2x2 -------------------------------- #
def _maxpool_kernel(x_ref, o_ref):
    # x_ref: (1, 2*THp, Wo, 2C) -- column pairs packed on the lane axis by the
    # wrapper's free HBM reshape.  o_ref: (1, THp, Wo, C).
    THp, Wo, C = o_ref.shape[1], o_ref.shape[2], o_ref.shape[3]
    x = x_ref[0]                                         # (2*THp, Wo, 2C)
    colmax = jnp.maximum(x[:, :, :C], x[:, :, C:])       # (2*THp, Wo, C)
    pairs = colmax.reshape(THp, 2, Wo, C)                # leading-dim split only
    o_ref[0] = jnp.maximum(pairs[:, 0], pairs[:, 1]).astype(o_ref.dtype)


def maxpool2x2(x):
    """Standalone 2x2/stride-2 max-pool; only used when the preceding conv's
    un-pooled activation is itself a requested output."""
    N, H, W, C = x.shape
    assert H % 2 == 0 and W % 2 == 0, "maxpool2x2 expects even H and W"
    Ho, Wo = H // 2, W // 2
    THp = _pick_row_tile(Ho, need_even=False, max_tile=64)
    xw = x.reshape(N, H, Wo, 2 * C)          # contiguous reshape: free in HBM
    return pl.pallas_call(
        _maxpool_kernel,
        out_shape=jax.ShapeDtypeStruct((N, Ho, Wo, C), x.dtype),
        grid=(N, Ho // THp),
        in_specs=[pl.BlockSpec((1, 2 * THp, Wo, 2 * C), lambda n, i: (n, i, 0, 0))],
        out_specs=pl.BlockSpec((1, THp, Wo, C), lambda n, i: (n, i, 0, 0)),
        compiler_params=pltpu.CompilerParams(
            dimension_semantics=("parallel", "parallel"),
            vmem_limit_bytes=_VMEM_LIMIT),
    )(xw)


# ------------------------------ TransferVgg -------------------------------- #
class TransferVggPallas:
    """Mirrors TransferVgg.forward: run layers in order, ReLU after convs,
    and return the requested intermediates (NCHW).  Normalization and maxpool
    layers are fused into neighbouring convs whenever their standalone
    activations are not requested."""

    def __init__(self, layers):
        self.layers = layers                  # list of (name, kind, params)
        self.layer_names = [n for n, _, _ in layers]

    def __call__(self, x_nchw, out_keys):
        x = jnp.transpose(x_nchw, (0, 2, 3, 1))           # NCHW -> NHWC
        out = {}
        layers = self.layers
        n_layers = len(layers)
        i = 0
        pending_norm = None                   # (requested_name_or_None, params)
        while i < n_layers:
            name, kind, params = layers[i]
            if kind == "norm":
                if i + 1 < n_layers and layers[i + 1][1] == "conv":
                    pending_norm = (name if name in out_keys else None, params)
                else:
                    x = normalization(x, params["mean"], params["std"])
                    out[name] = x
                i += 1
                continue
            if kind == "conv":
                fuse_pool = (i + 1 < n_layers and layers[i + 1][1] == "pool"
                             and name not in out_keys)
                if pending_norm is not None:
                    norm_name, norm_p = pending_norm
                    main, normed = conv3x3_relu(
                        x, params["w"], params["b"],
                        mean=norm_p["mean"], std=norm_p["std"],
                        emit_norm=norm_name is not None, fuse_pool=fuse_pool)
                    if norm_name is not None:
                        out[norm_name] = normed
                    pending_norm = None
                else:
                    main, _ = conv3x3_relu(x, params["w"], params["b"],
                                           fuse_pool=fuse_pool)
                x = main
                if fuse_pool:
                    out[layers[i + 1][0]] = x             # record under pool name
                    i += 2
                else:
                    out[name] = x
                    i += 1
                continue
            if kind == "pool":
                x = maxpool2x2(x)
                out[name] = x
                i += 1
                continue
            raise ValueError("unknown layer kind: %s" % kind)
        return {k: jnp.transpose(v, (0, 3, 1, 2))         # NHWC -> NCHW
                for k, v in out.items() if k in out_keys}

    @classmethod
    def factory(cls, cfg, last_layer, mean, std, key):
        layers = [("normalization", "norm",
                   {"mean": jnp.asarray(mean, jnp.float32),
                    "std": jnp.asarray(std, jnp.float32)})]
        in_channels = 3
        conv_layer = 1
        conv_layer_number = 1
        pool_layer_number = 1
        for v in cfg:
            if v == "M":
                layers.append(("pool_%s" % pool_layer_number, "pool", {}))
                pool_layer_number += 1
                conv_layer += 1
                conv_layer_number = 1
            else:
                name = "conv_%s_%s" % (conv_layer, conv_layer_number)
                key, kw, kb = jax.random.split(key, 3)
                # PyTorch Conv2d default init: U(-s, s), s = 1/sqrt(Cin*3*3)
                fan_in = in_channels * 9
                s = 1.0 / (fan_in ** 0.5)
                w_oihw = jax.random.uniform(kw, (v, in_channels, 3, 3),
                                            jnp.float32, -s, s)
                b = jax.random.uniform(kb, (v,), jnp.float32, -s, s)
                w = jnp.transpose(w_oihw, (2, 3, 1, 0))   # OIHW -> HWIO
                layers.append((name, "conv", {"w": w, "b": b}))
                in_channels = v
                if name == last_layer:
                    break
                conv_layer_number += 1
        return cls(layers)


# ---------------------------- Pure-JAX reference --------------------------- #
def reference_forward(model, x_nchw, out_keys):
    x = jnp.transpose(x_nchw, (0, 2, 3, 1))
    out = {}
    for name, kind, params in model.layers:
        if kind == "norm":
            x = (x - params["mean"]) / params["std"]
        elif kind == "conv":
            y = lax.conv_general_dilated(
                x, params["w"], (1, 1), "SAME",
                dimension_numbers=("NHWC", "HWIO", "NHWC"),
                precision=lax.Precision.HIGHEST)
            x = jnp.maximum(y + params["b"], 0.0)
        elif kind == "pool":
            x = lax.reduce_window(x, -jnp.inf, lax.max,
                                  (1, 2, 2, 1), (1, 2, 2, 1), "VALID")
        out[name] = x
    return {k: jnp.transpose(v, (0, 3, 1, 2))
            for k, v in out.items() if k in out_keys}


if __name__ == "__main__":
    key = jax.random.PRNGKey(0)
    kx, kp = jax.random.split(key)

    # Small VGG-ish config exercising every code path:
    #   fused norm + conv (with norm emitted), plain conv, standalone pool,
    #   conv with fused pool epilogue, final conv.
    cfg = [8, 8, "M", 16, 16, "M", 32]
    model = TransferVggPallas.factory(
        cfg, last_layer="conv_3_1",
        mean=[0.485, 0.456, 0.406], std=[0.229, 0.224, 0.225], key=kp)

    x = jax.random.uniform(kx, (2, 3, 16, 16), jnp.float32)   # NCHW like PyTorch
    out_keys = ["normalization", "conv_1_2", "pool_1", "pool_2", "conv_3_1"]

    outs = model(x, out_keys)
    jax.block_until_ready(outs)

    refs = reference_forward(model, x, out_keys)
    for k in out_keys:
        assert outs[k].shape == refs[k].shape, (k, outs[k].shape, refs[k].shape)
        assert jnp.allclose(outs[k], refs[k], atol=1e-2, rtol=1e-2), k

    print("KERNEL_OK")
</pallas_src>

<mosaic_0001>
module attributes {stable_mosaic.version = 11 : i64} {
  func.func @_conv_kernel(%arg0: i32, %arg1: i32, %arg2: memref<1x16x16x3xf32, #tpu.memory_space<vmem>>, %arg3: memref<1x1x16x3xf32, #tpu.memory_space<vmem>>, %arg4: memref<1x1x16x3xf32, #tpu.memory_space<vmem>>, %arg5: memref<3x3x3x8xf32, #tpu.memory_space<vmem>>, %arg6: memref<1x8xf32, #tpu.memory_space<vmem>>, %arg7: memref<1x1x1x3xf32, #tpu.memory_space<vmem>>, %arg8: memref<1x1x1x3xf32, #tpu.memory_space<vmem>>, %arg9: memref<1x16x16x8xf32, #tpu.memory_space<vmem>>, %arg10: memref<1x16x16x3xf32, #tpu.memory_space<vmem>>, %arg11: memref<19x24x3xf32, #tpu.memory_space<vmem>>) attributes {dimension_semantics = [#tpu.dimension_semantics<parallel>, #tpu.dimension_semantics<parallel>], iteration_bounds = array<i64: 2, 1>, scalar_prefetch = 0 : i64, scratch_operands = 1 : i64, tpu.core_type = #tpu.core_type<tc>, window_params = [{transform_indices = @transform_0, window_bounds = array<i64: 1, 16, 16, 3>}, {transform_indices = @transform_1, window_bounds = array<i64: 1, 1, 16, 3>}, {transform_indices = @transform_2, window_bounds = array<i64: 1, 1, 16, 3>}, {pipeline_mode = #tpu.pipeline_mode<synchronous>, transform_indices = @transform_3, window_bounds = array<i64: 3, 3, 3, 8>}, {pipeline_mode = #tpu.pipeline_mode<synchronous>, transform_indices = @transform_4, window_bounds = array<i64: 1, 8>}, {pipeline_mode = #tpu.pipeline_mode<synchronous>, transform_indices = @transform_5, window_bounds = array<i64: 1, 1, 1, 3>}, {pipeline_mode = #tpu.pipeline_mode<synchronous>, transform_indices = @transform_6, window_bounds = array<i64: 1, 1, 1, 3>}, {transform_indices = @transform_7, window_bounds = array<i64: 1, 16, 16, 8>}, {transform_indices = @transform_8, window_bounds = array<i64: 1, 16, 16, 3>}]} {
    %c0 = arith.constant 0 : index
    %c0_0 = arith.constant 0 : index
    %c0_1 = arith.constant 0 : index
    %c0_2 = arith.constant 0 : index
    %0 = vector.load %arg2[%c0, %c0_0, %c0_1, %c0_2] : memref<1x16x16x3xf32, #tpu.memory_space<vmem>>, vector<1x16x16x3xf32>
    %1 = vector.shape_cast %0 : vector<1x16x16x3xf32> to vector<16x16x3xf32>
    %c0_3 = arith.constant 0 : index
    %c0_4 = arith.constant 0 : index
    %c0_5 = arith.constant 0 : index
    %c0_6 = arith.constant 0 : index
    %2 = vector.load %arg7[%c0_3, %c0_4, %c0_5, %c0_6] : memref<1x1x1x3xf32, #tpu.memory_space<vmem>>, vector<1x1x1x3xf32>
    %3 = vector.shape_cast %2 : vector<1x1x1x3xf32> to vector<1x3xf32>
    %c0_7 = arith.constant 0 : index
    %c0_8 = arith.constant 0 : index
    %c0_9 = arith.constant 0 : index
    %c0_10 = arith.constant 0 : index
    %4 = vector.load %arg8[%c0_7, %c0_8, %c0_9, %c0_10] : memref<1x1x1x3xf32, #tpu.memory_space<vmem>>, vector<1x1x1x3xf32>
    %5 = vector.shape_cast %4 : vector<1x1x1x3xf32> to vector<1x3xf32>
    %6 = vector.shape_cast %3 : vector<1x3xf32> to vector<1x1x3xf32>
    %7 = vector.broadcast %6 : vector<1x1x3xf32> to vector<16x16x3xf32>
    %8 = arith.subf %1, %7 : vector<16x16x3xf32>
    %9 = vector.shape_cast %5 : vector<1x3xf32> to vector<1x1x3xf32>
    %10 = vector.broadcast %9 : vector<1x1x3xf32> to vector<16x16x3xf32>
    %11 = arith.mulf %8, %10 : vector<16x16x3xf32>
    %c0_11 = arith.constant 0 : index
    %c0_12 = arith.constant 0 : index
    %c0_13 = arith.constant 0 : index
    %c0_14 = arith.constant 0 : index
    %12 = vector.load %arg10[%c0_11, %c0_12, %c0_13, %c0_14] : memref<1x16x16x3xf32, #tpu.memory_space<vmem>>, vector<1x16x16x3xf32>
    %13 = vector.shape_cast %12 : vector<1x16x16x3xf32> to vector<16x16x3xf32>
    %14 = vector.shape_cast %11 : vector<16x16x3xf32> to vector<1x16x16x3xf32>
    tpu.vector_store %arg10[%c0_11, %c0_12, %c0_13, %c0_14], %14 {strides = array<i32>} : memref<1x16x16x3xf32, #tpu.memory_space<vmem>>, vector<1x16x16x3xf32>,
    %cst = arith.constant 0.000000e+00 : f32
    %15 = vector.broadcast %cst : f32 to vector<19x1x3xf32>
    %c0_15 = arith.constant 0 : index
    %c0_16 = arith.constant 0 : index
    %c0_17 = arith.constant 0 : index
    %16 = vector.load %arg11[%c0_15, %c0_16, %c0_17] : memref<19x24x3xf32, #tpu.memory_space<vmem>>, vector<19x1x3xf32>
    tpu.vector_store %arg11[%c0_15, %c0_16, %c0_17], %15 {strides = array<i32>} : memref<19x24x3xf32, #tpu.memory_space<vmem>>, vector<19x1x3xf32>,
    %cst_18 = arith.constant 0.000000e+00 : f32
    %17 = vector.broadcast %cst_18 : f32 to vector<19x7x3xf32>
    %c0_19 = arith.constant 0 : index
    %c17 = arith.constant 17 : index
    %c0_20 = arith.constant 0 : index
    %18 = vector.load %arg11[%c0_19, %c17, %c0_20] : memref<19x24x3xf32, #tpu.memory_space<vmem>>, vector<19x7x3xf32>
    tpu.vector_store %arg11[%c0_19, %c17, %c0_20], %17 {strides = array<i32>} : memref<19x24x3xf32, #tpu.memory_space<vmem>>, vector<19x7x3xf32>,
    %cst_21 = arith.constant 0.000000e+00 : f32
    %19 = vector.broadcast %cst_21 : f32 to vector<1x16x3xf32>
    %c18 = arith.constant 18 : index
    %c1 = arith.constant 1 : index
    %c0_22 = arith.constant 0 : index
    %20 = vector.load %arg11[%c18, %c1, %c0_22] : memref<19x24x3xf32, #tpu.memory_space<vmem>>, vector<1x16x3xf32>
    tpu.vector_store %arg11[%c18, %c1, %c0_22], %19 {strides = array<i32>} : memref<19x24x3xf32, #tpu.memory_space<vmem>>, vector<1x16x3xf32>,
    %c1_23 = arith.constant 1 : index
    %c1_24 = arith.constant 1 : index
    %c0_25 = arith.constant 0 : index
    %21 = vector.load %arg11[%c1_23, %c1_24, %c0_25] : memref<19x24x3xf32, #tpu.memory_space<vmem>>, vector<16x16x3xf32>
    tpu.vector_store %arg11[%c1_23, %c1_24, %c0_25], %11 {strides = array<i32>} : memref<19x24x3xf32, #tpu.memory_space<vmem>>, vector<16x16x3xf32>,
    %cst_26 = arith.constant 0.000000e+00 : f32
    %22 = vector.broadcast %cst_26 : f32 to vector<1x16x3xf32>
    %c0_i32 = arith.constant 0 : i32
    %23 = arith.cmpi eq, %arg1, %c0_i32 : i32
    %24 = arith.extui %23 : i1 to i32
    %c0_i32_27 = arith.constant 0 : i32
    %25 = arith.cmpi ne, %24, %c0_i32_27 : i32
    scf.if %25 {
      %c0_89 = arith.constant 0 : index
      %c1_90 = arith.constant 1 : index
      %c0_91 = arith.constant 0 : index
      %94 = vector.load %arg11[%c0_89, %c1_90, %c0_91] : memref<19x24x3xf32, #tpu.memory_space<vmem>>, vector<1x16x3xf32>
      tpu.vector_store %arg11[%c0_89, %c1_90, %c0_91], %22 {strides = array<i32>} : memref<19x24x3xf32, #tpu.memory_space<vmem>>, vector<1x16x3xf32>,
    } else {
    }
    %c0_i32_28 = arith.constant 0 : i32
    %26 = arith.cmpi sgt, %arg1, %c0_i32_28 : i32
    %27 = arith.extui %26 : i1 to i32
    %c0_i32_29 = arith.constant 0 : i32
    %28 = arith.cmpi ne, %27, %c0_i32_29 : i32
    scf.if %28 {
      %c0_89 = arith.constant 0 : index
      %c0_90 = arith.constant 0 : index
      %c0_91 = arith.constant 0 : index
      %c0_92 = arith.constant 0 : index
      %94 = vector.load %arg3[%c0_89, %c0_90, %c0_91, %c0_92] : memref<1x1x16x3xf32, #tpu.memory_space<vmem>>, vector<1x1x16x3xf32>
      %95 = vector.shape_cast %94 : vector<1x1x16x3xf32> to vector<1x16x3xf32>
      %96 = vector.shape_cast %3 : vector<1x3xf32> to vector<1x1x3xf32>
      %97 = vector.broadcast %96 : vector<1x1x3xf32> to vector<1x16x3xf32>
      %98 = arith.subf %95, %97 : vector<1x16x3xf32>
      %99 = vector.shape_cast %5 : vector<1x3xf32> to vector<1x1x3xf32>
      %100 = vector.broadcast %99 : vector<1x1x3xf32> to vector<1x16x3xf32>
      %101 = arith.mulf %98, %100 : vector<1x16x3xf32>
      %c0_93 = arith.constant 0 : index
      %c1_94 = arith.constant 1 : index
      %c0_95 = arith.constant 0 : index
      %102 = vector.load %arg11[%c0_93, %c1_94, %c0_95] : memref<19x24x3xf32, #tpu.memory_space<vmem>>, vector<1x16x3xf32>
      tpu.vector_store %arg11[%c0_93, %c1_94, %c0_95], %101 {strides = array<i32>} : memref<19x24x3xf32, #tpu.memory_space<vmem>>, vector<1x16x3xf32>,
    } else {
    }
    %c0_i32_30 = arith.constant 0 : i32
    %29 = arith.cmpi eq, %arg1, %c0_i32_30 : i32
    %30 = arith.extui %29 : i1 to i32
    %c0_i32_31 = arith.constant 0 : i32
    %31 = arith.cmpi ne, %30, %c0_i32_31 : i32
    scf.if %31 {
      %c17_89 = arith.constant 17 : index
      %c1_90 = arith.constant 1 : index
      %c0_91 = arith.constant 0 : index
      %94 = vector.load %arg11[%c17_89, %c1_90, %c0_91] : memref<19x24x3xf32, #tpu.memory_space<vmem>>, vector<1x16x3xf32>
      tpu.vector_store %arg11[%c17_89, %c1_90, %c0_91], %22 {strides = array<i32>} : memref<19x24x3xf32, #tpu.memory_space<vmem>>, vector<1x16x3xf32>,
    } else {
    }
    %c0_i32_32 = arith.constant 0 : i32
    %32 = arith.cmpi slt, %arg1, %c0_i32_32 : i32
    %33 = arith.extui %32 : i1 to i32
    %c0_i32_33 = arith.constant 0 : i32
    %34 = arith.cmpi ne, %33, %c0_i32_33 : i32
    scf.if %34 {
      %c0_89 = arith.constant 0 : index
      %c0_90 = arith.constant 0 : index
      %c0_91 = arith.constant 0 : index
      %c0_92 = arith.constant 0 : index
      %94 = vector.load %arg4[%c0_89, %c0_90, %c0_91, %c0_92] : memref<1x1x16x3xf32, #tpu.memory_space<vmem>>, vector<1x1x16x3xf32>
      %95 = vector.shape_cast %94 : vector<1x1x16x3xf32> to vector<1x16x3xf32>
      %96 = vector.shape_cast %3 : vector<1x3xf32> to vector<1x1x3xf32>
      %97 = vector.broadcast %96 : vector<1x1x3xf32> to vector<1x16x3xf32>
      %98 = arith.subf %95, %97 : vector<1x16x3xf32>
      %99 = vector.shape_cast %5 : vector<1x3xf32> to vector<1x1x3xf32>
      %100 = vector.broadcast %99 : vector<1x1x3xf32> to vector<1x16x3xf32>
      %101 = arith.mulf %98, %100 : vector<1x16x3xf32>
      %c17_93 = arith.constant 17 : index
      %c1_94 = arith.constant 1 : index
      %c0_95 = arith.constant 0 : index
      %102 = vector.load %arg11[%c17_93, %c1_94, %c0_95] : memref<19x24x3xf32, #tpu.memory_space<vmem>>, vector<1x16x3xf32>
      tpu.vector_store %arg11[%c17_93, %c1_94, %c0_95], %101 {strides = array<i32>} : memref<19x24x3xf32, #tpu.memory_space<vmem>>, vector<1x16x3xf32>,
    } else {
    }
    %c0_34 = arith.constant 0 : index
    %c0_35 = arith.constant 0 : index
    %c0_36 = arith.constant 0 : index
    %35 = vector.load %arg11[%c0_34, %c0_35, %c0_36] : memref<19x24x3xf32, #tpu.memory_space<vmem>>, vector<19x24x3xf32>
    %36 = vector.shape_cast %35 : vector<19x24x3xf32> to vector<456x3xf32>
    %cst_37 = arith.constant 0.000000e+00 : f32
    %37 = vector.broadcast %cst_37 : f32 to vector<384x8xf32>
    %38 = vector.extract_strided_slice %36 {offsets = [0, 0], sizes = [384, 3], strides = [1, 1]} : vector<456x3xf32> to vector<384x3xf32>
    %c0_38 = arith.constant 0 : index
    %c0_39 = arith.constant 0 : index
    %c0_40 = arith.constant 0 : index
    %c0_41 = arith.constant 0 : index
    %39 = vector.load %arg5[%c0_38, %c0_39, %c0_40, %c0_41] : memref<3x3x3x8xf32, #tpu.memory_space<vmem>>, vector<1x1x3x8xf32>
    %40 = vector.shape_cast %39 : vector<1x1x3x8xf32> to vector<3x8xf32>
    %cst_42 = arith.constant dense<0.000000e+00> : vector<384x8xf32>
    %41 = tpu.matmul %38, %40, %cst_42 {dimension_numbers = #tpu.dot_dimension_numbers<[1], [0], [0], [1], [0, 0, 1, 1], [], []>} : vector<384x3xf32>, vector<3x8xf32>, vector<384x8xf32> -> vector<384x8xf32>
    %42 = arith.addf %37, %41 : vector<384x8xf32>
    %43 = vector.extract_strided_slice %36 {offsets = [1, 0], sizes = [384, 3], strides = [1, 1]} : vector<456x3xf32> to vector<384x3xf32>
    %c0_43 = arith.constant 0 : index
    %c1_44 = arith.constant 1 : index
    %c0_45 = arith.constant 0 : index
    %c0_46 = arith.constant 0 : index
    %44 = vector.load %arg5[%c0_43, %c1_44, %c0_45, %c0_46] : memref<3x3x3x8xf32, #tpu.memory_space<vmem>>, vector<1x1x3x8xf32>
    %45 = vector.shape_cast %44 : vector<1x1x3x8xf32> to vector<3x8xf32>
    %cst_47 = arith.constant dense<0.000000e+00> : vector<384x8xf32>
    %46 = tpu.matmul %43, %45, %cst_47 {dimension_numbers = #tpu.dot_dimension_numbers<[1], [0], [0], [1], [0, 0, 1, 1], [], []>} : vector<384x3xf32>, vector<3x8xf32>, vector<384x8xf32> -> vector<384x8xf32>
    %47 = arith.addf %42, %46 : vector<384x8xf32>
    %48 = vector.extract_strided_slice %36 {offsets = [2, 0], sizes = [384, 3], strides = [1, 1]} : vector<456x3xf32> to vector<384x3xf32>
    %c0_48 = arith.constant 0 : index
    %c2 = arith.constant 2 : index
    %c0_49 = arith.constant 0 : index
    %c0_50 = arith.constant 0 : index
    %49 = vector.load %arg5[%c0_48, %c2, %c0_49, %c0_50] : memref<3x3x3x8xf32, #tpu.memory_space<vmem>>, vector<1x1x3x8xf32>
    %50 = vector.shape_cast %49 : vector<1x1x3x8xf32> to vector<3x8xf32>
    %cst_51 = arith.constant dense<0.000000e+00> : vector<384x8xf32>
    %51 = tpu.matmul %48, %50, %cst_51 {dimension_numbers = #tpu.dot_dimension_numbers<[1], [0], [0], [1], [0, 0, 1, 1], [], []>} : vector<384x3xf32>, vector<3x8xf32>, vector<384x8xf32> -> vector<384x8xf32>
    %52 = arith.addf %47, %51 : vector<384x8xf32>
    %53 = vector.extract_strided_slice %36 {offsets = [24, 0], sizes = [384, 3], strides = [1, 1]} : vector<456x3xf32> to vector<384x3xf32>
    %c1_52 = arith.constant 1 : index
    %c0_53 = arith.constant 0 : index
    %c0_54 = arith.constant 0 : index
    %c0_55 = arith.constant 0 : index
    %54 = vector.load %arg5[%c1_52, %c0_53, %c0_54, %c0_55] : memref<3x3x3x8xf32, #tpu.memory_space<vmem>>, vector<1x1x3x8xf32>
    %55 = vector.shape_cast %54 : vector<1x1x3x8xf32> to vector<3x8xf32>
    %cst_56 = arith.constant dense<0.000000e+00> : vector<384x8xf32>
    %56 = tpu.matmul %53, %55, %cst_56 {dimension_numbers = #tpu.dot_dimension_numbers<[1], [0], [0], [1], [0, 0, 1, 1], [], []>} : vector<384x3xf32>, vector<3x8xf32>, vector<384x8xf32> -> vector<384x8xf32>
    %57 = arith.addf %52, %56 : vector<384x8xf32>
    %58 = vector.extract_strided_slice %36 {offsets = [25, 0], sizes = [384, 3], strides = [1, 1]} : vector<456x3xf32> to vector<384x3xf32>
    %c1_57 = arith.constant 1 : index
    %c1_58 = arith.constant 1 : index
    %c0_59 = arith.constant 0 : index
    %c0_60 = arith.constant 0 : index
    %59 = vector.load %arg5[%c1_57, %c1_58, %c0_59, %c0_60] : memref<3x3x3x8xf32, #tpu.memory_space<vmem>>, vector<1x1x3x8xf32>
    %60 = vector.shape_cast %59 : vector<1x1x3x8xf32> to vector<3x8xf32>
    %cst_61 = arith.constant dense<0.000000e+00> : vector<384x8xf32>
    %61 = tpu.matmul %58, %60, %cst_61 {dimension_numbers = #tpu.dot_dimension_numbers<[1], [0], [0], [1], [0, 0, 1, 1], [], []>} : vector<384x3xf32>, vector<3x8xf32>, vector<384x8xf32> -> vector<384x8xf32>
    %62 = arith.addf %57, %61 : vector<384x8xf32>
    %63 = vector.extract_strided_slice %36 {offsets = [26, 0], sizes = [384, 3], strides = [1, 1]} : vector<456x3xf32> to vector<384x3xf32>
    %c1_62 = arith.constant 1 : index
    %c2_63 = arith.constant 2 : index
    %c0_64 = arith.constant 0 : index
    %c0_65 = arith.constant 0 : index
    %64 = vector.load %arg5[%c1_62, %c2_63, %c0_64, %c0_65] : memref<3x3x3x8xf32, #tpu.memory_space<vmem>>, vector<1x1x3x8xf32>
    %65 = vector.shape_cast %64 : vector<1x1x3x8xf32> to vector<3x8xf32>
    %cst_66 = arith.constant dense<0.000000e+00> : vector<384x8xf32>
    %66 = tpu.matmul %63, %65, %cst_66 {dimension_numbers = #tpu.dot_dimension_numbers<[1], [0], [0], [1], [0, 0, 1, 1], [], []>} : vector<384x3xf32>, vector<3x8xf32>, vector<384x8xf32> -> vector<384x8xf32>
    %67 = arith.addf %62, %66 : vector<384x8xf32>
    %68 = vector.extract_strided_slice %36 {offsets = [48, 0], sizes = [384, 3], strides = [1, 1]} : vector<456x3xf32> to vector<384x3xf32>
    %c2_67 = arith.constant 2 : index
    %c0_68 = arith.constant 0 : index
    %c0_69 = arith.constant 0 : index
    %c0_70 = arith.constant 0 : index
    %69 = vector.load %arg5[%c2_67, %c0_68, %c0_69, %c0_70] : memref<3x3x3x8xf32, #tpu.memory_space<vmem>>, vector<1x1x3x8xf32>
    %70 = vector.shape_cast %69 : vector<1x1x3x8xf32> to vector<3x8xf32>
    %cst_71 = arith.constant dense<0.000000e+00> : vector<384x8xf32>
    %71 = tpu.matmul %68, %70, %cst_71 {dimension_numbers = #tpu.dot_dimension_numbers<[1], [0], [0], [1], [0, 0, 1, 1], [], []>} : vector<384x3xf32>, vector<3x8xf32>, vector<384x8xf32> -> vector<384x8xf32>
    %72 = arith.addf %67, %71 : vector<384x8xf32>
    %73 = vector.extract_strided_slice %36 {offsets = [49, 0], sizes = [384, 3], strides = [1, 1]} : vector<456x3xf32> to vector<384x3xf32>
    %c2_72 = arith.constant 2 : index
    %c1_73 = arith.constant 1 : index
    %c0_74 = arith.constant 0 : index
    %c0_75 = arith.constant 0 : index
    %74 = vector.load %arg5[%c2_72, %c1_73, %c0_74, %c0_75] : memref<3x3x3x8xf32, #tpu.memory_space<vmem>>, vector<1x1x3x8xf32>
    %75 = vector.shape_cast %74 : vector<1x1x3x8xf32> to vector<3x8xf32>
    %cst_76 = arith.constant dense<0.000000e+00> : vector<384x8xf32>
    %76 = tpu.matmul %73, %75, %cst_76 {dimension_numbers = #tpu.dot_dimension_numbers<[1], [0], [0], [1], [0, 0, 1, 1], [], []>} : vector<384x3xf32>, vector<3x8xf32>, vector<384x8xf32> -> vector<384x8xf32>
    %77 = arith.addf %72, %76 : vector<384x8xf32>
    %78 = vector.extract_strided_slice %36 {offsets = [50, 0], sizes = [384, 3], strides = [1, 1]} : vector<456x3xf32> to vector<384x3xf32>
    %c2_77 = arith.constant 2 : index
    %c2_78 = arith.constant 2 : index
    %c0_79 = arith.constant 0 : index
    %c0_80 = arith.constant 0 : index
    %79 = vector.load %arg5[%c2_77, %c2_78, %c0_79, %c0_80] : memref<3x3x3x8xf32, #tpu.memory_space<vmem>>, vector<1x1x3x8xf32>
    %80 = vector.shape_cast %79 : vector<1x1x3x8xf32> to vector<3x8xf32>
    %cst_81 = arith.constant dense<0.000000e+00> : vector<384x8xf32>
    %81 = tpu.matmul %78, %80, %cst_81 {dimension_numbers = #tpu.dot_dimension_numbers<[1], [0], [0], [1], [0, 0, 1, 1], [], []>} : vector<384x3xf32>, vector<3x8xf32>, vector<384x8xf32> -> vector<384x8xf32>
    %82 = arith.addf %77, %81 : vector<384x8xf32>
    %83 = vector.shape_cast %82 : vector<384x8xf32> to vector<16x24x8xf32>
    %84 = vector.extract_strided_slice %83 {offsets = [0, 0, 0], sizes = [16, 16, 8], strides = [1, 1, 1]} : vector<16x24x8xf32> to vector<16x16x8xf32>
    %c0_82 = arith.constant 0 : index
    %c0_83 = arith.constant 0 : index
    %85 = vector.load %arg6[%c0_82, %c0_83] : memref<1x8xf32, #tpu.memory_space<vmem>>, vector<1x8xf32>
    %86 = vector.shape_cast %85 : vector<1x8xf32> to vector<1x1x8xf32>
    %87 = vector.broadcast %86 : vector<1x1x8xf32> to vector<16x16x8xf32>
    %88 = arith.addf %84, %87 : vector<16x16x8xf32>
    %cst_84 = arith.constant 0.000000e+00 : f32
    %89 = vector.broadcast %cst_84 : f32 to vector<16x16x8xf32>
    %90 = arith.maximumf %88, %89 : vector<16x16x8xf32>
    %c0_85 = arith.constant 0 : index
    %c0_86 = arith.constant 0 : index
    %c0_87 = arith.constant 0 : index
    %c0_88 = arith.constant 0 : index
    %91 = vector.load %arg9[%c0_85, %c0_86, %c0_87, %c0_88] : memref<1x16x16x8xf32, #tpu.memory_space<vmem>>, vector<1x16x16x8xf32>
    %92 = vector.shape_cast %91 : vector<1x16x16x8xf32> to vector<16x16x8xf32>
    %93 = vector.shape_cast %90 : vector<16x16x8xf32> to vector<1x16x16x8xf32>
    tpu.vector_store %arg9[%c0_85, %c0_86, %c0_87, %c0_88], %93 {strides = array<i32>} : memref<1x16x16x8xf32, #tpu.memory_space<vmem>>, vector<1x16x16x8xf32>,
    return
  }
  func.func @transform_0(%arg0: i32, %arg1: i32) -> (i32, i32, i32, i32) {
    %c0_i32 = arith.constant 0 : i32
    %c0_i32_0 = arith.constant 0 : i32
    %c0_i32_1 = arith.constant 0 : i32
    return %arg0, %arg1, %c0_i32, %c0_i32_0 : i32, i32, i32, i32
  }
  func.func @transform_1(%arg0: i32, %arg1: i32) -> (i32, i32, i32, i32) {
    %c16_i32 = arith.constant 16 : i32
    %0 = arith.muli %arg1, %c16_i32 : i32
    %c1_i32 = arith.constant 1 : i32
    %1 = arith.subi %0, %c1_i32 : i32
    %c0_i32 = arith.constant 0 : i32
    %2 = arith.maxsi %1, %c0_i32 : i32
    %c0_i32_0 = arith.constant 0 : i32
    %c0_i32_1 = arith.constant 0 : i32
    %c0_i32_2 = arith.constant 0 : i32
    return %arg0, %2, %c0_i32_0, %c0_i32_1 : i32, i32, i32, i32
  }
  func.func @transform_2(%arg0: i32, %arg1: i32) -> (i32, i32, i32, i32) {
    %c1_i32 = arith.constant 1 : i32
    %0 = arith.addi %arg1, %c1_i32 : i32
    %c16_i32 = arith.constant 16 : i32
    %1 = arith.muli %0, %c16_i32 : i32
    %c15_i32 = arith.constant 15 : i32
    %2 = arith.minsi %1, %c15_i32 : i32
    %c0_i32 = arith.constant 0 : i32
    %c0_i32_0 = arith.constant 0 : i32
    %c0_i32_1 = arith.constant 0 : i32
    return %arg0, %2, %c0_i32, %c0_i32_0 : i32, i32, i32, i32
  }
  func.func @transform_3(%arg0: i32, %arg1: i32) -> (i32, i32, i32, i32) {
    %c0_i32 = arith.constant 0 : i32
    %c0_i32_0 = arith.constant 0 : i32
    %c0_i32_1 = arith.constant 0 : i32
    %c0_i32_2 = arith.constant 0 : i32
    %c0_i32_3 = arith.constant 0 : i32
    return %c0_i32, %c0_i32_0, %c0_i32_1, %c0_i32_2 : i32, i32, i32, i32
  }
  func.func @transform_4(%arg0: i32, %arg1: i32) -> (i32, i32) {
    %c0_i32 = arith.constant 0 : i32
    %c0_i32_0 = arith.constant 0 : i32
    %c0_i32_1 = arith.constant 0 : i32
    return %c0_i32, %c0_i32_0 : i32, i32
  }
  func.func @transform_5(%arg0: i32, %arg1: i32) -> (i32, i32, i32, i32) {
    %c0_i32 = arith.constant 0 : i32
    %c0_i32_0 = arith.constant 0 : i32
    %c0_i32_1 = arith.constant 0 : i32
    %c0_i32_2 = arith.constant 0 : i32
    %c0_i32_3 = arith.constant 0 : i32
    return %c0_i32, %c0_i32_0, %c0_i32_1, %c0_i32_2 : i32, i32, i32, i32
  }
  func.func @transform_6(%arg0: i32, %arg1: i32) -> (i32, i32, i32, i32) {
    %c0_i32 = arith.constant 0 : i32
    %c0_i32_0 = arith.constant 0 : i32
    %c0_i32_1 = arith.constant 0 : i32
    %c0_i32_2 = arith.constant 0 : i32
    %c0_i32_3 = arith.constant 0 : i32
    return %c0_i32, %c0_i32_0, %c0_i32_1, %c0_i32_2 : i32, i32, i32, i32
  }
  func.func @transform_7(%arg0: i32, %arg1: i32) -> (i32, i32, i32, i32) {
    %c0_i32 = arith.constant 0 : i32
    %c0_i32_0 = arith.constant 0 : i32
    %c0_i32_1 = arith.constant 0 : i32
    return %arg0, %arg1, %c0_i32, %c0_i32_0 : i32, i32, i32, i32
  }
  func.func @transform_8(%arg0: i32, %arg1: i32) -> (i32, i32, i32, i32) {
    %c0_i32 = arith.constant 0 : i32
    %c0_i32_0 = arith.constant 0 : i32
    %c0_i32_1 = arith.constant 0 : i32
    return %arg0, %arg1, %c0_i32, %c0_i32_0 : i32, i32, i32, i32
  }
}

</mosaic_0001>

<bundles_post_ra>
// kernel: tpu_custom_call.1
= control target key start
LH: loop header
LB: loop body
LE: loop exit
PB: predicated region body
PF: predicated region fallthrough
CT: control target
= control target key end

     0   :  { %s6294_s26 = smov 0   ;;  %s6296_s2 = smov 0   ;;  %s8525_s0 = inlined_call_operand.vmem [shape: f32[2,16,16,3], index: 0, kind: input, shape index: {}]   ;;  %s8526_s1 = inlined_call_operand.vmem [shape: f32[2,16,16,3], index: 1, kind: input, shape index: {}]   ;;  %s8527_s2 = inlined_call_operand.vmem [shape: f32[2,16,16,3], index: 2, kind: input, shape index: {}]   ;;  %s8528_s3 = inlined_call_operand.vmem [shape: f32[3,3,3,8], index: 3, kind: input, shape index: {}]   ;;  %s8529_s4 = inlined_call_operand.vmem [shape: f32[1,8], index: 4, kind: input, shape index: {}]   ;;  %s8530_s5 = inlined_call_operand.vmem [shape: f32[1,1,1,3], index: 5, kind: input, shape index: {}]   ;;  %s8531_s6 = inlined_call_operand.vmem [shape: f32[1,1,1,3], index: 6, kind: input, shape index: {}]   ;;  %s8532_s7 = inlined_call_operand.vmem [shape: f32[2,16,16,8], index: 7, kind: output, shape index: {0}]   ;;  %s8533_s8 = inlined_call_operand.vmem [shape: f32[2,16,16,3], index: 8, kind: output, shape index: {1}]  }
   0x1   :  { %s6298_s27 = smov 0  }
   0x2 LB: > { %s31_s28 = sadd.s32 1, %s6242_s2  ;;  %p4582_p0 = scmp.ge.s32.totalorder %s6246_s27, 1  ;;  %s6246_s27 = sphi %s6298_s27, %s19_s27   ;;  %s6242_s2 = sphi %s6296_s2, %s8980_s2   ;;  %s6238_s26 = sphi %s6294_s26, %s8979_s26  }
   0x3   : > { %p33_p1 = scmp.ge.s32.totalorder %s31_s28, 2  ;;  %p353_p2 = scmp.lt.s32.totalorder %s6246_s27, 3 }
   0x5   : > { %s8982_s28 = smov (%p33_p1, %s31_s28), 0  ;;  %p354_p3 = pnand %p4582_p0, %p353_p2 }
   0x7   : > { %357 = sbr.rel (%p354_p3) target bundleno = 684 (0x2ac), region = 48 }
   0xc   : > { %v4595_v0 = vld [vmem:[%s8528_s3 + $0x4] sm:$0x7]  ;;  %vm1057_vm0 = vcmask 1042432   ;;  %vm610_vm1 = vcmask 23552   ;;  %vm643_vm2 = vcmask 16384   ;;  %v6248_v1 = vmov 0.0  }
   0xd   : > { %6160 = vmatprep.subr.msk.mxu1 %vm1057_vm0, %v4595_v0  ;;  %5494 = vmatprep.subr.msk.mxu0 %vm1057_vm0, %v4595_v0  ;;  %644 = vst.msk [vmem:[#allocation2] sm:$0x1] %vm643_vm2, %v6248_v1  ;;  %645 = vst.msk [vmem:[#allocation2 + $0x18] sm:$0x1] %vm643_vm2, %v6248_v1  ;;  %p434_p4 = scmp.lt.s32.totalorder %s6238_s26, 1  ;;  %vm663_vm3 = vcmask 22528  }
   0xe   : > { %723 = vst.msk [vmem:[#allocation2 + $0x1] sm:$0xff] %vm610_vm1, %v6248_v1  ;;  %724 = vst.msk [vmem:[#allocation2 + $0x9] sm:$0xff] %vm610_vm1, %v6248_v1  ;;  %6161 = vmatpush3.msk.msra.mxu1 %vm1057_vm0, %v4595_v0  ;;  %5495 = vmatpush3.msk.msra.mxu0 %vm1057_vm0, %v4595_v0  ;;  %v6349_v2 = vld [vmem:[%s8528_s3] sm:$0x7]  ;;  %v6354_v3 = vld [vmem:[%s8528_s3 + $0x8] sm:$0x7] }
   0xf   : > { %646 = vst.msk [vmem:[#allocation2 + $0x30] sm:$0x1] %vm643_vm2, %v6248_v1  ;;  %647 = vst.msk [vmem:[#allocation2 + $0x48] sm:$0x1] %vm643_vm2, %v6248_v1  ;;  %s8984_s26 = smov (!%p434_p4, %s6238_s26), 1  ;;  %5568 = vmatprep.subr.msk.mxu1 %vm1057_vm0, %v6349_v2  ;;  %5642 = vmatprep.subr.msk.mxu0 %vm1057_vm0, %v6354_v3  ;;  %vm863_vm4 = vcmask 1046528  }
  0x10   : > { %648 = vst.msk [vmem:[#allocation2 + $0x60] sm:$0x1] %vm643_vm2, %v6248_v1  ;;  %649 = vst.msk [vmem:[#allocation2 + $0x78] sm:$0x1] %vm643_vm2, %v6248_v1  ;;  %s6379_s13 = sshll.u32 %s8984_s26, 8  ;;  %vm1740_vm5 = vcmask 1045504  }
  0x11   : > { %650 = vst.msk [vmem:[#allocation2 + $0x90] sm:$0x1] %vm643_vm2, %v6248_v1  ;;  %651 = vst.msk [vmem:[#allocation2 + $0xa8] sm:$0x1] %vm643_vm2, %v6248_v1  ;;  %v6384_v4 = vld [vmem:[%s8530_s5] ss:$0 sm:$0xff]  ;;  %s6390_s18 = scalar_lea.vmem %s8525_s0, %s6379_s13  ;;  %s6414_s23 = scalar_lea.vmem %s8533_s8, %s6379_s13 }
  0x12   : > { %652 = vst.msk [vmem:[#allocation2 + $0xc0] sm:$0x1] %vm643_vm2, %v6248_v1  ;;  %653 = vst.msk [vmem:[#allocation2 + $0xd8] sm:$0x1] %vm643_vm2, %v6248_v1  ;;  %v6395_v5 = vld [vmem:[%s8531_s6] ss:$0 sm:$0xff]  ;;  %s8390_s20 = scalar_lea.vmem %s8532_s7, %s6379_s13 }
  0x13   : > { %654 = vst.msk [vmem:[#allocation2 + $0xf0] sm:$0x1] %vm643_vm2, %v6248_v1  ;;  %655 = vst.msk [vmem:[#allocation2 + $0x108] sm:$0x1] %vm643_vm2, %v6248_v1  ;;  %v514_v6 = vld [vmem:[%s6390_s18 + $0x70] sm:$0xff]  ;;  %v515_v7 = vld [vmem:[%s6390_s18 + $0x78] sm:$0xff] }
  0x14   : > { %656 = vst.msk [vmem:[#allocation2 + $0x120] sm:$0x1] %vm643_vm2, %v6248_v1  ;;  %657 = vst.msk [vmem:[#allocation2 + $0x138] sm:$0x1] %vm643_vm2, %v6248_v1  ;;  %v500_v8 = vld [vmem:[%s6390_s18] sm:$0xff]  ;;  %v554_v11 = vsub.f32 %v514_v6, %v6384_v4  ;;  %v555_v12 = vsub.f32 %v515_v7, %v6384_v4  ;;  %v501_v18 = vld [vmem:[%s6390_s18 + $0x8] sm:$0xff] }
  0x15   : > { %658 = vst.msk [vmem:[#allocation2 + $0x150] sm:$0x1] %vm643_vm2, %v6248_v1  ;;  %659 = vst.msk [vmem:[#allocation2 + $0x168] sm:$0x1] %vm643_vm2, %v6248_v1  ;;  %v6400_v9 = vld [vmem:[#allocation2] sm:$0xff]  ;;  %v6402_v10 = vld [vmem:[#allocation2 + $0x8] sm:$0xff]  ;;  %v540_v13 = vsub.f32 %v500_v8, %v6384_v4  ;;  %v541_v25 = vsub.f32 %v501_v18, %v6384_v4 }
  0x16   : > { %660 = vst.msk [vmem:[#allocation2 + $0x180] sm:$0x1] %vm643_vm2, %v6248_v1  ;;  %661 = vst.msk [vmem:[#allocation2 + $0x198] sm:$0x1] %vm643_vm2, %v6248_v1  ;;  %v516_v14 = vld [vmem:[%s6390_s18 + $0x80] sm:$0xff]  ;;  %v864_v15 = vrot.slane %v6400_v9, 1  ;;  %v592_v21 = vmul.f32 %v6395_v5, %v554_v11  ;;  %v593_v22 = vmul.f32 %v6395_v5, %v555_v12 }
  0x17   : > { %662 = vst.msk [vmem:[#allocation2 + $0x1b0] sm:$0x1] %vm643_vm2, %v6248_v1  ;;  %v865_v16 = vrot.slane %v6402_v10, 1  ;;  %v556_v17 = vsub.f32 %v516_v14, %v6384_v4  ;;  %v517_v19 = vld [vmem:[%s6390_s18 + $0x88] sm:$0xff]  ;;  %v502_v20 = vld [vmem:[%s6390_s18 + $0x10] sm:$0xff]  ;;  %v578_v24 = vmul.f32 %v6395_v5, %v540_v13  ;;  %v503_v27 = vld [vmem:[%s6390_s18 + $0x18] sm:$0xff]  ;;  %v579_v34 = vmul.f32 %v6395_v5, %v541_v25 }
  0x18   : > { %684 = vst.msk [vmem:[#allocation2 + $0x1b1] sm:$0xff] %vm610_vm1, %v6248_v1  ;;  %741 = vst.msk [vmem:[#allocation2 + $0x199] sm:$0xff] %vm610_vm1, %v6248_v1  ;;  %v518_v26 = vld [vmem:[%s6390_s18 + $0x90] sm:$0xff]  ;;  %v519_v31 = vld [vmem:[%s6390_s18 + $0x98] sm:$0xff]  ;;  %v557_v35 = vsub.f32 %v517_v19, %v6384_v4  ;;  %v542_v36 = vsub.f32 %v502_v20, %v6384_v4  ;;  %v543_v41 = vsub.f32 %v503_v27, %v6384_v4  ;;  %vm4351_vm6 = vcmask 64512  }
  0x19   : > { %742 = vst.msk [vmem:[#allocation2 + $0x1a1] sm:$0xff] %vm610_vm1, %v6248_v1  ;;  %v866_v28 = vsel %vm863_vm4, %v864_v15, %v865_v16  ;;  %v594_v30 = vmul.f32 %v6395_v5, %v556_v17  ;;  %v504_v32 = vld [vmem:[%s6390_s18 + $0x20] sm:$0xff]  ;;  %625 = vst.msk [vmem:[%s6414_s23 + $0x70] sm:$0xff] %vm610_vm1, %v592_v21  ;;  %v558_v37 = vsub.f32 %v518_v26, %v6384_v4  ;;  %v505_v38 = vld [vmem:[%s6390_s18 + $0x28] sm:$0xff] }
  0x1a   : > { %664 = vst.msk [vmem:[#allocation2 + $0x11] sm:$0x7f] %vm663_vm3, %v6248_v1  ;;  %665 = vst.msk [vmem:[#allocation2 + $0x29] sm:$0x7f] %vm663_vm3, %v6248_v1  ;;  %v520_v33 = vld [vmem:[%s6390_s18 + $0xa0] sm:$0xff]  ;;  %5496 = vmatprep.mubr.msk.f32.mxu0 %vm610_vm1, %v866_v28  ;;  %v559_v42 = vsub.f32 %v519_v31, %v6384_v4  ;;  %v544_v43 = vsub.f32 %v504_v32, %v6384_v4  ;;  %v521_v44 = vld [vmem:[%s6390_s18 + $0xa8] sm:$0xff]  ;;  %v595_v47 = vmul.f32 %v6395_v5, %v557_v35 }
  0x1b   : > { %666 = vst.msk [vmem:[#allocation2 + $0x41] sm:$0x7f] %vm663_vm3, %v6248_v1  ;;  %667 = vst.msk [vmem:[#allocation2 + $0x59] sm:$0x7f] %vm663_vm3, %v6248_v1  ;;  %v6452_v39 = vld [vmem:[%s8528_s3 + $0x10] sm:$0x7]  ;;  %v580_v48 = vmul.f32 %v6395_v5, %v542_v36  ;;  %v596_v49 = vmul.f32 %v6395_v5, %v558_v37  ;;  %v560_v50 = vsub.f32 %v520_v33, %v6384_v4 }
  0x1c   : > { %668 = vst.msk [vmem:[#allocation2 + $0x71] sm:$0x7f] %vm663_vm3, %v6248_v1  ;;  %669 = vst.msk [vmem:[#allocation2 + $0x89] sm:$0x7f] %vm663_vm3, %v6248_v1  ;;  %v506_v45 = vld [vmem:[%s6390_s18 + $0x30] sm:$0xff]  ;;  %v507_v51 = vld [vmem:[%s6390_s18 + $0x38] sm:$0xff]  ;;  %v581_v54 = vmul.f32 %v6395_v5, %v543_v41  ;;  %v597_v55 = vmul.f32 %v6395_v5, %v559_v42  ;;  %v582_v56 = vmul.f32 %v6395_v5, %v544_v43 }
  0x1d   : > { %670 = vst.msk [vmem:[#allocation2 + $0xa1] sm:$0x7f] %vm663_vm3, %v6248_v1  ;;  %671 = vst.msk [vmem:[#allocation2 + $0xb9] sm:$0x7f] %vm663_vm3, %v6248_v1  ;;  %v522_v46 = vld [vmem:[%s6390_s18 + $0xb0] sm:$0xff]  ;;  %v523_v52 = vld [vmem:[%s6390_s18 + $0xb8] sm:$0xff]  ;;  %v545_v57 = vsub.f32 %v505_v38, %v6384_v4  ;;  %v598_v59 = vmul.f32 %v6395_v5, %v560_v50  ;;  %v561_v60 = vsub.f32 %v521_v44, %v6384_v4 }
  0x1e   : > { %672 = vst.msk [vmem:[#allocation2 + $0xd1] sm:$0x7f] %vm663_vm3, %v6248_v1  ;;  %673 = vst.msk [vmem:[#allocation2 + $0xe9] sm:$0x7f] %vm663_vm3, %v6248_v1  ;;  %v508_v53 = vld [vmem:[%s6390_s18 + $0x40] sm:$0xff]  ;;  %v546_v61 = vsub.f32 %v506_v45, %v6384_v4  ;;  %v562_v62 = vsub.f32 %v522_v46, %v6384_v4  ;;  %v509_v63 = vld [vmem:[%s6390_s18 + $0x48] sm:$0xff] }
  0x1f   : > { %674 = vst.msk [vmem:[#allocation2 + $0x101] sm:$0x7f] %vm663_vm3, %v6248_v1  ;;  %675 = vst.msk [vmem:[#allocation2 + $0x119] sm:$0x7f] %vm663_vm3, %v6248_v1  ;;  %v524_v58 = vld [vmem:[%s6390_s18 + $0xc0] sm:$0xff]  ;;  %v583_v0 = vmul.f32 %v6395_v5, %v545_v57  ;;  %v548_v6 = vsub.f32 %v508_v53, %v6384_v4  ;;  %v599_v7 = vmul.f32 %v6395_v5, %v561_v60  ;;  %v525_v13 = vld [vmem:[%s6390_s18 + $0xc8] sm:$0xff] }
  0x20   : > { %676 = vst.msk [vmem:[#allocation2 + $0x131] sm:$0x7f] %vm663_vm3, %v6248_v1  ;;  %677 = vst.msk [vmem:[#allocation2 + $0x149] sm:$0x7f] %vm663_vm3, %v6248_v1  ;;  %v584_v8 = vmul.f32 %v6395_v5, %v546_v61  ;;  %v600_v11 = vmul.f32 %v6395_v5, %v562_v62  ;;  %v564_v12 = vsub.f32 %v524_v58, %v6384_v4 }
  0x21   : > { %678 = vst.msk [vmem:[#allocation2 + $0x161] sm:$0x7f] %vm663_vm3, %v6248_v1  ;;  %679 = vst.msk [vmem:[#allocation2 + $0x179] sm:$0x7f] %vm663_vm3, %v6248_v1  ;;  %v6422_v23 = vld [vmem:[#allocation2 + $0x10] sm:$0xff]  ;;  %v586_v19 = vmul.f32 %v6395_v5, %v548_v6  ;;  %v549_v20 = vsub.f32 %v509_v63, %v6384_v4 }
  0x22   : > { %680 = vst.msk [vmem:[#allocation2 + $0x191] sm:$0x7f] %vm663_vm3, %v6248_v1  ;;  %681 = vst.msk [vmem:[#allocation2 + $0x1a9] sm:$0x7f] %vm663_vm3, %v6248_v1  ;;  %v867_v29 = vrot.slane %v6422_v23, 1  ;;  %v547_v1 = vsub.f32 %v507_v51, %v6384_v4  ;;  %v602_v27 = vmul.f32 %v6395_v5, %v564_v12 }
  0x23   : > { %626 = vst.msk [vmem:[%s6414_s23 + $0x78] sm:$0xff] %vm610_vm1, %v593_v22  ;;  %701 = vst.msk [vmem:[#allocation2 + $0xc1] sm:$0xff] %vm610_vm1, %v592_v21  ;;  %v587_v33 = vmul.f32 %v6395_v5, %v549_v20 }
  0x24   : > { %702 = vst.msk [vmem:[#allocation2 + $0xc9] sm:$0xff] %vm610_vm1, %v593_v22  ;;  %611 = vst.msk [vmem:[%s6414_s23] sm:$0xff] %vm610_vm1, %v578_v24  ;;  %v868_v40 = vsel %vm863_vm4, %v865_v16, %v867_v29  ;;  %v585_v17 = vmul.f32 %v6395_v5, %v547_v1 }
  0x25   : > { %687 = vst.msk [vmem:[#allocation2 + $0x19] sm:$0xff] %vm610_vm1, %v578_v24  ;;  %627 = vst.msk [vmem:[%s6414_s23 + $0x80] sm:$0xff] %vm610_vm1, %v594_v30  ;;  %5497 = vmatmul.mubr.msk.f32.vlgmr.msra.gmra.mxu0 %vm610_vm1, %v868_v40  ;;  %v6584_v40 = vld [vmem:[%s8528_s3 + $0xc] sm:$0x7] }
  0x26   : > { %703 = vst.msk [vmem:[#allocation2 + $0xd9] sm:$0xff] %vm610_vm1, %v594_v30  ;;  %612 = vst.msk [vmem:[%s6414_s23 + $0x8] sm:$0xff] %vm610_vm1, %v579_v34  ;;  %5643 = vmatpush3.msk.msra.mxu0 %vm1057_vm0, %v6354_v3  ;;  %v563_v3 = vsub.f32 %v523_v52, %v6384_v4 }
  0x27   : > { %688 = vst.msk [vmem:[#allocation2 + $0x21] sm:$0xff] %vm610_vm1, %v579_v34  ;;  %628 = vst.msk [vmem:[%s6414_s23 + $0x88] sm:$0xff] %vm610_vm1, %v595_v47  ;;  %5790 = vmatprep.subr.msk.mxu0 %vm1057_vm0, %v6452_v39  ;;  %v565_v34 = vsub.f32 %v525_v13, %v6384_v4 }
  0x28   : > { %704 = vst.msk [vmem:[#allocation2 + $0xe1] sm:$0xff] %vm610_vm1, %v595_v47  ;;  %613 = vst.msk [vmem:[%s6414_s23 + $0x10] sm:$0xff] %vm610_vm1, %v580_v48  ;;  %v601_v18 = vmul.f32 %v6395_v5, %v563_v3 }
  0x29   : > { %689 = vst.msk [vmem:[#allocation2 + $0x31] sm:$0xff] %vm610_vm1, %v580_v48  ;;  %629 = vst.msk [vmem:[%s6414_s23 + $0x90] sm:$0xff] %vm610_vm1, %v596_v49  ;;  %v603_v46 = vmul.f32 %v6395_v5, %v565_v34 }
  0x2a   : > { %705 = vst.msk [vmem:[#allocation2 + $0xf1] sm:$0xff] %vm610_vm1, %v596_v49  ;;  %614 = vst.msk [vmem:[%s6414_s23 + $0x18] sm:$0xff] %vm610_vm1, %v581_v54  ;;  %v6521_v14 = vld [vmem:[#allocation2 + $0xc0] sm:$0xff] }
  0x2b   : > { %690 = vst.msk [vmem:[#allocation2 + $0x39] sm:$0xff] %vm610_vm1, %v581_v54  ;;  %630 = vst.msk [vmem:[%s6414_s23 + $0x98] sm:$0xff] %vm610_vm1, %v597_v55  ;;  %v6523_v15 = vld [vmem:[#allocation2 + $0xc8] sm:$0xff]  ;;  %v6525_v16 = vld [vmem:[#allocation2 + $0xd0] sm:$0xff]  ;;  %v8534_v21 = vrot.slane %v6521_v14, 1 }
  0x2c   : > { %706 = vst.msk [vmem:[#allocation2 + $0xf9] sm:$0xff] %vm610_vm1, %v597_v55  ;;  %615 = vst.msk [vmem:[%s6414_s23 + $0x20] sm:$0xff] %vm610_vm1, %v582_v56  ;;  %v913_v22 = vrot.slane %v6523_v15, 1  ;;  %v915_v24 = vrot.slane %v6525_v16, 1  ;;  %v6537_v25 = vld [vmem:[#allocation2 + $0x18] sm:$0xff] }
  0x2d   : > { %691 = vst.msk [vmem:[#allocation2 + $0x49] sm:$0xff] %vm610_vm1, %v582_v56  ;;  %631 = vst.msk [vmem:[%s6414_s23 + $0xa0] sm:$0xff] %vm610_vm1, %v598_v59  ;;  %v6539_v26 = vld [vmem:[#allocation2 + $0xd8] sm:$0xff]  ;;  %v869_v28 = vrot.slane %v6537_v25, 1 }
  0x2e   : > { %707 = vst.msk [vmem:[#allocation2 + $0x109] sm:$0xff] %vm610_vm1, %v598_v59  ;;  %616 = vst.msk [vmem:[%s6414_s23 + $0x28] sm:$0xff] %vm610_vm1, %v583_v0  ;;  %v917_v30 = vrot.slane %v6539_v26, 1  ;;  %v6553_v31 = vld [vmem:[#allocation2 + $0x20] sm:$0xff]  ;;  %v6555_v32 = vld [vmem:[#allocation2 + $0x28] sm:$0xff]  ;;  %v6571_v35 = vsel %vm863_vm4, %v8534_v21, %v913_v22  ;;  %v6574_v36 = vsel %vm863_vm4, %v913_v22, %v915_v24 }
  0x2f   : > { %692 = vst.msk [vmem:[#allocation2 + $0x51] sm:$0xff] %vm610_vm1, %v583_v0  ;;  %632 = vst.msk [vmem:[%s6414_s23 + $0xa8] sm:$0xff] %vm610_vm1, %v599_v7  ;;  %v871_v37 = vrot.slane %v6553_v31, 1  ;;  %v873_v38 = vrot.slane %v6555_v32, 1  ;;  %5532 = vmatprep.mubr.msk.f32.mxu1 %vm610_vm1, %v6571_v35  ;;  %v870_v41 = vsel %vm863_vm4, %v867_v29, %v869_v28  ;;  %v6594_v43 = vld [vmem:[#allocation2 + $0xe0] sm:$0xff]  ;;  %v6596_v44 = vld [vmem:[#allocation2 + $0xe8] sm:$0xff] }
  0x30   : > { %708 = vst.msk [vmem:[#allocation2 + $0x111] sm:$0xff] %vm610_vm1, %v599_v7  ;;  %617 = vst.msk [vmem:[%s6414_s23 + $0x30] sm:$0xff] %vm610_vm1, %v584_v8  ;;  %v6592_v42 = vsel %vm863_vm4, %v915_v24, %v917_v30  ;;  %v6598_v45 = vld [vmem:[#allocation2 + $0x30] sm:$0xff]  ;;  %5533 = vmatmul.mubr.msk.f32.vlgmr.msra.gmra.mxu1 %vm610_vm1, %v6574_v36  ;;  %5499 = vmatprep.mubr.msk.f32.mxu0 %vm610_vm1, %v870_v41  ;;  %v919_v47 = vrot.slane %v6594_v43, 1  ;;  %v921_v49 = vrot.slane %v6596_v44, 1 }
  0x31   : > { %693 = vst.msk [vmem:[#allocation2 + $0x61] sm:$0xff] %vm610_vm1, %v584_v8  ;;  %633 = vst.msk [vmem:[%s6414_s23 + $0xb0] sm:$0xff] %vm610_vm1, %v600_v11  ;;  %v6608_v29 = vsel %vm863_vm4, %v869_v28, %v871_v37  ;;  %v6612_v48 = vsel %vm863_vm4, %v871_v37, %v873_v38  ;;  %v6615_v50 = vld [vmem:[#allocation2 + $0xf0] sm:$0xff]  ;;  %5569 = vmatpush3.msk.msra.mxu1 %vm1057_vm0, %v6349_v2  ;;  %5535 = vmatprep.mubr.msk.f32.mxu1 %vm610_vm1, %v6592_v42  ;;  %v875_v53 = vrot.slane %v6598_v45, 1 }
  0x32   : > { %709 = vst.msk [vmem:[#allocation2 + $0x121] sm:$0xff] %vm610_vm1, %v600_v11  ;;  %618 = vst.msk [vmem:[%s6414_s23 + $0x38] sm:$0xff] %vm610_vm1, %v585_v17  ;;  %v6617_v51 = vld [vmem:[#allocation2 + $0x38] sm:$0xff]  ;;  %v923_v54 = vrot.slane %v6615_v50, 1  ;;  %v6628_v56 = vld [vmem:[#allocation2 + $0x40] sm:$0xff]  ;;  %5500 = vmatmul.mubr.msk.f32.gmra.mxu0 %vm610_vm1, %v6608_v29  ;;  %v6636_v2 = vsel %vm863_vm4, %v917_v30, %v919_v47  ;;  %v6639_v57 = vsel %vm863_vm4, %v919_v47, %v921_v49  ;;  %5716 = vmatprep.subr.msk.mxu1 %vm1057_vm0, %v6584_v40 }
  0x33   : > { %694 = vst.msk [vmem:[#allocation2 + $0x69] sm:$0xff] %vm610_vm1, %v585_v17  ;;  %634 = vst.msk [vmem:[%s6414_s23 + $0xb8] sm:$0xff] %vm610_vm1, %v601_v18  ;;  %v6619_v52 = vld [vmem:[#allocation2 + $0xf8] sm:$0xff]  ;;  %v877_v55 = vrot.slane %v6617_v51, 1  ;;  %v6642_v59 = vld [vmem:[#allocation2 + $0x100] sm:$0xff]  ;;  %5502 = vmatprep.mubr.msk.f32.mxu0 %vm610_vm1, %v6612_v48  ;;  %v6651_v61 = vsel %vm863_vm4, %v873_v38, %v875_v53  ;;  %v879_v62 = vrot.slane %v6628_v56, 1 }
  0x34   : > { %710 = vst.msk [vmem:[#allocation2 + $0x129] sm:$0xff] %vm610_vm1, %v601_v18  ;;  %619 = vst.msk [vmem:[%s6414_s23 + $0x40] sm:$0xff] %vm610_vm1, %v586_v19  ;;  %v925_v58 = vrot.slane %v6619_v52, 1  ;;  %v6644_v60 = vld [vmem:[#allocation2 + $0x48] sm:$0xff]  ;;  %5536 = vmatmul.mubr.msk.f32.gmra.mxu1 %vm610_vm1, %v6636_v2  ;;  %v6671_v8 = vsel %vm863_vm4, %v921_v49, %v923_v54  ;;  %v927_v11 = vrot.slane %v6642_v59, 1 }
  0x35   : > { %695 = vst.msk [vmem:[#allocation2 + $0x79] sm:$0xff] %vm610_vm1, %v586_v19  ;;  %8699 = vst [vmem:[#allocation3_spill] sm:$0xff] %v6571_v35  ;;  %v6654_v63 = vld [vmem:[#allocation2 + $0x108] sm:$0xff]  ;;  %v6659_v0 = vsel %vm863_vm4, %v875_v53, %v877_v55  ;;  %v881_v1 = vrot.slane %v6644_v60, 1  ;;  %5538 = vmatprep.mubr.msk.f32.mxu1 %vm610_vm1, %v6639_v57  ;;  %v510_v19 = vld [vmem:[%s6390_s18 + $0x50] sm:$0xff]  ;;  %v6688_v20 = vsel %vm863_vm4, %v877_v55, %v879_v62 }
  0x36   : > { %8700 = vst [vmem:[#allocation4_spill] sm:$0xff] %v6574_v36  ;;  %635 = vst.msk [vmem:[%s6414_s23 + $0xc0] sm:$0xff] %vm610_vm1, %v602_v27  ;;  %v6662_v3 = vld [vmem:[#allocation2 + $0x50] sm:$0xff]  ;;  %v6666_v7 = vld [vmem:[#allocation2 + $0x58] sm:$0xff]  ;;  %5503 = vmatmul.mubr.msk.f32.gmra.mxu0 %vm610_vm1, %v6651_v61  ;;  %v6681_v17 = vsel %vm863_vm4, %v923_v54, %v925_v58  ;;  %v929_v18 = vrot.slane %v6654_v63, 1  ;;  %v6707_v38 = vsel %vm863_vm4, %v925_v58, %v927_v11 }
  0x37   : > { %711 = vst.msk [vmem:[#allocation2 + $0x139] sm:$0xff] %vm610_vm1, %v602_v27  ;;  %8701 = vst [vmem:[#allocation5_spill] sm:$0xff] %v6592_v42  ;;  %v6664_v6 = vld [vmem:[#allocation2 + $0x110] sm:$0xff]  ;;  %v6674_v12 = vld [vmem:[#allocation2 + $0x118] sm:$0xff]  ;;  %5505 = vmatprep.mubr.msk.f32.mxu0 %vm610_vm1, %v6659_v0  ;;  %v883_v22 = vrot.slane %v6662_v3, 1  ;;  %v885_v27 = vrot.slane %v6666_v7, 1  ;;  %v6698_v30 = vsel %vm863_vm4, %v879_v62, %v881_v1  ;;  %v550_v47 = vsub.f32 %v510_v19, %v6384_v4 }
  0x38   : > { %620 = vst.msk [vmem:[%s6414_s23 + $0x48] sm:$0xff] %vm610_vm1, %v587_v33  ;;  %696 = vst.msk [vmem:[#allocation2 + $0x81] sm:$0xff] %vm610_vm1, %v587_v33  ;;  %v6676_v13 = vld [vmem:[#allocation2 + $0x60] sm:$0xff]  ;;  %v931_v24 = vrot.slane %v6664_v6, 1  ;;  %5539 = vmatmul.mubr.msk.f32.gmra.mxu1 %vm610_vm1, %v6671_v8  ;;  %v933_v33 = vrot.slane %v6674_v12, 1  ;;  %v6717_v49 = vsel %vm863_vm4, %v927_v11, %v929_v18  ;;  %v526_v54 = vld [vmem:[%s6390_s18 + $0xd0] sm:$0xff] }
  0x39   : > { %8702 = vst [vmem:[#allocation6_spill] sm:$0xff] %v6608_v29  ;;  %8703 = vst [vmem:[#allocation7_spill] sm:$0xff] %v6612_v48  ;;  %v887_v34 = vrot.slane %v6676_v13, 1  ;;  %v6702_v37 = vld [vmem:[#allocation2 + $0x120] sm:$0xff]  ;;  %5541 = vmatprep.mubr.msk.f32.mxu1 %vm610_vm1, %v6681_v17  ;;  %v511_v55 = vld [vmem:[%s6390_s18 + $0x58] sm:$0xff]  ;;  %v6726_v62 = vsel %vm863_vm4, %v881_v1, %v883_v22  ;;  %v6732_v21 = vsel %vm863_vm4, %v883_v22, %v885_v27 }
  0x3a   : > { %636 = vst.msk [vmem:[%s6414_s23 + $0xc8] sm:$0xff] %vm610_vm1, %v603_v46  ;;  %712 = vst.msk [vmem:[#allocation2 + $0x141] sm:$0xff] %vm610_vm1, %v603_v46  ;;  %v6693_v28 = vld [vmem:[#allocation2 + $0x68] sm:$0xff]  ;;  %v6711_v46 = vld [vmem:[#allocation2 + $0x70] sm:$0xff]  ;;  %5506 = vmatmul.mubr.msk.f32.gmra.mxu0 %vm610_vm1, %v6688_v20  ;;  %v6729_v19 = vsel %vm863_vm4, %v929_v18, %v931_v24  ;;  %v935_v11 = vrot.slane %v6702_v37, 1  ;;  %v6742_v1 = vsel %vm863_vm4, %v931_v24, %v933_v33 }
  0x3b   : > { %8704 = vst [vmem:[#allocation8_spill] sm:$0xff] %v6636_v2  ;;  %8705 = vst [vmem:[#allocation9_spill] sm:$0xff] %v6639_v57  ;;  %v6709_v41 = vld [vmem:[#allocation2 + $0x128] sm:$0xff]  ;;  %v527_v58 = vld [vmem:[%s6390_s18 + $0xd8] sm:$0xff]  ;;  %5508 = vmatprep.mubr.msk.f32.mxu0 %vm610_vm1, %v6698_v30  ;;  %v6745_v18 = vsel %vm863_vm4, %v885_v27, %v887_v34  ;;  %v891_v57 = vrot.slane %v6711_v46, 1  ;;  %v588_v42 = vmul.f32 %v6395_v5, %v550_v47  ;;  %v8719_v22 = vrot.slane %v6693_v28, 1 }
  0x3c   : > { %8706 = vst [vmem:[#allocation10_spill] sm:$0xff] %v6651_v61  ;;  %8707 = vst [vmem:[#allocation11_spill] sm:$0xff] %v6659_v0  ;;  %v6735_v53 = vld [vmem:[#allocation2 + $0x78] sm:$0xff]  ;;  %5542 = vmatmul.mubr.msk.f32.gmra.mxu1 %vm610_vm1, %v6707_v38  ;;  %v513_v2 = vld [vmem:[%s6390_s18 + $0x68] sm:$0xff]  ;;  %v566_v36 = vsub.f32 %v526_v54, %v6384_v4  ;;  %v567_v24 = vsub.f32 %v527_v58, %v6384_v4 }
  0x3d   : > { %8708 = vst [vmem:[#allocation12_spill] sm:$0xff] %v6671_v8  ;;  %8709 = vst [vmem:[#allocation13_spill] sm:$0xff] %v6681_v17  ;;  %v512_v17 = vld [vmem:[%s6390_s18 + $0x60] sm:$0xff]  ;;  %5544 = vmatprep.mubr.msk.f32.mxu1 %vm610_vm1, %v6717_v49  ;;  %v529_v35 = vld [vmem:[%s6390_s18 + $0xe8] sm:$0xff]  ;;  %v893_v47 = vrot.slane %v6735_v53, 1 }
  0x3e   : > { %8710 = vst [vmem:[#allocation14_spill] sm:$0xff] %v6688_v20  ;;  %8711 = vst [vmem:[#allocation15_spill] sm:$0xff] %v6698_v30  ;;  %v528_v8 = vld [vmem:[%s6390_s18 + $0xe0] sm:$0xff]  ;;  %v530_v27 = vld [vmem:[%s6390_s18 + $0xf0] sm:$0xff]  ;;  %5509 = vmatmul.mubr.msk.f32.gmra.mxu0 %vm610_vm1, %v6726_v62  ;;  %v6763_v30 = vsel %vm863_vm4, %v887_v34, %v8719_v22  ;;  %v552_v54 = vsub.f32 %v512_v17, %v6384_v4  ;;  %v604_v34 = vmul.f32 %v6395_v5, %v566_v36 }
  0x3f   : > { %8712 = vst [vmem:[#allocation16_spill] sm:$0xff] %v6707_v38  ;;  %8713 = vst [vmem:[#allocation17_spill] sm:$0xff] %v6717_v49  ;;  %v551_v38 = vsub.f32 %v511_v55, %v6384_v4  ;;  %v6765_v20 = vld [vmem:[#allocation2 + $0x130] sm:$0xff]  ;;  %v568_v55 = vsub.f32 %v528_v8, %v6384_v4  ;;  %5511 = vmatprep.mubr.msk.f32.mxu0 %vm610_vm1, %v6732_v21  ;;  %v6772_v58 = vld [vmem:[#allocation2 + $0x138] sm:$0xff]  ;;  %v605_v49 = vmul.f32 %v6395_v5, %v567_v24 }
  0x40   : > { %8714 = vst [vmem:[#allocation18_spill] sm:$0xff] %v6726_v62  ;;  %8715 = vst [vmem:[#allocation19_spill] sm:$0xff] %v6729_v19  ;;  %v553_v8 = vsub.f32 %v513_v2, %v6384_v4  ;;  %5545 = vmatmul.mubr.msk.f32.gmra.mxu1 %vm610_vm1, %v6729_v19  ;;  %v6783_v17 = vld [vmem:[#allocation2 + $0x80] sm:$0xff]  ;;  %v570_v36 = vsub.f32 %v530_v27, %v6384_v4  ;;  %v939_v2 = vrot.slane %v6765_v20, 1  ;;  %v6795_v24 = vld [vmem:[#allocation2 + $0x88] sm:$0xff] }
  0x41   : > { %8716 = vst [vmem:[#allocation20_spill] sm:$0xff] %v6732_v21  ;;  %8717 = vst [vmem:[#allocation21_spill] sm:$0xff] %v6742_v1  ;;  %v589_v22 = vmul.f32 %v6395_v5, %v551_v38  ;;  %v590_v21 = vmul.f32 %v6395_v5, %v552_v54  ;;  %v606_v62 = vmul.f32 %v6395_v5, %v568_v55  ;;  %5547 = vmatprep.mubr.msk.f32.mxu1 %vm610_vm1, %v6742_v1  ;;  %v6815_v55 = vld [vmem:[#allocation2 + $0x140] sm:$0xff] }
  0x42   : > { %8718 = vst [vmem:[#allocation22_spill] sm:$0xff] %v6745_v18  ;;  %8720 = vst [vmem:[#allocation23_spill] sm:$0xff] %v6763_v30  ;;  %v6792_v38 = vsel %vm863_vm4, %v933_v33, %v935_v11  ;;  %5512 = vmatmul.mubr.msk.f32.gmra.mxu0 %vm610_vm1, %v6745_v18  ;;  %v8722_v33 = vrot.slane %v6709_v41, 1  ;;  %v941_v54 = vrot.slane %v6772_v58, 1 }
  0x43   : > { %621 = vst.msk [vmem:[%s6414_s23 + $0x50] sm:$0xff] %vm610_vm1, %v588_v42  ;;  %697 = vst.msk [vmem:[#allocation2 + $0x91] sm:$0xff] %vm610_vm1, %v588_v42  ;;  %v569_v42 = vsub.f32 %v529_v35, %v6384_v4  ;;  %v591_v35 = vmul.f32 %v6395_v5, %v553_v8  ;;  %5514 = vmatprep.mubr.msk.f32.mxu0 %vm610_vm1, %v6763_v30  ;;  %v895_v8 = vrot.slane %v6783_v17, 1 }
  0x44   : > { %8721 = vst [vmem:[#allocation24_spill] sm:$0xff] %v6792_v38  ;;  %637 = vst.msk [vmem:[%s6414_s23 + $0xd0] sm:$0xff] %vm610_vm1, %v604_v34  ;;  %v6812_v27 = vsel %vm863_vm4, %v935_v11, %v8722_v33  ;;  %v8724_v11 = vrot.slane %v6693_v28, 1  ;;  %5548 = vmatmul.mubr.msk.f32.gmra.mxu1 %vm610_vm1, %v6792_v38 }
  0x45   : > { %713 = vst.msk [vmem:[#allocation2 + $0x151] sm:$0xff] %vm610_vm1, %v604_v34  ;;  %622 = vst.msk [vmem:[%s6414_s23 + $0x58] sm:$0xff] %vm610_vm1, %v589_v22  ;;  %v608_v34 = vmul.f32 %v6395_v5, %v570_v36  ;;  %5550 = vmatprep.mubr.msk.f32.mxu1 %vm610_vm1, %v6812_v27  ;;  %v8727_v36 = vmov %v8722_v33  ;;  %v6861_v33 = vsel %vm863_vm4, %v939_v2, %v941_v54 }
  0x46   : > { %698 = vst.msk [vmem:[#allocation2 + $0x99] sm:$0xff] %vm610_vm1, %v589_v22  ;;  %638 = vst.msk [vmem:[%s6414_s23 + $0xd8] sm:$0xff] %vm610_vm1, %v605_v49  ;;  %v6830_v22 = vsel %vm863_vm4, %v8724_v11, %v891_v57 }
  0x47   : > { %714 = vst.msk [vmem:[#allocation2 + $0x159] sm:$0xff] %vm610_vm1, %v605_v49  ;;  %8723 = vst [vmem:[#allocation25_spill] sm:$0xff] %v6812_v27  ;;  %v607_v49 = vmul.f32 %v6395_v5, %v569_v42  ;;  %v897_v42 = vrot.slane %v6795_v24, 1  ;;  %5515 = vmatmul.mubr.msk.f32.gmra.mxu0 %vm610_vm1, %v6830_v22 }
  0x48   : > { %623 = vst.msk [vmem:[%s6414_s23 + $0x60] sm:$0xff] %vm610_vm1, %v590_v21  ;;  %699 = vst.msk [vmem:[#allocation2 + $0xa9] sm:$0xff] %vm610_vm1, %v590_v21  ;;  %v6833_v21 = vld [vmem:[#allocation2 + $0x148] sm:$0xff] }
  0x49   : > { %639 = vst.msk [vmem:[%s6414_s23 + $0xe0] sm:$0xff] %vm610_vm1, %v606_v62  ;;  %715 = vst.msk [vmem:[#allocation2 + $0x169] sm:$0xff] %vm610_vm1, %v606_v62  ;;  %v6841_v62 = vsel %vm863_vm4, %v891_v57, %v893_v47  ;;  %v943_v57 = vrot.slane %v6815_v55, 1  ;;  %v6875_v27 = vsel %vm863_vm4, %v895_v8, %v897_v42 }
  0x4a   : > { %8725 = vst [vmem:[#allocation26_spill] sm:$0xff] %v6830_v22  ;;  %624 = vst.msk [vmem:[%s6414_s23 + $0x68] sm:$0xff] %vm610_vm1, %v591_v35  ;;  %v6864_v11 = vld [vmem:[#allocation2 + $0x90] sm:$0xff]  ;;  %5517 = vmatprep.mubr.msk.f32.mxu0 %vm610_vm1, %v6841_v62 }
  0x4b   : > { %700 = vst.msk [vmem:[#allocation2 + $0xb1] sm:$0xff] %vm610_vm1, %v591_v35  ;;  %8726 = vst [vmem:[#allocation27_spill] sm:$0xff] %v6841_v62  ;;  %v6855_v35 = vsel %vm863_vm4, %v8727_v36, %v939_v2  ;;  %v899_v36 = vrot.slane %v6864_v11, 1 }
  0x4c   : > { %640 = vst.msk [vmem:[%s6414_s23 + $0xe8] sm:$0xff] %vm610_vm1, %v607_v49  ;;  %716 = vst.msk [vmem:[#allocation2 + $0x171] sm:$0xff] %vm610_vm1, %v607_v49  ;;  %v945_v49 = vrot.slane %v6833_v21, 1  ;;  %5551 = vmatmul.mubr.msk.f32.gmra.mxu1 %vm610_vm1, %v6855_v35  ;;  %v6877_v2 = vld [vmem:[#allocation2 + $0x150] sm:$0xff] }
  0x4d   : > { %641 = vst.msk [vmem:[%s6414_s23 + $0xf0] sm:$0xff] %vm610_vm1, %v608_v34  ;;  %717 = vst.msk [vmem:[#allocation2 + $0x181] sm:$0xff] %vm610_vm1, %v608_v34  ;;  %v6869_v34 = vsel %vm863_vm4, %v893_v47, %v895_v8  ;;  %v6879_v38 = vld [vmem:[#allocation2 + $0x98] sm:$0xff]  ;;  %5553 = vmatprep.mubr.msk.f32.mxu1 %vm610_vm1, %v6861_v33  ;;  %v6886_v47 = vsel %vm863_vm4, %v941_v54, %v943_v57  ;;  %v947_v19 = vrot.slane %v6877_v2, 1 }
  0x4e   : > { %8728 = vst [vmem:[#allocation28_spill] sm:$0xff] %v6855_v35  ;;  %8729 = vst [vmem:[#allocation29_spill] sm:$0xff] %v6861_v33  ;;  %v6881_v1 = vld [vmem:[#allocation2 + $0x158] sm:$0xff]  ;;  %v901_v62 = vrot.slane %v6879_v38, 1  ;;  %v6890_v35 = vld [vmem:[#allocation2 + $0xa0] sm:$0xff]  ;;  %5518 = vmatmul.mubr.msk.f32.gmra.mxu0 %vm610_vm1, %v6869_v34  ;;  %v6897_v22 = vsel %vm863_vm4, %v943_v57, %v945_v49  ;;  %v6905_v54 = vsel %vm863_vm4, %v897_v42, %v899_v36 }
  0x4f   : > { %8730 = vst [vmem:[#allocation30_spill] sm:$0xff] %v6869_v34  ;;  %8731 = vst [vmem:[#allocation31_spill] sm:$0xff] %v6875_v27  ;;  %v6892_v8 = vld [vmem:[#allocation2 + $0xa8] sm:$0xff]  ;;  %v949_v30 = vrot.slane %v6881_v1, 1  ;;  %v6900_v33 = vld [vmem:[#allocation2 + $0x160] sm:$0xff]  ;;  %5520 = vmatprep.mubr.msk.f32.mxu0 %vm610_vm1, %v6875_v27  ;;  %v903_v18 = vrot.slane %v6890_v35, 1  ;;  %v6921_v42 = vsel %vm863_vm4, %v945_v49, %v947_v19 }
  0x50   : > { %8732 = vst [vmem:[#allocation32_spill] sm:$0xff] %v6886_v47  ;;  %8733 = vst [vmem:[#allocation33_spill] sm:$0xff] %v6897_v22  ;;  %v6908_v0 = vld [vmem:[#allocation2 + $0x168] sm:$0xff]  ;;  %5554 = vmatmul.mubr.msk.f32.gmra.mxu1 %vm610_vm1, %v6886_v47  ;;  %v6913_v57 = vsel %vm863_vm4, %v899_v36, %v901_v62  ;;  %v905_v34 = vrot.slane %v6892_v8, 1  ;;  %v951_v27 = vrot.slane %v6900_v33, 1 }
  0x51   : > { %8734 = vst [vmem:[#allocation34_spill] sm:$0xff] %v6900_v33  ;;  %8735 = vst [vmem:[#allocation35_spill] sm:$0xff] %v6905_v54  ;;  %5556 = vmatprep.mubr.msk.f32.mxu1 %vm610_vm1, %v6897_v22  ;;  %v6929_v36 = vsel %vm863_vm4, %v947_v19, %v949_v30  ;;  %v953_v47 = vrot.slane %v6908_v0, 1  ;;  %v6937_v49 = vsel %vm863_vm4, %v901_v62, %v903_v18 }
  0x52   : > { %8736 = vst [vmem:[#allocation36_spill] sm:$0xff] %v6908_v0  ;;  %8737 = vst [vmem:[#allocation37_spill] sm:$0xff] %v6913_v57  ;;  %v6916_v61 = vld [vmem:[#allocation2 + $0xb0] sm:$0xff]  ;;  %v6924_v48 = vld [vmem:[#allocation2 + $0xb8] sm:$0xff]  ;;  %5521 = vmatmul.mubr.msk.f32.gmra.mxu0 %vm610_vm1, %v6905_v54  ;;  %v6945_v19 = vsel %vm863_vm4, %v903_v18, %v905_v34 }
  0x53   : > { %8738 = vst [vmem:[#allocation38_spill] sm:$0xff] %v6921_v42  ;;  %8739 = vst [vmem:[#allocation39_spill] sm:$0xff] %v6929_v36  ;;  %v6932_v29 = vld [vmem:[#allocation2 + $0x170] sm:$0xff]  ;;  %5523 = vmatprep.mubr.msk.f32.mxu0 %vm610_vm1, %v6913_v57  ;;  %v907_v22 = vrot.slane %v6916_v61, 1  ;;  %v6940_v33 = vld [vmem:[#allocation2 + $0x178] sm:$0xff]  ;;  %v909_v54 = vrot.slane %v6924_v48, 1  ;;  %v6951_v57 = vsel %vm863_vm4, %v949_v30, %v951_v27  ;;  %v6957_v0 = vsel %vm863_vm4, %v951_v27, %v953_v47 }
  0x54   : > { %8740 = vst [vmem:[#allocation40_spill] sm:$0xff] %v6937_v49  ;;  %8741 = vst [vmem:[#allocation41_spill] sm:$0xff] %v6940_v33  ;;  %5557 = vmatmul.mubr.msk.f32.gmra.mxu1 %vm610_vm1, %v6921_v42  ;;  %v955_v62 = vrot.slane %v6932_v29, 1  ;;  %v957_v42 = vrot.slane %v6940_v33, 1  ;;  %v6960_v18 = vld [vmem:[#allocation2 + $0x180] sm:$0xff]  ;;  %v1742_v27 = vrot.slane %v6402_v10, 2 }
  0x55   : > { %8742 = vst [vmem:[#allocation42_spill] sm:$0xff] %v6945_v19  ;;  %5559 = vmatprep.mubr.msk.f32.mxu1 %vm610_vm1, %v6929_v36  ;;  %8743 = vst [vmem:[#allocation43_spill] sm:$0xff] %v6951_v57  ;;  %v6965_v36 = vsel %vm863_vm4, %v905_v34, %v907_v22  ;;  %v6970_v30 = vsel %vm863_vm4, %v907_v22, %v909_v54  ;;  %v1744_v22 = vrot.slane %v6422_v23, 2 }
  0x56   : > { %5524 = vmatmul.mubr.msk.f32.gmra.mxu0 %vm610_vm1, %v6937_v49  ;;  %8744 = vst [vmem:[#allocation44_spill] sm:$0xff] %v6957_v0  ;;  %8745 = vst [vmem:[#allocation45_spill] sm:$0xff] %v6965_v36  ;;  %v1741_v49 = vrot.slane %v6400_v9, 2  ;;  %v6977_v33 = vsel %vm863_vm4, %v953_v47, %v955_v62  ;;  %v6983_v34 = vsel %vm863_vm4, %v955_v62, %v957_v42  ;;  %v8751_v62 = vrot.slane %v6960_v18, 1 }
  0x57   : > { %5526 = vmatprep.mubr.msk.f32.mxu0 %vm610_vm1, %v6945_v19  ;;  %8746 = vst [vmem:[#allocation46_spill] sm:$0xff] %v6970_v30  ;;  %8747 = vst [vmem:[#allocation47_spill] sm:$0xff] %v6977_v33  ;;  %v1746_v19 = vrot.slane %v6537_v25, 2 }
  0x58   : > { %5560 = vmatmul.mubr.msk.f32.gmra.mxu1 %vm610_vm1, %v6951_v57  ;;  %8748 = vst [vmem:[#allocation48_spill] sm:$0xff] %v6983_v34  ;;  %v8749_v57 = vrot.slane %v6521_v14, 1  ;;  %v1743_v47 = vsel %vm1740_vm5, %v1741_v49, %v1742_v27 }
  0x59   : > { %5562 = vmatprep.mubr.msk.f32.mxu1 %vm610_vm1, %v6957_v0  ;;  %v1747_v49 = vsel %vm1740_vm5, %v1744_v22, %v1746_v19 }
  0x5a   : > { %5527 = vmatmul.mubr.msk.f32.gmra.mxu0 %vm610_vm1, %v6965_v36  ;;  %v6991_v0 = vsel %vm863_vm4, %v909_v54, %v8749_v57  ;;  %v7002_v36 = vsel %vm863_vm4, %v957_v42, %v8751_v62  ;;  %v1745_v54 = vsel %vm1740_vm5, %v1742_v27, %v1744_v22  ;;  %v1748_v57 = vrot.slane %v6553_v31, 2  ;;  %v7018_v42 = vld [vmem:[%s8528_s3 + $0x18] sm:$0x7] }
  0x5b   : > { %5529 = vmatprep.mubr.msk.f32.mxu0 %vm610_vm1, %v6970_v30  ;;  %8750 = vst [vmem:[#allocation49_spill] sm:$0xff] %v6991_v0  ;;  %8752 = vst [vmem:[#allocation50_spill] sm:$0xff] %v7002_v36  ;;  %v1752_v22 = vrot.slane %v6598_v45, 2  ;;  %v1760_v62 = vrot.slane %v6662_v3, 2 }
  0x5c   : > { %5563 = vmatmul.mubr.msk.f32.gmra.mxu1 %vm610_vm1, %v6977_v33  ;;  %v7025_v27 = vsel %vm1740_vm5, %v1746_v19, %v1748_v57  ;;  %v1756_v19 = vrot.slane %v6628_v56, 2 }
  0x5d   : > { %5565 = vmatprep.mubr.msk.f32.mxu1 %vm610_vm1, %v6983_v34  ;;  %v1750_v34 = vrot.slane %v6555_v32, 2 }
  0x5e   : > { %5530 = vmatmul.mubr.msk.f32.gmra.mxu0 %vm610_vm1, %v6991_v0 }
  0x5f   : > { %5644 = vmatprep.mubr.msk.f32.mxu0 %vm610_vm1, %v1743_v47  ;;  %v7036_v47 = vsel %vm1740_vm5, %v1748_v57, %v1750_v34  ;;  %v1762_v57 = vrot.slane %v6666_v7, 2 }
  0x60   : > { %5566 = vmatmul.mubr.msk.f32.gmra.mxu1 %vm610_vm1, %v7002_v36 }
  0x61   : > { %5570 = vmatprep.mubr.msk.f32.mxu1 %vm610_vm1, %v6400_v9  ;;  %v7031_v9 = vld [vmem:[%s8528_s3 + $0x14] sm:$0x7] }
  0x62   : > { %5645 = vmatmul.mubr.msk.f32.vlgmr.msra.gmra.mxu0 %vm610_vm1, %v1745_v54 }
  0x63   : > { %5791 = vmatpush3.msk.msra.mxu0 %vm1057_vm0, %v6452_v39  ;;  %5647 = vmatprep.mubr.msk.f32.mxu0 %vm610_vm1, %v1747_v49  ;;  %v1754_v39 = vrot.slane %v6617_v51, 2 }
  0x64   : > { %5571 = vmatmul.mubr.msk.f32.vlgmr.msra.gmra.mxu1 %vm610_vm1, %v6402_v10  ;;  %5938 = vmatprep.subr.msk.mxu0 %vm1057_vm0, %v7018_v42  ;;  %v7052_v10 = vsel %vm1740_vm5, %v1750_v34, %v1752_v22 }
  0x65   : > { %5717 = vmatpush3.msk.msra.mxu1 %vm1057_vm0, %v6584_v40  ;;  %5573 = vmatprep.mubr.msk.f32.mxu1 %vm610_vm1, %v6422_v23  ;;  %8753 = vst [vmem:[#allocation51_spill] sm:$0xff] %v7052_v10  ;;  %v7058_v40 = vsel %vm1740_vm5, %v1752_v22, %v1754_v39  ;;  %v1758_v23 = vrot.slane %v6644_v60, 2  ;;  %v7068_v34 = vsel %vm1740_vm5, %v1754_v39, %v1756_v19  ;;  %v1764_v22 = vrot.slane %v6676_v13, 2 }
  0x66   : > { %5648 = vmatmul.mubr.msk.f32.gmra.mxu0 %vm610_vm1, %v7025_v27  ;;  %5864 = vmatprep.subr.msk.mxu1 %vm1057_vm0, %v7031_v9  ;;  %8754 = vst [vmem:[#allocation52_spill] sm:$0xff] %v7058_v40  ;;  %8755 = vst [vmem:[#allocation53_spill] sm:$0xff] %v7068_v34  ;;  %v7090_v39 = vsel %vm1740_vm5, %v1760_v62, %v1762_v57 }
  0x67   : > { %5650 = vmatprep.mubr.msk.f32.mxu0 %vm610_vm1, %v7036_v47  ;;  %v7074_v54 = vsel %vm1740_vm5, %v1756_v19, %v1758_v23  ;;  %v7084_v49 = vsel %vm1740_vm5, %v1758_v23, %v1760_v62  ;;  %8758 = vst [vmem:[#allocation56_spill] sm:$0xff] %v7090_v39  ;;  %v1766_v19 = vrot.slane %v6693_v28, 2  ;;  %v7100_v23 = vsel %vm1740_vm5, %v1762_v57, %v1764_v22 }
  0x68   : > { %5574 = vmatmul.mubr.msk.f32.gmra.mxu1 %vm610_vm1, %v6537_v25  ;;  %8756 = vst [vmem:[#allocation54_spill] sm:$0xff] %v7074_v54  ;;  %8757 = vst [vmem:[#allocation55_spill] sm:$0xff] %v7084_v49 }
  0x69   : > { %5576 = vmatprep.mubr.msk.f32.mxu1 %vm610_vm1, %v6553_v31  ;;  %8759 = vst [vmem:[#allocation57_spill] sm:$0xff] %v7100_v23  ;;  %v7106_v62 = vsel %vm1740_vm5, %v1764_v22, %v1766_v19 }
  0x6a   : > { %5651 = vmatmul.mubr.msk.f32.gmra.mxu0 %vm610_vm1, %v7052_v10  ;;  %8760 = vst [vmem:[#allocation58_spill] sm:$0xff] %v7106_v62 }
  0x6b   : > { %5653 = vmatprep.mubr.msk.f32.mxu0 %vm610_vm1, %v7058_v40  ;;  %v531_v40 = vld [vmem:[%s6390_s18 + $0xf8] sm:$0xff] }
  0x6c   : > { %5577 = vmatmul.mubr.msk.f32.gmra.mxu1 %vm610_vm1, %v6555_v32 }
  0x6d   : > { %5579 = vmatprep.mubr.msk.f32.mxu1 %vm610_vm1, %v6598_v45 }
  0x6e   : > { %5654 = vmatmul.mubr.msk.f32.gmra.mxu0 %vm610_vm1, %v7068_v34  ;;  %v1770_v34 = vrot.slane %v6735_v53, 2 }
  0x6f   : > { %5656 = vmatprep.mubr.msk.f32.mxu0 %vm610_vm1, %v7074_v54  ;;  %v1768_v54 = vrot.slane %v6711_v46, 2 }
  0x70   : > { %5580 = vmatmul.mubr.msk.f32.gmra.mxu1 %vm610_vm1, %v6617_v51 }
  0x71   : > { %5582 = vmatprep.mubr.msk.f32.mxu1 %vm610_vm1, %v6628_v56  ;;  %v7116_v57 = vsel %vm1740_vm5, %v1766_v19, %v1768_v54  ;;  %v7122_v22 = vsel %vm1740_vm5, %v1768_v54, %v1770_v34 }
  0x72   : > { %5657 = vmatmul.mubr.msk.f32.gmra.mxu0 %vm610_vm1, %v7084_v49  ;;  %8761 = vst [vmem:[#allocation59_spill] sm:$0xff] %v7116_v57  ;;  %8762 = vst [vmem:[#allocation60_spill] sm:$0xff] %v7122_v22  ;;  %v1774_v49 = vrot.slane %v6795_v24, 2 }
  0x73   : > { %5659 = vmatprep.mubr.msk.f32.mxu0 %vm610_vm1, %v7090_v39  ;;  %v1772_v39 = vrot.slane %v6783_v17, 2 }
  0x74   : > { %5583 = vmatmul.mubr.msk.f32.gmra.mxu1 %vm610_vm1, %v6644_v60 }
  0x75   : > { %5585 = vmatprep.mubr.msk.f32.mxu1 %vm610_vm1, %v6662_v3  ;;  %v7132_v19 = vsel %vm1740_vm5, %v1770_v34, %v1772_v39  ;;  %v7138_v54 = vsel %vm1740_vm5, %v1772_v39, %v1774_v49 }
  0x76   : > { %5660 = vmatmul.mubr.msk.f32.gmra.mxu0 %vm610_vm1, %v7100_v23  ;;  %8763 = vst [vmem:[#allocation61_spill] sm:$0xff] %v7132_v19  ;;  %8764 = vst [vmem:[#allocation62_spill] sm:$0xff] %v7138_v54  ;;  %v1778_v23 = vrot.slane %v6879_v38, 2 }
  0x77   : > { %5662 = vmatprep.mubr.msk.f32.mxu0 %vm610_vm1, %v7106_v62  ;;  %v1776_v62 = vrot.slane %v6864_v11, 2 }
  0x78   : > { %5586 = vmatmul.mubr.msk.f32.gmra.mxu1 %vm610_vm1, %v6666_v7 }
  0x79   : > { %5588 = vmatprep.mubr.msk.f32.mxu1 %vm610_vm1, %v6676_v13  ;;  %v7148_v34 = vsel %vm1740_vm5, %v1774_v49, %v1776_v62  ;;  %v7154_v39 = vsel %vm1740_vm5, %v1776_v62, %v1778_v23 }
  0x7a   : > { %5663 = vmatmul.mubr.msk.f32.gmra.mxu0 %vm610_vm1, %v7116_v57  ;;  %8765 = vst [vmem:[#allocation63_spill] sm:$0xff] %v7148_v34  ;;  %8766 = vst [vmem:[#allocation64_spill] sm:$0xff] %v7154_v39  ;;  %v1782_v57 = vrot.slane %v6892_v8, 2 }
  0x7b   : > { %5665 = vmatprep.mubr.msk.f32.mxu0 %vm610_vm1, %v7122_v22  ;;  %v1780_v22 = vrot.slane %v6890_v35, 2 }
  0x7c   : > { %5589 = vmatmul.mubr.msk.f32.gmra.mxu1 %vm610_vm1, %v6693_v28 }
  0x7d   : > { %5591 = vmatprep.mubr.msk.f32.mxu1 %vm610_vm1, %v6711_v46  ;;  %v7164_v49 = vsel %vm1740_vm5, %v1778_v23, %v1780_v22  ;;  %v7170_v62 = vsel %vm1740_vm5, %v1780_v22, %v1782_v57 }
  0x7e   : > { %5666 = vmatmul.mubr.msk.f32.gmra.mxu0 %vm610_vm1, %v7132_v19  ;;  %8767 = vst [vmem:[#allocation65_spill] sm:$0xff] %v7164_v49  ;;  %8768 = vst [vmem:[#allocation66_spill] sm:$0xff] %v7170_v62  ;;  %v1786_v19 = vrot.slane %v6924_v48, 2 }
  0x7f   : > { %5668 = vmatprep.mubr.msk.f32.mxu0 %vm610_vm1, %v7138_v54  ;;  %v1784_v54 = vrot.slane %v6916_v61, 2 }
  0x80   : > { %5592 = vmatmul.mubr.msk.f32.gmra.mxu1 %vm610_vm1, %v6735_v53 }
  0x81   : > { %5594 = vmatprep.mubr.msk.f32.mxu1 %vm610_vm1, %v6783_v17  ;;  %v7180_v23 = vsel %vm1740_vm5, %v1782_v57, %v1784_v54  ;;  %v7186_v22 = vsel %vm1740_vm5, %v1784_v54, %v1786_v19 }
  0x82   : > { %5669 = vmatmul.mubr.msk.f32.gmra.mxu0 %vm610_vm1, %v7148_v34  ;;  %8769 = vst [vmem:[#allocation67_spill] sm:$0xff] %v7180_v23  ;;  %8770 = vst [vmem:[#allocation68_spill] sm:$0xff] %v7186_v22  ;;  %v1790_v34 = vrot.slane %v6523_v15, 2 }
  0x83   : > { %5671 = vmatprep.mubr.msk.f32.mxu0 %vm610_vm1, %v7154_v39  ;;  %v1788_v39 = vrot.slane %v6521_v14, 2 }
  0x84   : > { %5595 = vmatmul.mubr.msk.f32.gmra.mxu1 %vm610_vm1, %v6795_v24 }
  0x85   : > { %5597 = vmatprep.mubr.msk.f32.mxu1 %vm610_vm1, %v6864_v11  ;;  %v7196_v57 = vsel %vm1740_vm5, %v1786_v19, %v1788_v39  ;;  %v7202_v54 = vsel %vm1740_vm5, %v1788_v39, %v1790_v34  ;;  %v1796_v39 = vrot.slane %v6594_v43, 2 }
  0x86   : > { %5672 = vmatmul.mubr.msk.f32.gmra.mxu0 %vm610_vm1, %v7164_v49  ;;  %v1794_v49 = vrot.slane %v6539_v26, 2 }
  0x87   : > { %5674 = vmatprep.mubr.msk.f32.mxu0 %vm610_vm1, %v7170_v62  ;;  %v1792_v62 = vrot.slane %v6525_v16, 2 }
  0x88   : > { %5598 = vmatmul.mubr.msk.f32.gmra.mxu1 %vm610_vm1, %v6879_v38 }
  0x89   : > { %5600 = vmatprep.mubr.msk.f32.mxu1 %vm610_vm1, %v6890_v35  ;;  %v7214_v19 = vsel %vm1740_vm5, %v1790_v34, %v1792_v62  ;;  %v7221_v10 = vsel %vm1740_vm5, %v1792_v62, %v1794_v49  ;;  %v1802_v34 = vrot.slane %v6619_v52, 2  ;;  %v1804_v62 = vrot.slane %v6642_v59, 2 }
  0x8a   : > { %5675 = vmatmul.mubr.msk.f32.gmra.mxu0 %vm610_vm1, %v7180_v23 }
  0x8b   : > { %5677 = vmatprep.mubr.msk.f32.mxu0 %vm610_vm1, %v7186_v22  ;;  %v571_v22 = vsub.f32 %v531_v40, %v6384_v4  ;;  %v1798_v4 = vrot.slane %v6596_v44, 2  ;;  %v1800_v40 = vrot.slane %v6615_v50, 2 }
  0x8c   : > { %5601 = vmatmul.mubr.msk.f32.gmra.mxu1 %vm610_vm1, %v6892_v8 }
  0x8d   : > { %5603 = vmatprep.mubr.msk.f32.mxu1 %vm610_vm1, %v6916_v61  ;;  %v609_v23 = vmul.f32 %v6395_v5, %v571_v22  ;;  %v7234_v5 = vsel %vm1740_vm5, %v1794_v49, %v1796_v39  ;;  %v7250_v49 = vsel %vm1740_vm5, %v1798_v4, %v1800_v40  ;;  %v1808_v22 = vrot.slane %v6664_v6, 2 }
  0x8e   : > { %5678 = vmatmul.mubr.msk.f32.gmra.mxu0 %vm610_vm1, %v7196_v57  ;;  %8771 = vst [vmem:[#allocation69_spill] sm:$0xff] %v7234_v5  ;;  %8773 = vst [vmem:[#allocation71_spill] sm:$0xff] %v7250_v49 }
  0x8f   : > { %5680 = vmatprep.mubr.msk.f32.mxu0 %vm610_vm1, %v7202_v54  ;;  %642 = vst.msk [vmem:[%s6414_s23 + $0xf8] sm:$0xff] %vm610_vm1, %v609_v23  ;;  %718 = vst.msk [vmem:[#allocation2 + $0x189] sm:$0xff] %vm610_vm1, %v609_v23  ;;  %v1806_v23 = vrot.slane %v6654_v63, 2 }
  0x90   : > { %5604 = vmatmul.mubr.msk.f32.gmra.mxu1 %vm610_vm1, %v6924_v48 }
  0x91   : > { %5606 = vmatprep.mubr.msk.f32.mxu1 %vm610_vm1, %v6521_v14  ;;  %v7240_v14 = vsel %vm1740_vm5, %v1796_v39, %v1798_v4  ;;  %v7272_v39 = vsel %vm1740_vm5, %v1804_v62, %v1806_v23  ;;  %v1810_v4 = vrot.slane %v6674_v12, 2 }
  0x92   : > { %5681 = vmatmul.mubr.msk.f32.gmra.mxu0 %vm610_vm1, %v7214_v19  ;;  %8772 = vst [vmem:[#allocation70_spill] sm:$0xff] %v7240_v14  ;;  %8776 = vst [vmem:[#allocation74_spill] sm:$0xff] %v7272_v39 }
  0x93   : > { %5683 = vmatprep.mubr.msk.f32.mxu0 %vm610_vm1, %v7221_v10 }
  0x94   : > { %5607 = vmatmul.mubr.msk.f32.gmra.mxu1 %vm610_vm1, %v6523_v15  ;;  %v7256_v15 = vsel %vm1740_vm5, %v1800_v40, %v1802_v34  ;;  %v7282_v40 = vsel %vm1740_vm5, %v1806_v23, %v1808_v22 }
  0x95   : > { %5609 = vmatprep.mubr.msk.f32.mxu1 %vm610_vm1, %v6525_v16  ;;  %8774 = vst [vmem:[#allocation72_spill] sm:$0xff] %v7256_v15  ;;  %v7266_v16 = vsel %vm1740_vm5, %v1802_v34, %v1804_v62  ;;  %8777 = vst [vmem:[#allocation75_spill] sm:$0xff] %v7282_v40  ;;  %v1812_v34 = vrot.slane %v6702_v37, 2  ;;  %v7288_v62 = vsel %vm1740_vm5, %v1808_v22, %v1810_v4 }
  0x96   : > { %5684 = vmatmul.mubr.msk.f32.gmra.mxu0 %vm610_vm1, %v7234_v5  ;;  %8775 = vst [vmem:[#allocation73_spill] sm:$0xff] %v7266_v16  ;;  %8778 = vst [vmem:[#allocation76_spill] sm:$0xff] %v7288_v62 }
  0x97   : > { %5686 = vmatprep.mubr.msk.f32.mxu0 %vm610_vm1, %v7240_v14  ;;  %v7298_v23 = vsel %vm1740_vm5, %v1810_v4, %v1812_v34 }
  0x98   : > { %5610 = vmatmul.mubr.msk.f32.gmra.mxu1 %vm610_vm1, %v6539_v26  ;;  %8779 = vst [vmem:[#allocation77_spill] sm:$0xff] %v7298_v23 }
  0x99   : > { %5612 = vmatprep.mubr.msk.f32.mxu1 %vm610_vm1, %v6594_v43 }
  0x9a   : > { %5687 = vmatmul.mubr.msk.f32.gmra.mxu0 %vm610_vm1, %v7250_v49  ;;  %v8787_v49 = vld [vmem:[#allocation36_spill] sm:$0xff] }
  0x9b   : > { %5689 = vmatprep.mubr.msk.f32.mxu0 %vm610_vm1, %v7256_v15  ;;  %v1814_v15 = vrot.slane %v6709_v41, 2  ;;  %v1830_v14 = vrot.slane %v8787_v49, 2 }
  0x9c   : > { %5613 = vmatmul.mubr.msk.f32.gmra.mxu1 %vm610_vm1, %v6596_v44 }
  0x9d   : > { %5615 = vmatprep.mubr.msk.f32.mxu1 %vm610_vm1, %v6615_v50  ;;  %v7304_v22 = vsel %vm1740_vm5, %v1812_v34, %v1814_v15 }
  0x9e   : > { %5690 = vmatmul.mubr.msk.f32.gmra.mxu0 %vm610_vm1, %v7266_v16  ;;  %8780 = vst [vmem:[#allocation78_spill] sm:$0xff] %v7304_v22  ;;  %v1818_v16 = vrot.slane %v6772_v58, 2 }
  0x9f   : > { %5692 = vmatprep.mubr.msk.f32.mxu0 %vm610_vm1, %v7272_v39  ;;  %v1816_v39 = vrot.slane %v6765_v20, 2 }
  0xa0   : > { %5616 = vmatmul.mubr.msk.f32.gmra.mxu1 %vm610_vm1, %v6619_v52 }
  0xa1   : > { %5618 = vmatprep.mubr.msk.f32.mxu1 %vm610_vm1, %v6642_v59  ;;  %v7314_v4 = vsel %vm1740_vm5, %v1814_v15, %v1816_v39  ;;  %v7320_v34 = vsel %vm1740_vm5, %v1816_v39, %v1818_v16 }
  0xa2   : > { %5693 = vmatmul.mubr.msk.f32.gmra.mxu0 %vm610_vm1, %v7282_v40  ;;  %8781 = vst [vmem:[#allocation79_spill] sm:$0xff] %v7314_v4  ;;  %8782 = vst [vmem:[#allocation80_spill] sm:$0xff] %v7320_v34  ;;  %v1822_v40 = vrot.slane %v6833_v21, 2 }
  0xa3   : > { %5695 = vmatprep.mubr.msk.f32.mxu0 %vm610_vm1, %v7288_v62  ;;  %v1820_v62 = vrot.slane %v6815_v55, 2 }
  0xa4   : > { %5619 = vmatmul.mubr.msk.f32.gmra.mxu1 %vm610_vm1, %v6654_v63 }
  0xa5   : > { %5621 = vmatprep.mubr.msk.f32.mxu1 %vm610_vm1, %v6664_v6  ;;  %v7330_v15 = vsel %vm1740_vm5, %v1818_v16, %v1820_v62  ;;  %v7336_v39 = vsel %vm1740_vm5, %v1820_v62, %v1822_v40 }
  0xa6   : > { %5696 = vmatmul.mubr.msk.f32.gmra.mxu0 %vm610_vm1, %v7298_v23  ;;  %8783 = vst [vmem:[#allocation81_spill] sm:$0xff] %v7330_v15  ;;  %8784 = vst [vmem:[#allocation82_spill] sm:$0xff] %v7336_v39  ;;  %v1826_v23 = vrot.slane %v6881_v1, 2 }
  0xa7   : > { %5698 = vmatprep.mubr.msk.f32.mxu0 %vm610_vm1, %v7304_v22  ;;  %v1824_v22 = vrot.slane %v6877_v2, 2 }
  0xa8   : > { %5622 = vmatmul.mubr.msk.f32.gmra.mxu1 %vm610_vm1, %v6674_v12 }
  0xa9   : > { %5624 = vmatprep.mubr.msk.f32.mxu1 %vm610_vm1, %v6702_v37  ;;  %v7346_v16 = vsel %vm1740_vm5, %v1822_v40, %v1824_v22  ;;  %v7352_v62 = vsel %vm1740_vm5, %v1824_v22, %v1826_v23 }
  0xaa   : > { %5699 = vmatmul.mubr.msk.f32.gmra.mxu0 %vm610_vm1, %v7314_v4 }
  0xab   : > { %5701 = vmatprep.mubr.msk.f32.mxu0 %vm610_vm1, %v7320_v34  ;;  %v8785_v34 = vld [vmem:[#allocation34_spill] sm:$0xff] }
  0xac   : > { %5625 = vmatmul.mubr.msk.f32.gmra.mxu1 %vm610_vm1, %v6709_v41  ;;  %v1828_v4 = vrot.slane %v8785_v34, 2  ;;  %8786 = vst [vmem:[#allocation34_spill] sm:$0xff] %v7352_v62 }
  0xad   : > { %5627 = vmatprep.mubr.msk.f32.mxu1 %vm610_vm1, %v6765_v20 }
  0xae   : > { %5702 = vmatmul.mubr.msk.f32.gmra.mxu0 %vm610_vm1, %v7330_v15  ;;  %v7362_v40 = vsel %vm1740_vm5, %v1826_v23, %v1828_v4  ;;  %v7368_v22 = vsel %vm1740_vm5, %v1828_v4, %v1830_v14  ;;  %v8788_v15 = vld [vmem:[#allocation41_spill] sm:$0xff] }
  0xaf   : > { %5704 = vmatprep.mubr.msk.f32.mxu0 %vm610_vm1, %v7336_v39  ;;  %v1832_v39 = vrot.slane %v6932_v29, 2  ;;  %v1834_v5 = vrot.slane %v8788_v15, 2 }
  0xb0   : > { %5628 = vmatmul.mubr.msk.f32.gmra.mxu1 %vm610_vm1, %v6772_v58 }
  0xb1   : > { %5630 = vmatprep.mubr.msk.f32.mxu1 %vm610_vm1, %v6815_v55  ;;  %v7378_v23 = vsel %vm1740_vm5, %v1830_v14, %v1832_v39  ;;  %v7384_v4 = vsel %vm1740_vm5, %v1832_v39, %v1834_v5  ;;  %v8791_v39 = vld [vmem:[#allocation6_spill] sm:$0xff] }
  0xb2   : > { %5705 = vmatmul.mubr.msk.f32.gmra.mxu0 %vm610_vm1, %v7346_v16  ;;  %8789 = vst [vmem:[#allocation36_spill] sm:$0xff] %v7384_v4 }
  0xb3   : > { %5707 = vmatprep.mubr.msk.f32.mxu0 %vm610_vm1, %v7352_v62  ;;  %v8685_v62 = vrot.slane %v6960_v18, 2 }
  0xb4   : > { %5631 = vmatmul.mubr.msk.f32.gmra.mxu1 %vm610_vm1, %v6833_v21 }
  0xb5   : > { %5633 = vmatprep.mubr.msk.f32.mxu1 %vm610_vm1, %v6877_v2  ;;  %v7395_v14 = vsel %vm1740_vm5, %v1834_v5, %v8685_v62  ;;  %v7412_v5 = vld [vmem:[%s8528_s3 + $0x20] sm:$0x7]  ;;  %v8792_v62 = vld [vmem:[#allocation7_spill] sm:$0xff] }
  0xb6   : > { %5708 = vmatmul.mubr.msk.f32.gmra.mxu0 %vm610_vm1, %v7362_v40  ;;  %8790 = vst [vmem:[#allocation41_spill] sm:$0xff] %v7395_v14 }
  0xb7   : > { %5710 = vmatprep.mubr.msk.f32.mxu0 %vm610_vm1, %v7368_v22 }
  0xb8   : > { %5634 = vmatmul.mubr.msk.f32.gmra.mxu1 %vm610_vm1, %v6881_v1 }
  0xb9   : > { %5636 = vmatprep.mubr.msk.f32.mxu1 %vm610_vm1, %v8785_v34 }
  0xba   : > { %5711 = vmatmul.mubr.msk.f32.gmra.mxu0 %vm610_vm1, %v7378_v23 }
  0xbb   : > { %5713 = vmatprep.mubr.msk.f32.mxu0 %vm610_vm1, %v7384_v4 }
  0xbc   : > { %5637 = vmatmul.mubr.msk.f32.gmra.mxu1 %vm610_vm1, %v8787_v49 }
  0xbd   : > { %5639 = vmatprep.mubr.msk.f32.mxu1 %vm610_vm1, %v6932_v29 }
  0xbe   : > { %5714 = vmatmul.mubr.msk.f32.gmra.mxu0 %vm610_vm1, %v7395_v14  ;;  %v8793_v14 = vld [vmem:[#allocation10_spill] sm:$0xff] }
  0xbf   : > { %5792 = vmatprep.mubr.msk.f32.mxu0 %vm610_vm1, %v8791_v39  ;;  %v7423_v39 = vld [vmem:[%s8528_s3 + $0x1c] sm:$0x7] }
  0xc0   : > { %5640 = vmatmul.mubr.msk.f32.gmra.mxu1 %vm610_vm1, %v8788_v15 }
  0xc1   : > { %5718 = vmatprep.mubr.msk.f32.mxu1 %vm610_vm1, %v6537_v25  ;;  %v8794_v25 = vld [vmem:[#allocation11_spill] sm:$0xff] }
  0xc2   : > { %5793 = vmatmul.mubr.msk.f32.vlgmr.msra.gmra.mxu0 %vm610_vm1, %v8792_v62  ;;  %v8799_v62 = vld [vmem:[#allocation22_spill] sm:$0xff] }
  0xc3   : > { %5939 = vmatpush3.msk.msra.mxu0 %vm1057_vm0, %v7018_v42  ;;  %5795 = vmatprep.mubr.msk.f32.mxu0 %vm610_vm1, %v8793_v14  ;;  %v8795_v42 = vld [vmem:[#allocation14_spill] sm:$0xff] }
  0xc4   : > { %5719 = vmatmul.mubr.msk.f32.vlgmr.msra.gmra.mxu1 %vm610_vm1, %v6553_v31  ;;  %6086 = vmatprep.subr.msk.mxu0 %vm1057_vm0, %v7412_v5  ;;  %v8796_v31 = vld [vmem:[#allocation15_spill] sm:$0xff]  ;;  %v7511_v14 = vld [vmem:[#allocation2 + $0xc0] sm:$0xff] }
  0xc5   : > { %5865 = vmatpush3.msk.msra.mxu1 %vm1057_vm0, %v7031_v9  ;;  %5721 = vmatprep.mubr.msk.f32.mxu1 %vm610_vm1, %v6555_v32  ;;  %v8797_v9 = vld [vmem:[#allocation18_spill] sm:$0xff]  ;;  %v8798_v32 = vld [vmem:[#allocation20_spill] sm:$0xff] }
  0xc6   : > { %5796 = vmatmul.mubr.msk.f32.gmra.mxu0 %vm610_vm1, %v8794_v25  ;;  %6012 = vmatprep.subr.msk.mxu1 %vm1057_vm0, %v7423_v39 }
  0xc7   : > { %5798 = vmatprep.mubr.msk.f32.mxu0 %vm610_vm1, %v8795_v42 }
  0xc8   : > { %5722 = vmatmul.mubr.msk.f32.gmra.mxu1 %vm610_vm1, %v6598_v45  ;;  %v8800_v45 = vld [vmem:[#allocation23_spill] sm:$0xff] }
  0xc9   : > { %5724 = vmatprep.mubr.msk.f32.mxu1 %vm610_vm1, %v6617_v51  ;;  %v8801_v51 = vld [vmem:[#allocation26_spill] sm:$0xff] }
  0xca   : > { %5799 = vmatmul.mubr.msk.f32.gmra.mxu0 %vm610_vm1, %v8796_v31 }
  0xcb   : > { %5801 = vmatprep.mubr.msk.f32.mxu0 %vm610_vm1, %v8797_v9  ;;  %v8830_v9 = vld [vmem:[#allocation44_spill] sm:$0xff] }
  0xcc   : > { %5725 = vmatmul.mubr.msk.f32.gmra.mxu1 %vm610_vm1, %v6628_v56  ;;  %v8802_v56 = vld [vmem:[#allocation27_spill] sm:$0xff] }
  0xcd   : > { %5727 = vmatprep.mubr.msk.f32.mxu1 %vm610_vm1, %v6644_v60  ;;  %v8803_v60 = vld [vmem:[#allocation30_spill] sm:$0xff] }
  0xce   : > { %5802 = vmatmul.mubr.msk.f32.gmra.mxu0 %vm610_vm1, %v8798_v32 }
  0xcf   : > { %5804 = vmatprep.mubr.msk.f32.mxu0 %vm610_vm1, %v8799_v62 }
  0xd0   : > { %5728 = vmatmul.mubr.msk.f32.gmra.mxu1 %vm610_vm1, %v6662_v3  ;;  %v8804_v3 = vld [vmem:[#allocation31_spill] sm:$0xff] }
  0xd1   : > { %5730 = vmatprep.mubr.msk.f32.mxu1 %vm610_vm1, %v6666_v7  ;;  %v8805_v7 = vld [vmem:[#allocation35_spill] sm:$0xff] }
  0xd2   : > { %5805 = vmatmul.mubr.msk.f32.gmra.mxu0 %vm610_vm1, %v8800_v45  ;;  %v8825_v45 = vld [vmem:[#allocation32_spill] sm:$0xff] }
  0xd3   : > { %5807 = vmatprep.mubr.msk.f32.mxu0 %vm610_vm1, %v8801_v51  ;;  %v8824_v51 = vld [vmem:[#allocation29_spill] sm:$0xff] }
  0xd4   : > { %5731 = vmatmul.mubr.msk.f32.gmra.mxu1 %vm610_vm1, %v6676_v13  ;;  %v8806_v13 = vld [vmem:[#allocation37_spill] sm:$0xff] }
  0xd5   : > { %5733 = vmatprep.mubr.msk.f32.mxu1 %vm610_vm1, %v6693_v28  ;;  %v8807_v28 = vld [vmem:[#allocation40_spill] sm:$0xff] }
  0xd6   : > { %5808 = vmatmul.mubr.msk.f32.gmra.mxu0 %vm610_vm1, %v8802_v56  ;;  %v8819_v56 = vld [vmem:[#allocation19_spill] sm:$0xff] }
  0xd7   : > { %5810 = vmatprep.mubr.msk.f32.mxu0 %vm610_vm1, %v8803_v60  ;;  %v8818_v60 = vld [vmem:[#allocation17_spill] sm:$0xff] }
  0xd8   : > { %5734 = vmatmul.mubr.msk.f32.gmra.mxu1 %vm610_vm1, %v6711_v46  ;;  %v8808_v46 = vld [vmem:[#allocation42_spill] sm:$0xff] }
  0xd9   : > { %5736 = vmatprep.mubr.msk.f32.mxu1 %vm610_vm1, %v6735_v53  ;;  %v8809_v53 = vld [vmem:[#allocation45_spill] sm:$0xff] }
  0xda   : > { %5811 = vmatmul.mubr.msk.f32.gmra.mxu0 %vm610_vm1, %v8804_v3 }
  0xdb   : > { %5813 = vmatprep.mubr.msk.f32.mxu0 %vm610_vm1, %v8805_v7 }
  0xdc   : > { %5737 = vmatmul.mubr.msk.f32.gmra.mxu1 %vm610_vm1, %v6783_v17  ;;  %v8810_v17 = vld [vmem:[#allocation3_spill] sm:$0xff] }
  0xdd   : > { %5739 = vmatprep.mubr.msk.f32.mxu1 %vm610_vm1, %v6795_v24  ;;  %v8811_v24 = vld [vmem:[#allocation4_spill] sm:$0xff] }
  0xde   : > { %5814 = vmatmul.mubr.msk.f32.gmra.mxu0 %vm610_vm1, %v8806_v13  ;;  %v8815_v13 = vld [vmem:[#allocation12_spill] sm:$0xff] }
  0xdf   : > { %5816 = vmatprep.mubr.msk.f32.mxu0 %vm610_vm1, %v8807_v28 }
  0xe0   : > { %5740 = vmatmul.mubr.msk.f32.gmra.mxu1 %vm610_vm1, %v6864_v11 }
  0xe1   : > { %5742 = vmatprep.mubr.msk.f32.mxu1 %vm610_vm1, %v6879_v38 }
  0xe2   : > { %5817 = vmatmul.mubr.msk.f32.gmra.mxu0 %vm610_vm1, %v8808_v46  ;;  %v8813_v46 = vld [vmem:[#allocation8_spill] sm:$0xff] }
  0xe3   : > { %5819 = vmatprep.mubr.msk.f32.mxu0 %vm610_vm1, %v8809_v53 }
  0xe4   : > { %5743 = vmatmul.mubr.msk.f32.gmra.mxu1 %vm610_vm1, %v6890_v35 }
  0xe5   : > { %5745 = vmatprep.mubr.msk.f32.mxu1 %vm610_vm1, %v6892_v8  ;;  %v7521_v53 = vpop.f32.mrf.mxu0 }
  0xe6   : > { %5820 = vmatmul.mubr.msk.f32.gmra.mxu0 %vm610_vm1, %v6970_v30  ;;  %v7515_v30 = vld [vmem:[#allocation2 + $0xc8] sm:$0xff] }
  0xe7   : > { %5822 = vmatprep.mubr.msk.f32.mxu0 %vm610_vm1, %v6991_v0  ;;  %v8812_v0 = vld [vmem:[#allocation5_spill] sm:$0xff]  ;;  %v7533_v28 = vpop.f32.mrf.mxu0 }
  0xe8   : > { %5746 = vmatmul.mubr.msk.f32.gmra.mxu1 %vm610_vm1, %v6916_v61 }
  0xe9   : > { %5748 = vmatprep.mubr.msk.f32.mxu1 %vm610_vm1, %v6924_v48 }
  0xea   : > { %5823 = vmatmul.mubr.msk.f32.gmra.mxu0 %vm610_vm1, %v8810_v17  ;;  %v7525_v17 = vld [vmem:[#allocation2 + $0xd0] sm:$0xff] }
  0xeb   : > { %5825 = vmatprep.mubr.msk.f32.mxu0 %vm610_vm1, %v8811_v24  ;;  %v8814_v24 = vld [vmem:[#allocation9_spill] sm:$0xff] }
  0xec   : > { %5749 = vmatmul.mubr.msk.f32.gmra.mxu1 %vm610_vm1, %v7511_v14 }
  0xed   : > { %5751 = vmatprep.mubr.msk.f32.mxu1 %vm610_vm1, %v7515_v30 }
  0xee   : > { %5826 = vmatmul.mubr.msk.f32.gmra.mxu0 %vm610_vm1, %v8812_v0 }
  0xef   : > { %5828 = vmatprep.mubr.msk.f32.mxu0 %vm610_vm1, %v8813_v46 }
  0xf0   : > { %5752 = vmatmul.mubr.msk.f32.gmra.mxu1 %vm610_vm1, %v7525_v17  ;;  %v7537_v0 = vpop.f32.mrf.mxu1 }
  0xf1   : > { %5754 = vmatprep.mubr.msk.f32.mxu1 %vm610_vm1, %v6539_v26  ;;  %v8816_v26 = vld [vmem:[#allocation13_spill] sm:$0xff] }
  0xf2   : > { %5829 = vmatmul.mubr.msk.f32.gmra.mxu0 %vm610_vm1, %v8814_v24  ;;  %v7543_v46 = vpop.f32.mrf.mxu1  ;;  %v7545_v7 = vpop.f32.mrf.mxu0  ;;  %v8817_v24 = vld [vmem:[#allocation16_spill] sm:$0xff] }
  0xf3   : > { %5831 = vmatprep.mubr.msk.f32.mxu0 %vm610_vm1, %v8815_v13 }
  0xf4   : > { %5755 = vmatmul.mubr.msk.f32.gmra.mxu1 %vm610_vm1, %v6594_v43  ;;  %v7551_v3 = vpop.f32.mrf.mxu1  ;;  %v1137_v13 = vpop.f32.mrf.mxu0 }
  0xf5   : > { %5757 = vmatprep.mubr.msk.f32.mxu1 %vm610_vm1, %v6596_v44  ;;  %v8820_v13 = vld [vmem:[#allocation21_spill] sm:$0xff] }
  0xf6   : > { %5832 = vmatmul.mubr.msk.f32.gmra.mxu0 %vm610_vm1, %v8816_v26  ;;  %v1249_v43 = vpop.f32.mrf.mxu1  ;;  %v5504_v44 = vpop.f32.mrf.mxu0 }
  0xf7   : > { %5834 = vmatprep.mubr.msk.f32.mxu0 %vm610_vm1, %v8817_v24  ;;  %v8821_v43 = vld [vmem:[#allocation24_spill] sm:$0xff] }
  0xf8   : > { %5758 = vmatmul.mubr.msk.f32.gmra.mxu1 %vm610_vm1, %v6615_v50  ;;  %v5540_v26 = vpop.f32.mrf.mxu1  ;;  %v7563_v24 = vpop.f32.mrf.mxu0 }
  0xf9   : > { %5760 = vmatprep.mubr.msk.f32.mxu1 %vm610_vm1, %v6619_v52 }
  0xfa   : > { %5835 = vmatmul.mubr.msk.f32.gmra.mxu0 %vm610_vm1, %v8818_v60  ;;  %v7567_v50 = vpop.f32.mrf.mxu1  ;;  %v7569_v52 = vpop.f32.mrf.mxu0 }
  0xfb   : > { %5837 = vmatprep.mubr.msk.f32.mxu0 %vm610_vm1, %v8819_v56  ;;  %v8822_v56 = vld [vmem:[#allocation25_spill] sm:$0xff] }
  0xfc   : > { %5761 = vmatmul.mubr.msk.f32.gmra.mxu1 %vm610_vm1, %v6642_v59  ;;  %v7575_v44 = vpop.f32.mrf.mxu1  ;;  %v7579_v59 = vpop.f32.mrf.mxu0 }
  0xfd   : > { %5763 = vmatprep.mubr.msk.f32.mxu1 %vm610_vm1, %v6654_v63 }
  0xfe   : > { %5838 = vmatmul.mubr.msk.f32.gmra.mxu0 %vm610_vm1, %v8820_v13  ;;  %v7583_v63 = vpop.f32.mrf.mxu1  ;;  %v7585_v26 = vpop.f32.mrf.mxu0  ;;  %v8823_v13 = vld [vmem:[#allocation28_spill] sm:$0xff] }
  0xff   : > { %5840 = vmatprep.mubr.msk.f32.mxu0 %vm610_vm1, %v8821_v43 }
 0x100   : > { %5764 = vmatmul.mubr.msk.f32.gmra.mxu1 %vm610_vm1, %v6664_v6  ;;  %v7591_v43 = vpop.f32.mrf.mxu1  ;;  %v1165_v6 = vpop.f32.mrf.mxu0 }
 0x101   : > { %5766 = vmatprep.mubr.msk.f32.mxu1 %vm610_vm1, %v6674_v12  ;;  %v8827_v6 = vld [vmem:[#allocation38_spill] sm:$0xff] }
 0x102   : > { %5841 = vmatmul.mubr.msk.f32.gmra.mxu0 %vm610_vm1, %v8822_v56  ;;  %v1277_v12 = vpop.f32.mrf.mxu1  ;;  %v5513_v60 = vpop.f32.mrf.mxu0 }
 0x103   : > { %5843 = vmatprep.mubr.msk.f32.mxu0 %vm610_vm1, %v8823_v13  ;;  %v8826_v60 = vld [vmem:[#allocation33_spill] sm:$0xff] }
 0x104   : > { %5767 = vmatmul.mubr.msk.f32.gmra.mxu1 %vm610_vm1, %v6702_v37  ;;  %v5549_v56 = vpop.f32.mrf.mxu1  ;;  %v7603_v13 = vpop.f32.mrf.mxu0 }
 0x105   : > { %5769 = vmatprep.mubr.msk.f32.mxu1 %vm610_vm1, %v6709_v41 }
 0x106   : > { %5844 = vmatmul.mubr.msk.f32.gmra.mxu0 %vm610_vm1, %v8824_v51  ;;  %v7607_v37 = vpop.f32.mrf.mxu1  ;;  %v7635_v51 = vld [vmem:[#allocation2 + $0x188] sm:$0xff] }
 0x107   : > { %5846 = vmatprep.mubr.msk.f32.mxu0 %vm610_vm1, %v8825_v45  ;;  %v7609_v41 = vpop.f32.mrf.mxu0  ;;  %v8828_v45 = vld [vmem:[#allocation39_spill] sm:$0xff] }
 0x108   : > { %5770 = vmatmul.mubr.msk.f32.gmra.mxu1 %vm610_vm1, %v6765_v20 }
 0x109   : > { %5772 = vmatprep.mubr.msk.f32.mxu1 %vm610_vm1, %v6772_v58  ;;  %v7619_v20 = vpop.f32.mrf.mxu0 }
 0x10a   : > { %5847 = vmatmul.mubr.msk.f32.gmra.mxu0 %vm610_vm1, %v8826_v60  ;;  %v8829_v60 = vld [vmem:[#allocation43_spill] sm:$0xff] }
 0x10b   : > { %5849 = vmatprep.mubr.msk.f32.mxu0 %vm610_vm1, %v8827_v6 }
 0x10c   : > { %v7615_v12 = vpop.f32.mrf.mxu1  ;;  %5773 = vmatmul.mubr.msk.f32.gmra.mxu1 %vm610_vm1, %v6815_v55 }
 0x10d   : > { %5775 = vmatprep.mubr.msk.f32.mxu1 %vm610_vm1, %v6833_v21  ;;  %v7639_v21 = vld [vmem:[#allocation2 + $0x190] sm:$0xff] }
 0x10e   : > { %v7623_v58 = vpop.f32.mrf.mxu1  ;;  %v7625_v56 = vpop.f32.mrf.mxu0  ;;  %5850 = vmatmul.mubr.msk.f32.gmra.mxu0 %vm610_vm1, %v8828_v45 }
 0x10f   : > { %5852 = vmatprep.mubr.msk.f32.mxu0 %vm610_vm1, %v8829_v60  ;;  %v2595_v60 = vrot.slane %v7635_v51, 1 }
 0x110   : > { %v7631_v6 = vpop.f32.mrf.mxu1  ;;  %5776 = vmatmul.mubr.msk.f32.gmra.mxu1 %vm610_vm1, %v6877_v2  ;;  %v1193_v55 = vpop.f32.mrf.mxu0 }
 0x111   : > { %5778 = vmatprep.mubr.msk.f32.mxu1 %vm610_vm1, %v6881_v1  ;;  %v2597_v1 = vrot.slane %v7639_v21, 1  ;;  %v7651_v55 = vld [vmem:[#allocation2 + $0x198] sm:$0xff] }
 0x112   : > { %v1305_v62 = vpop.f32.mrf.mxu1  ;;  %v5522_v32 = vpop.f32.mrf.mxu0  ;;  %5853 = vmatmul.mubr.msk.f32.gmra.mxu0 %vm610_vm1, %v8830_v9  ;;  %8831 = vst [vmem:[#allocation6_spill] sm:$0xff] %v7651_v55  ;;  %v8694_v9 = vrot.slane %v7651_v55, 1  ;;  %v8844_v55 = vld [vmem:[#allocation53_spill] sm:$0xff] }
 0x113   : > { %5855 = vmatprep.mubr.msk.f32.mxu0 %vm610_vm1, %v6977_v33  ;;  %v8832_v33 = vld [vmem:[#allocation48_spill] sm:$0xff]  ;;  %v7676_v42 = vsel %vm863_vm4, %v2595_v60, %v2597_v1 }
 0x114   : > { %v5558_v45 = vpop.f32.mrf.mxu1  ;;  %5779 = vmatmul.mubr.msk.f32.gmra.mxu1 %vm610_vm1, %v8785_v34  ;;  %v7648_v2 = vpop.f32.mrf.mxu0  ;;  %v8833_v34 = vrot.slane %v6960_v18, 1  ;;  %8835 = vst [vmem:[#allocation10_spill] sm:$0xff] %v7676_v42 }
 0x115   : > { %5781 = vmatprep.mubr.msk.f32.mxu1 %vm610_vm1, %v8787_v49 }
 0x116   : > { %v7655_v32 = vpop.f32.mrf.mxu1  ;;  %v7657_v62 = vpop.f32.mrf.mxu0  ;;  %5856 = vmatmul.mubr.msk.f32.gmra.mxu0 %vm610_vm1, %v8832_v33  ;;  %v7666_v45 = vsel %vm863_vm4, %v8833_v34, %v2595_v60 }
 0x117   : > { %5858 = vmatprep.mubr.msk.f32.mxu0 %vm610_vm1, %v7002_v36  ;;  %8834 = vst [vmem:[#allocation7_spill] sm:$0xff] %v7666_v45 }
 0x118   : > { %v7669_v31 = vpop.f32.mrf.mxu1  ;;  %5782 = vmatmul.mubr.msk.f32.gmra.mxu1 %vm610_vm1, %v6932_v29  ;;  %v7673_v49 = vpop.f32.mrf.mxu0  ;;  %v7691_v29 = vsel %vm863_vm4, %v2597_v1, %v8694_v9 }
 0x119   : > { %5784 = vmatprep.mubr.msk.f32.mxu1 %vm610_vm1, %v8788_v15  ;;  %8837 = vst [vmem:[#allocation84_spill] sm:$0xff] %v7691_v29 }
 0x11a   : > { %v7680_v36 = vpop.f32.mrf.mxu1  ;;  %v7682_v33 = vpop.f32.mrf.mxu0  ;;  %5859 = vmatmul.mubr.msk.f32.gmra.mxu0 %vm610_vm1, %v7666_v45 }
 0x11b   : > { %8836 = vst [vmem:[#allocation83_spill] sm:$0xff] %v7680_v36  ;;  %5861 = vmatprep.mubr.msk.f32.mxu0 %vm610_vm1, %v7676_v42  ;;  %v6190_v42 = vld [vmem:[#allocation2 + $0x30] sm:$0xff] }
 0x11c   : > { %v7693_v60 = vpop.f32.mrf.mxu1  ;;  %5785 = vmatmul.mubr.msk.f32.gmra.mxu1 %vm610_vm1, %v6960_v18  ;;  %v1221_v15 = vpop.f32.mrf.mxu0  ;;  %v6194_v36 = vld [vmem:[#allocation2 + $0x50] sm:$0xff] }
 0x11d   : > { %8838 = vst [vmem:[#allocation85_spill] sm:$0xff] %v7693_v60  ;;  %5787 = vmatprep.mubr.msk.f32.mxu1 %vm610_vm1, %v7635_v51  ;;  %v6193_v60 = vld [vmem:[#allocation2 + $0x48] sm:$0xff] }
 0x11e   : > { %v1333_v34 = vpop.f32.mrf.mxu1  ;;  %v5531_v25 = vpop.f32.mrf.mxu0  ;;  %5862 = vmatmul.mubr.msk.f32.gmra.mxu0 %vm610_vm1, %v7691_v29 }
 0x11f   : > { %5940 = vmatprep.mubr.msk.f32.mxu0 %vm610_vm1, %v6190_v42  ;;  %v6191_v34 = vld [vmem:[#allocation2 + $0x38] sm:$0xff]  ;;  %v6192_v25 = vld [vmem:[#allocation2 + $0x40] sm:$0xff] }
 0x120   : > { %v5567_v45 = vpop.f32.mrf.mxu1  ;;  %5788 = vmatmul.mubr.msk.f32.gmra.mxu1 %vm610_vm1, %v7639_v21  ;;  %v7704_v1 = vpop.f32.mrf.mxu0 }
 0x121   : > { %5866 = vmatprep.mubr.msk.f32.mxu1 %vm610_vm1, %v7025_v27  ;;  %v8840_v27 = vld [vmem:[#allocation51_spill] sm:$0xff] }
 0x122   : > { %v7708_v15 = vpop.f32.mrf.mxu1  ;;  %v5646_v9 = vpop.f32.mrf.mxu0  ;;  %5941 = vmatmul.mubr.msk.f32.vlgmr.msra.gmra.mxu0 %vm610_vm1, %v6191_v34 }
 0x123   : > { %8839 = vst [vmem:[#allocation86_spill] sm:$0xff] %v7708_v15  ;;  %6087 = vmatpush3.msk.msra.mxu0 %vm1057_vm0, %v7412_v5  ;;  %5943 = vmatprep.mubr.msk.f32.mxu0 %vm610_vm1, %v6192_v25 }
 0x124   : > { %v5572_v42 = vpop.f32.mrf.mxu1  ;;  %5867 = vmatmul.mubr.msk.f32.vlgmr.msra.gmra.mxu1 %vm610_vm1, %v7036_v47  ;;  %v2003_v45 = vpop.f32.mrf.mxu0 }
 0x125   : > { %v1521_v29 = vadd.f32 %v5572_v42, %v7521_v53  ;;  %6013 = vmatpush3.msk.msra.mxu1 %vm1057_vm0, %v7423_v39  ;;  %5869 = vmatprep.mubr.msk.f32.mxu1 %vm610_vm1, %v8840_v27  ;;  %v8842_v53 = vld [vmem:[#allocation52_spill] sm:$0xff] }
 0x126   : > { %v1515_v34 = vpop.f32.mrf.mxu1  ;;  %v5649_v15 = vpop.f32.mrf.mxu0  ;;  %5944 = vmatmul.mubr.msk.f32.gmra.mxu0 %vm610_vm1, %v6193_v60 }
 0x127   : > { %v7722_v5 = vadd.f32 %v5646_v9, %v1521_v29  ;;  %v1516_v25 = vadd.f32 %v1515_v34, %v7533_v28  ;;  %5946 = vmatprep.mubr.msk.f32.mxu0 %vm610_vm1, %v6194_v36  ;;  %v6195_v29 = vld [vmem:[#allocation2 + $0x58] sm:$0xff]  ;;  %v6196_v36 = vld [vmem:[#allocation2 + $0x60] sm:$0xff] }
 0x128   : > { %v5575_v47 = vpop.f32.mrf.mxu1  ;;  %5870 = vmatmul.mubr.msk.f32.gmra.mxu1 %vm610_vm1, %v8842_v53  ;;  %v2013_v39 = vpop.f32.mrf.mxu0 }
 0x129   : > { %8841 = vst [vmem:[#allocation51_spill] sm:$0xff] %v7722_v5  ;;  %v7728_v42 = vadd.f32 %v2003_v45, %v1516_v25  ;;  %v1530_v27 = vadd.f32 %v5575_v47, %v7545_v7  ;;  %5872 = vmatprep.mubr.msk.f32.mxu1 %vm610_vm1, %v8844_v55  ;;  %v8846_v5 = vld [vmem:[#allocation54_spill] sm:$0xff]  ;;  %v8847_v25 = vld [vmem:[#allocation55_spill] sm:$0xff] }
 0x12a   : > { %v1525_v60 = vpop.f32.mrf.mxu1  ;;  %v5652_v9 = vpop.f32.mrf.mxu0  ;;  %5947 = vmatmul.mubr.msk.f32.gmra.mxu0 %vm610_vm1, %v6195_v29  ;;  %v6197_v39 = vld [vmem:[#allocation2 + $0x68] sm:$0xff] }
 0x12b   : > { %8843 = vst [vmem:[#allocation52_spill] sm:$0xff] %v7728_v42  ;;  %v7734_v28 = vadd.f32 %v5649_v15, %v1530_v27  ;;  %5949 = vmatprep.mubr.msk.f32.mxu0 %vm610_vm1, %v6196_v36  ;;  %v6198_v15 = vld [vmem:[#allocation2 + $0x70] sm:$0xff] }
 0x12c   : > { %v5578_v34 = vpop.f32.mrf.mxu1  ;;  %5873 = vmatmul.mubr.msk.f32.gmra.mxu1 %vm610_vm1, %v8846_v5  ;;  %v2022_v45 = vpop.f32.mrf.mxu0  ;;  %v8848_v9 = vld [vmem:[#allocation56_spill] sm:$0xff] }
 0x12d   : > { %8845 = vst [vmem:[#allocation53_spill] sm:$0xff] %v7734_v28  ;;  %5875 = vmatprep.mubr.msk.f32.mxu1 %vm610_vm1, %v8847_v25  ;;  %v8850_v28 = vld [vmem:[#allocation57_spill] sm:$0xff] }
 0x12e   : > { %v1534_v7 = vpop.f32.mrf.mxu1  ;;  %v5655_v47 = vpop.f32.mrf.mxu0  ;;  %5950 = vmatmul.mubr.msk.f32.gmra.mxu0 %vm610_vm1, %v6197_v39  ;;  %v6199_v39 = vld [vmem:[#allocation2 + $0x78] sm:$0xff] }
 0x12f   : > { %v1535_v60 = vadd.f32 %v1534_v7, %v7563_v24  ;;  %5952 = vmatprep.mubr.msk.f32.mxu0 %vm610_vm1, %v6198_v15  ;;  %v6200_v15 = vld [vmem:[#allocation2 + $0x80] sm:$0xff] }
 0x130   : > { %v5581_v27 = vpop.f32.mrf.mxu1  ;;  %5876 = vmatmul.mubr.msk.f32.gmra.mxu1 %vm610_vm1, %v8848_v9  ;;  %v2031_v29 = vpop.f32.mrf.mxu0 }
 0x131   : > { %v7746_v36 = vadd.f32 %v2022_v45, %v1535_v60  ;;  %v1549_v34 = vadd.f32 %v5581_v27, %v7569_v52  ;;  %5878 = vmatprep.mubr.msk.f32.mxu1 %vm610_vm1, %v8850_v28  ;;  %v8851_v45 = vld [vmem:[#allocation58_spill] sm:$0xff] }
 0x132   : > { %v1543_v42 = vpop.f32.mrf.mxu1  ;;  %v5658_v25 = vpop.f32.mrf.mxu0  ;;  %5953 = vmatmul.mubr.msk.f32.gmra.mxu0 %vm610_vm1, %v6199_v39 }
 0x133   : > { %8849 = vst [vmem:[#allocation54_spill] sm:$0xff] %v7746_v36  ;;  %v7752_v24 = vadd.f32 %v5655_v47, %v1549_v34  ;;  %v1544_v7 = vadd.f32 %v1543_v42, %v7579_v59  ;;  %5955 = vmatprep.mubr.msk.f32.mxu0 %vm610_vm1, %v6200_v15  ;;  %v8852_v36 = vld [vmem:[#allocation59_spill] sm:$0xff]  ;;  %v8854_v15 = vld [vmem:[#allocation60_spill] sm:$0xff] }
 0x134   : > { %v5584_v9 = vpop.f32.mrf.mxu1  ;;  %5879 = vmatmul.mubr.msk.f32.gmra.mxu1 %vm610_vm1, %v8851_v45  ;;  %v2041_v52 = vpop.f32.mrf.mxu0  ;;  %v6201_v34 = vld [vmem:[#allocation2 + $0x88] sm:$0xff] }
 0x135   : > { %v7758_v60 = vadd.f32 %v2031_v29, %v1544_v7  ;;  %v1558_v27 = vadd.f32 %v5584_v9, %v7585_v26  ;;  %5881 = vmatprep.mubr.msk.f32.mxu1 %vm610_vm1, %v8852_v36  ;;  %v8855_v7 = vld [vmem:[#allocation61_spill] sm:$0xff] }
 0x136   : > { %v1553_v39 = vpop.f32.mrf.mxu1  ;;  %v5661_v47 = vpop.f32.mrf.mxu0  ;;  %5956 = vmatmul.mubr.msk.f32.gmra.mxu0 %vm610_vm1, %v6201_v34  ;;  %v8857_v34 = vld [vmem:[#allocation63_spill] sm:$0xff] }
 0x137   : > { %v7764_v59 = vadd.f32 %v5658_v25, %v1558_v27  ;;  %5958 = vmatprep.mubr.msk.f32.mxu0 %vm610_vm1, %v6864_v11  ;;  %v8856_v11 = vld [vmem:[#allocation62_spill] sm:$0xff] }
 0x138   : > { %v5587_v42 = vpop.f32.mrf.mxu1  ;;  %5882 = vmatmul.mubr.msk.f32.gmra.mxu1 %vm610_vm1, %v8854_v15  ;;  %v2050_v29 = vpop.f32.mrf.mxu0 }
 0x139   : > { %8853 = vst [vmem:[#allocation57_spill] sm:$0xff] %v7764_v59  ;;  %5884 = vmatprep.mubr.msk.f32.mxu1 %vm610_vm1, %v8855_v7 }
 0x13a   : > { %v1562_v26 = vpop.f32.mrf.mxu1  ;;  %v5664_v9 = vpop.f32.mrf.mxu0  ;;  %5959 = vmatmul.mubr.msk.f32.gmra.mxu0 %vm610_vm1, %v6879_v38 }
 0x13b   : > { %v1563_v52 = vadd.f32 %v1562_v26, %v7603_v13  ;;  %5961 = vmatprep.mubr.msk.f32.mxu0 %vm610_vm1, %v6890_v35 }
 0x13c   : > { %v5590_v25 = vpop.f32.mrf.mxu1  ;;  %5885 = vmatmul.mubr.msk.f32.gmra.mxu1 %vm610_vm1, %v8856_v11  ;;  %v2059_v27 = vpop.f32.mrf.mxu0 }
 0x13d   : > { %v7779_v39 = vadd.f32 %v2050_v29, %v1563_v52  ;;  %v1577_v47 = vadd.f32 %v5590_v25, %v7609_v41  ;;  %5887 = vmatprep.mubr.msk.f32.mxu1 %vm610_vm1, %v8857_v34  ;;  %v8858_v29 = vld [vmem:[#allocation64_spill] sm:$0xff]  ;;  %v8859_v25 = vld [vmem:[#allocation65_spill] sm:$0xff] }
 0x13e   : > { %v1571_v42 = vpop.f32.mrf.mxu1  ;;  %v5667_v59 = vpop.f32.mrf.mxu0  ;;  %5962 = vmatmul.mubr.msk.f32.gmra.mxu0 %vm610_vm1, %v6892_v8 }
 0x13f   : > { %v7786_v38 = vadd.f32 %v5664_v9, %v1577_v47  ;;  %v1572_v35 = vadd.f32 %v1571_v42, %v7619_v20  ;;  %5964 = vmatprep.mubr.msk.f32.mxu0 %vm610_vm1, %v6916_v61  ;;  %v8860_v47 = vld [vmem:[#allocation66_spill] sm:$0xff]  ;;  %v8861_v42 = vld [vmem:[#allocation67_spill] sm:$0xff] }
 0x140   : > { %v5593_v13 = vpop.f32.mrf.mxu1  ;;  %5888 = vmatmul.mubr.msk.f32.gmra.mxu1 %vm610_vm1, %v8858_v29  ;;  %v2069_v41 = vpop.f32.mrf.mxu0 }
 0x141   : > { %v7793_v26 = vadd.f32 %v2059_v27, %v1572_v35  ;;  %v1586_v52 = vadd.f32 %v5593_v13, %v7625_v56  ;;  %5890 = vmatprep.mubr.msk.f32.mxu1 %vm610_vm1, %v8859_v25 }
 0x142   : > { %v1581_v8 = vpop.f32.mrf.mxu1  ;;  %v5670_v9 = vpop.f32.mrf.mxu0  ;;  %5965 = vmatmul.mubr.msk.f32.gmra.mxu0 %vm610_vm1, %v6924_v48 }
 0x143   : > { %v7800_v20 = vadd.f32 %v5667_v59, %v1586_v52  ;;  %5967 = vmatprep.mubr.msk.f32.mxu0 %vm610_vm1, %v7511_v14  ;;  %v8862_v14 = vld [vmem:[#allocation68_spill] sm:$0xff] }
 0x144   : > { %v5596_v61 = vpop.f32.mrf.mxu1  ;;  %5891 = vmatmul.mubr.msk.f32.gmra.mxu1 %vm610_vm1, %v8860_v47  ;;  %v2078_v27 = vpop.f32.mrf.mxu0 }
 0x145   : > { %5893 = vmatprep.mubr.msk.f32.mxu1 %vm610_vm1, %v8861_v42  ;;  %v6203_v61 = vld [vmem:[#allocation2 + $0xe0] sm:$0xff] }
 0x146   : > { %v1590_v56 = vpop.f32.mrf.mxu1  ;;  %v5673_v35 = vpop.f32.mrf.mxu0  ;;  %5968 = vmatmul.mubr.msk.f32.gmra.mxu0 %vm610_vm1, %v7515_v30  ;;  %v6202_v30 = vld [vmem:[#allocation2 + $0xd8] sm:$0xff] }
 0x147   : > { %v1591_v48 = vadd.f32 %v1590_v56, %v7648_v2  ;;  %5970 = vmatprep.mubr.msk.f32.mxu0 %vm610_vm1, %v7525_v17 }
 0x148   : > { %v5599_v59 = vpop.f32.mrf.mxu1  ;;  %5894 = vmatmul.mubr.msk.f32.gmra.mxu1 %vm610_vm1, %v8862_v14  ;;  %v2087_v13 = vpop.f32.mrf.mxu0 }
 0x149   : > { %v7815_v41 = vadd.f32 %v2078_v27, %v1591_v48  ;;  %v1605_v52 = vadd.f32 %v5599_v59, %v7657_v62  ;;  %5896 = vmatprep.mubr.msk.f32.mxu1 %vm610_vm1, %v7196_v57 }
 0x14a   : > { %v1599_v8 = vpop.f32.mrf.mxu1  ;;  %v5676_v9 = vpop.f32.mrf.mxu0  ;;  %5971 = vmatmul.mubr.msk.f32.gmra.mxu0 %vm610_vm1, %v6202_v30 }
 0x14b   : > { %v7821_v2 = vadd.f32 %v5673_v35, %v1605_v52  ;;  %v1600_v17 = vadd.f32 %v1599_v8, %v7673_v49  ;;  %5973 = vmatprep.mubr.msk.f32.mxu0 %vm610_vm1, %v6203_v61  ;;  %v6204_v52 = vld [vmem:[#allocation2 + $0xe8] sm:$0xff]  ;;  %v6205_v8 = vld [vmem:[#allocation2 + $0xf0] sm:$0xff] }
 0x14c   : > { %v5602_v56 = vpop.f32.mrf.mxu1  ;;  %5897 = vmatmul.mubr.msk.f32.gmra.mxu1 %vm610_vm1, %v7202_v54  ;;  %v2097_v62 = vpop.f32.mrf.mxu0 }
 0x14d   : > { %v7827_v27 = vadd.f32 %v2087_v13, %v1600_v17  ;;  %v1614_v48 = vadd.f32 %v5602_v56, %v7682_v33  ;;  %5899 = vmatprep.mubr.msk.f32.mxu1 %vm610_vm1, %v7214_v19  ;;  %v8865_v17 = vld [vmem:[#allocation69_spill] sm:$0xff] }
 0x14e   : > { %v1609_v59 = vpop.f32.mrf.mxu1  ;;  %v5679_v35 = vpop.f32.mrf.mxu0  ;;  %5974 = vmatmul.mubr.msk.f32.gmra.mxu0 %vm610_vm1, %v6204_v52  ;;  %v6206_v56 = vld [vmem:[#allocation2 + $0xf8] sm:$0xff] }
 0x14f   : > { %8863 = vst [vmem:[#allocation58_spill] sm:$0xff] %v7827_v27  ;;  %v7833_v49 = vadd.f32 %v5676_v9, %v1614_v48  ;;  %5976 = vmatprep.mubr.msk.f32.mxu0 %vm610_vm1, %v6205_v8  ;;  %v6207_v9 = vld [vmem:[#allocation2 + $0x100] sm:$0xff] }
 0x150   : > { %v5605_v30 = vpop.f32.mrf.mxu1  ;;  %5900 = vmatmul.mubr.msk.f32.gmra.mxu1 %vm610_vm1, %v7221_v10  ;;  %v2106_v13 = vpop.f32.mrf.mxu0  ;;  %v8866_v59 = vld [vmem:[#allocation70_spill] sm:$0xff] }
 0x151   : > { %8864 = vst [vmem:[#allocation59_spill] sm:$0xff] %v7833_v49  ;;  %5902 = vmatprep.mubr.msk.f32.mxu1 %vm610_vm1, %v8865_v17  ;;  %v8868_v30 = vld [vmem:[#allocation71_spill] sm:$0xff] }
 0x152   : > { %v1618_v33 = vpop.f32.mrf.mxu1  ;;  %v5682_v61 = vpop.f32.mrf.mxu0  ;;  %5977 = vmatmul.mubr.msk.f32.gmra.mxu0 %vm610_vm1, %v6206_v56  ;;  %v6208_v56 = vld [vmem:[#allocation2 + $0x108] sm:$0xff] }
 0x153   : > { %v1619_v62 = vadd.f32 %v1618_v33, %v7704_v1  ;;  %5979 = vmatprep.mubr.msk.f32.mxu0 %vm610_vm1, %v6207_v9  ;;  %v6209_v9 = vld [vmem:[#allocation2 + $0x110] sm:$0xff] }
 0x154   : > { %v5608_v48 = vpop.f32.mrf.mxu1  ;;  %5903 = vmatmul.mubr.msk.f32.gmra.mxu1 %vm610_vm1, %v8866_v59  ;;  %v2115_v35 = vpop.f32.mrf.mxu0 }
 0x155   : > { %v7845_v52 = vadd.f32 %v2106_v13, %v1619_v62  ;;  %v1633_v8 = vadd.f32 %v5608_v48, %v7537_v0  ;;  %5905 = vmatprep.mubr.msk.f32.mxu1 %vm610_vm1, %v8868_v30  ;;  %v8870_v13 = vld [vmem:[#allocation72_spill] sm:$0xff] }
 0x156   : > { %v1627_v49 = vpop.f32.mrf.mxu1  ;;  %v5685_v27 = vpop.f32.mrf.mxu0  ;;  %5980 = vmatmul.mubr.msk.f32.gmra.mxu0 %vm610_vm1, %v6208_v56 }
 0x157   : > { %8867 = vst [vmem:[#allocation60_spill] sm:$0xff] %v7845_v52  ;;  %v7851_v1 = vadd.f32 %v5682_v61, %v1633_v8  ;;  %v1628_v33 = vadd.f32 %v1627_v49, %v7543_v46  ;;  %5982 = vmatprep.mubr.msk.f32.mxu0 %vm610_vm1, %v6209_v9  ;;  %v8872_v52 = vld [vmem:[#allocation73_spill] sm:$0xff]  ;;  %v6211_v49 = vld [vmem:[#allocation2 + $0x120] sm:$0xff] }
 0x158   : > { %v5611_v59 = vpop.f32.mrf.mxu1  ;;  %5906 = vmatmul.mubr.msk.f32.gmra.mxu1 %vm610_vm1, %v8870_v13  ;;  %v2125_v0 = vpop.f32.mrf.mxu0  ;;  %v6210_v8 = vld [vmem:[#allocation2 + $0x118] sm:$0xff] }
 0x159   : > { %8869 = vst [vmem:[#allocation61_spill] sm:$0xff] %v7851_v1  ;;  %v7857_v62 = vadd.f32 %v2115_v35, %v1628_v33  ;;  %v1642_v48 = vadd.f32 %v5611_v59, %v7551_v3  ;;  %5908 = vmatprep.mubr.msk.f32.mxu1 %vm610_vm1, %v8872_v52  ;;  %v8874_v1 = vld [vmem:[#allocation74_spill] sm:$0xff]  ;;  %v8875_v33 = vld [vmem:[#allocation75_spill] sm:$0xff] }
 0x15a   : > { %v1637_v56 = vpop.f32.mrf.mxu1  ;;  %v5688_v61 = vpop.f32.mrf.mxu0  ;;  %5983 = vmatmul.mubr.msk.f32.gmra.mxu0 %vm610_vm1, %v6210_v8  ;;  %v6212_v0 = vld [vmem:[#allocation2 + $0x128] sm:$0xff] }
 0x15b   : > { %8871 = vst [vmem:[#allocation62_spill] sm:$0xff] %v7857_v62  ;;  %v7863_v46 = vadd.f32 %v5685_v27, %v1642_v48  ;;  %5985 = vmatprep.mubr.msk.f32.mxu0 %vm610_vm1, %v6211_v49  ;;  %v6213_v27 = vld [vmem:[#allocation2 + $0x130] sm:$0xff] }
 0x15c   : > { %v5614_v9 = vpop.f32.mrf.mxu1  ;;  %5909 = vmatmul.mubr.msk.f32.gmra.mxu1 %vm610_vm1, %v8874_v1  ;;  %v2134_v35 = vpop.f32.mrf.mxu0  ;;  %v8876_v61 = vld [vmem:[#allocation76_spill] sm:$0xff] }
 0x15d   : > { %8873 = vst [vmem:[#allocation63_spill] sm:$0xff] %v7863_v46  ;;  %5911 = vmatprep.mubr.msk.f32.mxu1 %vm610_vm1, %v8875_v33  ;;  %v8878_v46 = vld [vmem:[#allocation77_spill] sm:$0xff] }
 0x15e   : > { %v1646_v3 = vpop.f32.mrf.mxu1  ;;  %v5691_v59 = vpop.f32.mrf.mxu0  ;;  %5986 = vmatmul.mubr.msk.f32.gmra.mxu0 %vm610_vm1, %v6212_v0  ;;  %v6214_v0 = vld [vmem:[#allocation2 + $0x138] sm:$0xff] }
 0x15f   : > { %v1647_v56 = vadd.f32 %v1646_v3, %v7567_v50  ;;  %5988 = vmatprep.mubr.msk.f32.mxu0 %vm610_vm1, %v6213_v27  ;;  %v6215_v27 = vld [vmem:[#allocation2 + $0x140] sm:$0xff] }
 0x160   : > { %v5617_v48 = vpop.f32.mrf.mxu1  ;;  %5912 = vmatmul.mubr.msk.f32.gmra.mxu1 %vm610_vm1, %v8876_v61  ;;  %v2143_v8 = vpop.f32.mrf.mxu0 }
 0x161   : > { %v7875_v49 = vadd.f32 %v2134_v35, %v1647_v56  ;;  %v1661_v9 = vadd.f32 %v5617_v48, %v7575_v44  ;;  %5914 = vmatprep.mubr.msk.f32.mxu1 %vm610_vm1, %v8878_v46  ;;  %v8880_v35 = vld [vmem:[#allocation78_spill] sm:$0xff] }
 0x162   : > { %v1655_v62 = vpop.f32.mrf.mxu1  ;;  %v5694_v33 = vpop.f32.mrf.mxu0  ;;  %5989 = vmatmul.mubr.msk.f32.gmra.mxu0 %vm610_vm1, %v6214_v0 }
 0x163   : > { %8877 = vst [vmem:[#allocation64_spill] sm:$0xff] %v7875_v49  ;;  %v7881_v50 = vadd.f32 %v5691_v59, %v1661_v9  ;;  %v1656_v3 = vadd.f32 %v1655_v62, %v7583_v63  ;;  %5991 = vmatprep.mubr.msk.f32.mxu0 %vm610_vm1, %v6215_v27  ;;  %v8882_v49 = vld [vmem:[#allocation79_spill] sm:$0xff]  ;;  %v6217_v62 = vld [vmem:[#allocation2 + $0x150] sm:$0xff] }
 0x164   : > { %v5620_v61 = vpop.f32.mrf.mxu1  ;;  %5915 = vmatmul.mubr.msk.f32.gmra.mxu1 %vm610_vm1, %v8880_v35  ;;  %v2153_v44 = vpop.f32.mrf.mxu0  ;;  %v6216_v9 = vld [vmem:[#allocation2 + $0x148] sm:$0xff] }
 0x165   : > { %8879 = vst [vmem:[#allocation65_spill] sm:$0xff] %v7881_v50  ;;  %v7887_v56 = vadd.f32 %v2143_v8, %v1656_v3  ;;  %v1670_v48 = vadd.f32 %v5620_v61, %v7591_v43  ;;  %5917 = vmatprep.mubr.msk.f32.mxu1 %vm610_vm1, %v8882_v49  ;;  %v8884_v50 = vld [vmem:[#allocation80_spill] sm:$0xff]  ;;  %v8885_v3 = vld [vmem:[#allocation81_spill] sm:$0xff] }
 0x166   : > { %v1665_v0 = vpop.f32.mrf.mxu1  ;;  %v5697_v59 = vpop.f32.mrf.mxu0  ;;  %5992 = vmatmul.mubr.msk.f32.gmra.mxu0 %vm610_vm1, %v6216_v9  ;;  %v6218_v44 = vld [vmem:[#allocation2 + $0x158] sm:$0xff] }
 0x167   : > { %8881 = vst [vmem:[#allocation66_spill] sm:$0xff] %v7887_v56  ;;  %v7893_v63 = vadd.f32 %v5694_v33, %v1670_v48  ;;  %5994 = vmatprep.mubr.msk.f32.mxu0 %vm610_vm1, %v6217_v62  ;;  %v6219_v33 = vld [vmem:[#allocation2 + $0x160] sm:$0xff] }
 0x168   : > { %v5623_v27 = vpop.f32.mrf.mxu1  ;;  %5918 = vmatmul.mubr.msk.f32.gmra.mxu1 %vm610_vm1, %v8884_v50  ;;  %v2162_v8 = vpop.f32.mrf.mxu0  ;;  %v8886_v59 = vld [vmem:[#allocation82_spill] sm:$0xff] }
 0x169   : > { %8883 = vst [vmem:[#allocation67_spill] sm:$0xff] %v7893_v63  ;;  %5920 = vmatprep.mubr.msk.f32.mxu1 %vm610_vm1, %v8885_v3 }
 0x16a   : > { %v1674_v43 = vpop.f32.mrf.mxu1  ;;  %v5700_v61 = vpop.f32.mrf.mxu0  ;;  %5995 = vmatmul.mubr.msk.f32.gmra.mxu0 %vm610_vm1, %v6218_v44  ;;  %v6220_v44 = vld [vmem:[#allocation2 + $0x168] sm:$0xff] }
 0x16b   : > { %v1675_v0 = vadd.f32 %v1674_v43, %v7607_v37  ;;  %5997 = vmatprep.mubr.msk.f32.mxu0 %vm610_vm1, %v6219_v33  ;;  %v6221_v33 = vld [vmem:[#allocation2 + $0x170] sm:$0xff] }
 0x16c   : > { %v5626_v48 = vpop.f32.mrf.mxu1  ;;  %5921 = vmatmul.mubr.msk.f32.gmra.mxu1 %vm610_vm1, %v8886_v59  ;;  %v2171_v9 = vpop.f32.mrf.mxu0 }
 0x16d   : > { %v7905_v62 = vadd.f32 %v2162_v8, %v1675_v0  ;;  %v1689_v27 = vadd.f32 %v5626_v48, %v7615_v12  ;;  %5923 = vmatprep.mubr.msk.f32.mxu1 %vm610_vm1, %v7346_v16  ;;  %v8887_v8 = vld [vmem:[#allocation34_spill] sm:$0xff] }
 0x16e   : > { %v1683_v63 = vpop.f32.mrf.mxu1  ;;  %v5703_v56 = vpop.f32.mrf.mxu0  ;;  %5998 = vmatmul.mubr.msk.f32.gmra.mxu0 %vm610_vm1, %v6220_v44 }
 0x16f   : > { %v7911_v37 = vadd.f32 %v5700_v61, %v1689_v27  ;;  %v1684_v43 = vadd.f32 %v1683_v63, %v7623_v58  ;;  %6000 = vmatprep.mubr.msk.f32.mxu0 %vm610_vm1, %v6221_v33  ;;  %v6222_v27 = vld [vmem:[#allocation2 + $0x178] sm:$0xff]  ;;  %v6223_v63 = vld [vmem:[#allocation2 + $0x180] sm:$0xff] }
 0x170   : > { %v5629_v59 = vpop.f32.mrf.mxu1  ;;  %5924 = vmatmul.mubr.msk.f32.gmra.mxu1 %vm610_vm1, %v8887_v8  ;;  %v2181_v12 = vpop.f32.mrf.mxu0 }
 0x171   : > { %v7917_v0 = vadd.f32 %v2171_v9, %v1684_v43  ;;  %v1698_v48 = vadd.f32 %v5629_v59, %v7631_v6  ;;  %5926 = vmatprep.mubr.msk.f32.mxu1 %vm610_vm1, %v7362_v40  ;;  %v2933_v6 = vrot.slane %v7635_v51, 2 }
 0x172   : > { %v1693_v44 = vpop.f32.mrf.mxu1  ;;  %v5706_v61 = vpop.f32.mrf.mxu0  ;;  %6001 = vmatmul.mubr.msk.f32.gmra.mxu0 %vm610_vm1, %v6222_v27 }
 0x173   : > { %8888 = vst [vmem:[#allocation68_spill] sm:$0xff] %v7917_v0  ;;  %v7923_v58 = vadd.f32 %v5703_v56, %v1698_v48  ;;  %6003 = vmatprep.mubr.msk.f32.mxu0 %vm610_vm1, %v6223_v63  ;;  %v2935_v56 = vrot.slane %v7639_v21, 2  ;;  %v7939_v61 = vld [vmem:[#allocation2 + $0x1a0] sm:$0xff] }
 0x174   : > { %v5632_v33 = vpop.f32.mrf.mxu1  ;;  %5927 = vmatmul.mubr.msk.f32.gmra.mxu1 %vm610_vm1, %v7368_v22  ;;  %v2190_v9 = vpop.f32.mrf.mxu0 }
 0x175   : > { %8889 = vst [vmem:[#allocation69_spill] sm:$0xff] %v7923_v58  ;;  %5929 = vmatprep.mubr.msk.f32.mxu1 %vm610_vm1, %v7378_v23  ;;  %v8891_v33 = vld [vmem:[#allocation41_spill] sm:$0xff] }
 0x176   : > { %v1702_v59 = vpop.f32.mrf.mxu1  ;;  %v5709_v43 = vpop.f32.mrf.mxu0  ;;  %6004 = vmatmul.mubr.msk.f32.gmra.mxu0 %vm610_vm1, %v7635_v51  ;;  %v8892_v51 = vrot.slane %v6960_v18, 2  ;;  %v7962_v18 = vld [vmem:[#allocation2 + $0x1a8] sm:$0xff] }
 0x177   : > { %v1703_v12 = vadd.f32 %v1702_v59, %v7655_v32  ;;  %6006 = vmatprep.mubr.msk.f32.mxu0 %vm610_vm1, %v7639_v21  ;;  %v8893_v21 = vld [vmem:[#allocation6_spill] sm:$0xff] }
 0x178   : > { %v5635_v48 = vpop.f32.mrf.mxu1  ;;  %5930 = vmatmul.mubr.msk.f32.gmra.mxu1 %vm610_vm1, %v7384_v4  ;;  %v2199_v44 = vpop.f32.mrf.mxu0  ;;  %v7949_v32 = vsel %vm1740_vm5, %v8892_v51, %v2933_v6 }
 0x179   : > { %v7941_v27 = vadd.f32 %v2190_v9, %v1703_v12  ;;  %v1717_v63 = vadd.f32 %v5635_v48, %v7669_v31  ;;  %5932 = vmatprep.mubr.msk.f32.mxu1 %vm610_vm1, %v8891_v33  ;;  %v7955_v9 = vsel %vm1740_vm5, %v2933_v6, %v2935_v56  ;;  %v8895_v31 = vld [vmem:[#allocation83_spill] sm:$0xff]  ;;  %v8897_v33 = vld [vmem:[#allocation85_spill] sm:$0xff]  ;;  %v8898_v6 = vrot.slane %v8893_v21, 2 }
 0x17a   : > { %v1711_v58 = vpop.f32.mrf.mxu1  ;;  %v5712_v0 = vpop.f32.mrf.mxu0  ;;  %6007 = vmatmul.mubr.msk.f32.gmra.mxu0 %vm610_vm1, %v8893_v21 }
 0x17b   : > { %8890 = vst [vmem:[#allocation71_spill] sm:$0xff] %v7941_v27  ;;  %v7957_v12 = vadd.f32 %v5709_v43, %v1717_v63  ;;  %v1712_v48 = vadd.f32 %v1711_v58, %v8895_v31  ;;  %6009 = vmatprep.mubr.msk.f32.mxu0 %vm610_vm1, %v7939_v61  ;;  %v7974_v58 = vsel %vm1740_vm5, %v2935_v56, %v8898_v6 }
 0x17c   : > { %v5638_v51 = vpop.f32.mrf.mxu1  ;;  %5933 = vmatmul.mubr.msk.f32.gmra.mxu1 %vm610_vm1, %v7949_v32  ;;  %v2209_v59 = vpop.f32.mrf.mxu0 }
 0x17d   : > { %8894 = vst [vmem:[#allocation72_spill] sm:$0xff] %v7957_v12  ;;  %v7966_v27 = vadd.f32 %v2199_v44, %v1712_v48  ;;  %v1726_v4 = vadd.f32 %v5638_v51, %v8897_v33  ;;  %5935 = vmatprep.mubr.msk.f32.mxu1 %vm610_vm1, %v7955_v9  ;;  %v8900_v59 = vld [vmem:[#allocation11_spill] sm:$0xff]  ;;  %v8901_v51 = vld [vmem:[#allocation86_spill] sm:$0xff]  ;;  %v8908_v12 = vld [vmem:[#allocation56_spill] sm:$0xff] }
 0x17e   : > { %v1721_v43 = vpop.f32.mrf.mxu1  ;;  %v5715_v63 = vpop.f32.mrf.mxu0  ;;  %6010 = vmatmul.mubr.msk.f32.gmra.mxu0 %vm610_vm1, %v7962_v18 }
 0x17f   : > { %8896 = vst [vmem:[#allocation73_spill] sm:$0xff] %v7966_v27  ;;  %v7978_v31 = vadd.f32 %v5712_v0, %v1726_v4  ;;  %6088 = vmatprep.mubr.msk.f32.mxu0 %vm610_vm1, %v8842_v53  ;;  %v8902_v53 = vld [vmem:[#allocation14_spill] sm:$0xff]  ;;  %v8904_v63 = vld [vmem:[#allocation51_spill] sm:$0xff] }
 0x180   : > { %v5641_v44 = vpop.f32.mrf.mxu1  ;;  %5936 = vmatmul.mubr.msk.f32.gmra.mxu1 %vm610_vm1, %v7974_v58  ;;  %v2218_v33 = vpop.f32.mrf.mxu0 }
 0x181   : > { %8899 = vst [vmem:[#allocation74_spill] sm:$0xff] %v7978_v31  ;;  %6014 = vmatprep.mubr.msk.f32.mxu1 %vm610_vm1, %v8900_v59  ;;  %v8905_v59 = vld [vmem:[#allocation15_spill] sm:$0xff] }
 0x182   : > { %v1730_v56 = vpop.f32.mrf.mxu1  ;;  %v5794_v48 = vpop.f32.mrf.mxu0  ;;  %6089 = vmatmul.mubr.msk.f32.vlgmr.msra.gmra.mxu0 %vm610_vm1, %v8844_v55  ;;  %v8906_v55 = vld [vmem:[#allocation55_spill] sm:$0xff] }
 0x183   : > { %v1731_v6 = vadd.f32 %v1730_v56, %v8901_v51  ;;  %6091 = vmatprep.mubr.msk.f32.mxu0 %vm610_vm1, %v8846_v5  ;;  %v8907_v5 = vld [vmem:[#allocation52_spill] sm:$0xff] }
 0x184   : > { %v5720_v4 = vpop.f32.mrf.mxu1  ;;  %6015 = vmatmul.mubr.msk.f32.vlgmr.msra.gmra.mxu1 %vm610_vm1, %v8902_v53  ;;  %v2676_v0 = vpop.f32.mrf.mxu0 }
 0x185   : > { %v7993_v43 = vadd.f32 %v2218_v33, %v1731_v6  ;;  %v2561_v44 = vadd.f32 %v5720_v4, %v8904_v63  ;;  %6017 = vmatprep.mubr.msk.f32.mxu1 %vm610_vm1, %v8905_v59  ;;  %v8909_v33 = vld [vmem:[#allocation18_spill] sm:$0xff]  ;;  %v8910_v63 = vld [vmem:[#allocation53_spill] sm:$0xff] }
 0x186   : > { %v2337_v31 = vpop.f32.mrf.mxu1  ;;  %v5797_v27 = vpop.f32.mrf.mxu0  ;;  %6092 = vmatmul.mubr.msk.f32.gmra.mxu0 %vm610_vm1, %v8906_v55 }
 0x187   : > { %8903 = vst [vmem:[#allocation77_spill] sm:$0xff] %v7993_v43  ;;  %v8000_v56 = vadd.f32 %v5794_v48, %v2561_v44  ;;  %v2560_v51 = vadd.f32 %v2337_v31, %v8907_v5  ;;  %6094 = vmatprep.mubr.msk.f32.mxu0 %vm610_vm1, %v8908_v12  ;;  %v8911_v43 = vld [vmem:[#allocation20_spill] sm:$0xff]  ;;  %v8912_v44 = vld [vmem:[#allocation22_spill] sm:$0xff]  ;;  %v8913_v5 = vld [vmem:[#allocation23_spill] sm:$0xff] }
 0x188   : > { %v5723_v53 = vpop.f32.mrf.mxu1  ;;  %6018 = vmatmul.mubr.msk.f32.gmra.mxu1 %vm610_vm1, %v8909_v33  ;;  %v2686_v6 = vpop.f32.mrf.mxu0 }
 0x189   : > { %v8007_v4 = vadd.f32 %v2676_v0, %v2560_v51  ;;  %v2562_v59 = vadd.f32 %v5723_v53, %v8910_v63  ;;  %6020 = vmatprep.mubr.msk.f32.mxu1 %vm610_vm1, %v8911_v43  ;;  %v8914_v53 = vld [vmem:[#allocation54_spill] sm:$0xff] }
 0x18a   : > { %v2347_v55 = vpop.f32.mrf.mxu1  ;;  %v5800_v48 = vpop.f32.mrf.mxu0  ;;  %6095 = vmatmul.mubr.msk.f32.gmra.mxu0 %vm610_vm1, %v8850_v28 }
 0x18b   : > { %v8014_v31 = vadd.f32 %v5797_v27, %v2562_v59  ;;  %6097 = vmatprep.mubr.msk.f32.mxu0 %vm610_vm1, %v8851_v45  ;;  %v8915_v45 = vld [vmem:[#allocation26_spill] sm:$0xff]  ;;  %v8916_v59 = vld [vmem:[#allocation27_spill] sm:$0xff] }
 0x18c   : > { %v5726_v12 = vpop.f32.mrf.mxu1  ;;  %6021 = vmatmul.mubr.msk.f32.gmra.mxu1 %vm610_vm1, %v8912_v44  ;;  %v2695_v0 = vpop.f32.mrf.mxu0  ;;  %v8917_v44 = vld [vmem:[#allocation30_spill] sm:$0xff] }
 0x18d   : > { %6023 = vmatprep.mubr.msk.f32.mxu1 %vm610_vm1, %v8913_v5  ;;  %v8918_v5 = vld [vmem:[#allocation57_spill] sm:$0xff] }
 0x18e   : > { %v2356_v51 = vpop.f32.mrf.mxu1  ;;  %v5803_v43 = vpop.f32.mrf.mxu0  ;;  %6098 = vmatmul.mubr.msk.f32.gmra.mxu0 %vm610_vm1, %v8852_v36 }
 0x18f   : > { %v2563_v28 = vadd.f32 %v2356_v51, %v8914_v53  ;;  %6100 = vmatprep.mubr.msk.f32.mxu0 %vm610_vm1, %v8854_v15  ;;  %v8919_v53 = vld [vmem:[#allocation31_spill] sm:$0xff] }
 0x190   : > { %v5729_v27 = vpop.f32.mrf.mxu1  ;;  %6024 = vmatmul.mubr.msk.f32.gmra.mxu1 %vm610_vm1, %v8915_v45  ;;  %v2704_v33 = vpop.f32.mrf.mxu0  ;;  %v8921_v45 = vld [vmem:[#allocation37_spill] sm:$0xff] }
 0x191   : > { %v8029_v6 = vadd.f32 %v2695_v0, %v2563_v28  ;;  %v2565_v63 = vadd.f32 %v5729_v27, %v7752_v24  ;;  %6026 = vmatprep.mubr.msk.f32.mxu1 %vm610_vm1, %v8916_v59  ;;  %v8920_v28 = vld [vmem:[#allocation35_spill] sm:$0xff] }
 0x192   : > { %v2365_v55 = vpop.f32.mrf.mxu1  ;;  %v5806_v48 = vpop.f32.mrf.mxu0  ;;  %6101 = vmatmul.mubr.msk.f32.gmra.mxu0 %vm610_vm1, %v8855_v7 }
 0x193   : > { %v8036_v36 = vadd.f32 %v5803_v43, %v2565_v63  ;;  %v2564_v15 = vadd.f32 %v2365_v55, %v7758_v60  ;;  %6103 = vmatprep.mubr.msk.f32.mxu0 %vm610_vm1, %v8856_v11 }
 0x194   : > { %v5732_v12 = vpop.f32.mrf.mxu1  ;;  %6027 = vmatmul.mubr.msk.f32.gmra.mxu1 %vm610_vm1, %v8917_v44  ;;  %v2714_v24 = vpop.f32.mrf.mxu0 }
 0x195   : > { %v8043_v0 = vadd.f32 %v2704_v33, %v2564_v15  ;;  %v2566_v51 = vadd.f32 %v5732_v12, %v8918_v5  ;;  %6029 = vmatprep.mubr.msk.f32.mxu1 %vm610_vm1, %v8919_v53  ;;  %v8923_v12 = vld [vmem:[#allocation42_spill] sm:$0xff]  ;;  %v8924_v5 = vld [vmem:[#allocation45_spill] sm:$0xff] }
 0x196   : > { %v2375_v7 = vpop.f32.mrf.mxu1  ;;  %v5809_v43 = vpop.f32.mrf.mxu0  ;;  %6104 = vmatmul.mubr.msk.f32.gmra.mxu0 %vm610_vm1, %v8857_v34 }
 0x197   : > { %v8050_v60 = vadd.f32 %v5806_v48, %v2566_v51  ;;  %6106 = vmatprep.mubr.msk.f32.mxu0 %vm610_vm1, %v8858_v29  ;;  %v8922_v29 = vld [vmem:[#allocation40_spill] sm:$0xff]  ;;  %v8925_v7 = vld [vmem:[#allocation46_spill] sm:$0xff] }
 0x198   : > { %v5735_v11 = vpop.f32.mrf.mxu1  ;;  %6030 = vmatmul.mubr.msk.f32.gmra.mxu1 %vm610_vm1, %v8920_v28  ;;  %v2723_v27 = vpop.f32.mrf.mxu0 }
 0x199   : > { %6032 = vmatprep.mubr.msk.f32.mxu1 %vm610_vm1, %v8921_v45  ;;  %v8926_v11 = vld [vmem:[#allocation49_spill] sm:$0xff] }
 0x19a   : > { %v2384_v33 = vpop.f32.mrf.mxu1  ;;  %v5812_v63 = vpop.f32.mrf.mxu0  ;;  %6107 = vmatmul.mubr.msk.f32.gmra.mxu0 %vm610_vm1, %v8859_v25 }
 0x19b   : > { %v2567_v34 = vadd.f32 %v2384_v33, %v7779_v39  ;;  %6109 = vmatprep.mubr.msk.f32.mxu0 %vm610_vm1, %v8860_v47 }
 0x19c   : > { %v5738_v59 = vpop.f32.mrf.mxu1  ;;  %6033 = vmatmul.mubr.msk.f32.gmra.mxu1 %vm610_vm1, %v8922_v29  ;;  %v2732_v55 = vpop.f32.mrf.mxu0  ;;  %v8929_v29 = vld [vmem:[#allocation5_spill] sm:$0xff] }
 0x19d   : > { %v8065_v48 = vadd.f32 %v2723_v27, %v2567_v34  ;;  %v2569_v15 = vadd.f32 %v5738_v59, %v7786_v38  ;;  %6035 = vmatprep.mubr.msk.f32.mxu1 %vm610_vm1, %v8923_v12  ;;  %v8927_v27 = vld [vmem:[#allocation3_spill] sm:$0xff]  ;;  %v8931_v12 = vld [vmem:[#allocation70_spill] sm:$0xff] }
 0x19e   : > { %v2393_v44 = vpop.f32.mrf.mxu1  ;;  %v5815_v24 = vpop.f32.mrf.mxu0  ;;  %6110 = vmatmul.mubr.msk.f32.gmra.mxu0 %vm610_vm1, %v8861_v42 }
 0x19f   : > { %v8072_v39 = vadd.f32 %v5812_v63, %v2569_v15  ;;  %v2568_v25 = vadd.f32 %v2393_v44, %v7793_v26  ;;  %6112 = vmatprep.mubr.msk.f32.mxu0 %vm610_vm1, %v8862_v14 }
 0x1a0   : > { %v5741_v47 = vpop.f32.mrf.mxu1  ;;  %6036 = vmatmul.mubr.msk.f32.gmra.mxu1 %vm610_vm1, %v8924_v5  ;;  %v2742_v38 = vpop.f32.mrf.mxu0 }
 0x1a1   : > { %v8079_v51 = vadd.f32 %v2732_v55, %v2568_v25  ;;  %v2570_v53 = vadd.f32 %v5741_v47, %v7800_v20  ;;  %6038 = vmatprep.mubr.msk.f32.mxu1 %vm610_vm1, %v8925_v7  ;;  %v8933_v47 = vld [vmem:[#allocation59_spill] sm:$0xff]  ;;  %v8934_v38 = vld [vmem:[#allocation9_spill] sm:$0xff] }
 0x1a2   : > { %v2403_v42 = vpop.f32.mrf.mxu1  ;;  %v5818_v43 = vpop.f32.mrf.mxu0  ;;  %6113 = vmatmul.mubr.msk.f32.gmra.mxu0 %vm610_vm1, %v7196_v57 }
 0x1a3   : > { %v8086_v26 = vadd.f32 %v5815_v24, %v2570_v53  ;;  %6115 = vmatprep.mubr.msk.f32.mxu0 %vm610_vm1, %v7202_v54  ;;  %v8928_v54 = vld [vmem:[#allocation4_spill] sm:$0xff] }
 0x1a4   : > { %v5744_v14 = vpop.f32.mrf.mxu1  ;;  %6039 = vmatmul.mubr.msk.f32.gmra.mxu1 %vm610_vm1, %v8926_v11  ;;  %v2751_v28 = vpop.f32.mrf.mxu0  ;;  %v8932_v24 = vld [vmem:[#allocation8_spill] sm:$0xff]  ;;  %v8936_v11 = vld [vmem:[#allocation13_spill] sm:$0xff] }
 0x1a5   : > { %6041 = vmatprep.mubr.msk.f32.mxu1 %vm610_vm1, %v8927_v27  ;;  %v8935_v43 = vld [vmem:[#allocation12_spill] sm:$0xff] }
 0x1a6   : > { %v2412_v20 = vpop.f32.mrf.mxu1  ;;  %v5821_v45 = vpop.f32.mrf.mxu0  ;;  %6116 = vmatmul.mubr.msk.f32.gmra.mxu0 %vm610_vm1, %v7214_v19 }
 0x1a7   : > { %v2571_v57 = vadd.f32 %v2412_v20, %v7815_v41  ;;  %6118 = vmatprep.mubr.msk.f32.mxu0 %vm610_vm1, %v7221_v10  ;;  %v8930_v10 = vld [vmem:[#allocation58_spill] sm:$0xff]  ;;  %v8937_v20 = vld [vmem:[#allocation60_spill] sm:$0xff] }
 0x1a8   : > { %v5747_v33 = vpop.f32.mrf.mxu1  ;;  %6042 = vmatmul.mubr.msk.f32.gmra.mxu1 %vm610_vm1, %v8928_v54  ;;  %v2760_v63 = vpop.f32.mrf.mxu0  ;;  %v8939_v54 = vld [vmem:[#allocation61_spill] sm:$0xff] }
 0x1a9   : > { %v8101_v34 = vadd.f32 %v2751_v28, %v2571_v57  ;;  %v2573_v59 = vadd.f32 %v5747_v33, %v7821_v2  ;;  %6044 = vmatprep.mubr.msk.f32.mxu1 %vm610_vm1, %v8929_v29 }
 0x1aa   : > { %v2421_v55 = vpop.f32.mrf.mxu1  ;;  %v5824_v15 = vpop.f32.mrf.mxu0  ;;  %6119 = vmatmul.mubr.msk.f32.gmra.mxu0 %vm610_vm1, %v8865_v17 }
 0x1ab   : > { %v8108_v19 = vadd.f32 %v5821_v45, %v2573_v59  ;;  %v2572_v41 = vadd.f32 %v2421_v55, %v8930_v10  ;;  %6121 = vmatprep.mubr.msk.f32.mxu0 %vm610_vm1, %v8931_v12  ;;  %v8940_v59 = vld [vmem:[#allocation17_spill] sm:$0xff] }
 0x1ac   : > { %v5750_v44 = vpop.f32.mrf.mxu1  ;;  %6045 = vmatmul.mubr.msk.f32.gmra.mxu1 %vm610_vm1, %v8932_v24  ;;  %v2770_v2 = vpop.f32.mrf.mxu0 }
 0x1ad   : > { %v8115_v25 = vadd.f32 %v2760_v63, %v2572_v41  ;;  %v2574_v5 = vadd.f32 %v5750_v44, %v8933_v47  ;;  %6047 = vmatprep.mubr.msk.f32.mxu1 %vm610_vm1, %v8934_v38  ;;  %v8943_v41 = vld [vmem:[#allocation76_spill] sm:$0xff]  ;;  %v8944_v44 = vld [vmem:[#allocation19_spill] sm:$0xff]  ;;  %v8946_v38 = vld [vmem:[#allocation21_spill] sm:$0xff] }
 0x1ae   : > { %v2431_v17 = vpop.f32.mrf.mxu1  ;;  %v5827_v53 = vpop.f32.mrf.mxu0  ;;  %6122 = vmatmul.mubr.msk.f32.gmra.mxu0 %vm610_vm1, %v8868_v30  ;;  %v8945_v47 = vld [vmem:[#allocation63_spill] sm:$0xff] }
 0x1af   : > { %v8122_v7 = vadd.f32 %v5824_v15, %v2574_v5  ;;  %6124 = vmatprep.mubr.msk.f32.mxu0 %vm610_vm1, %v8870_v13  ;;  %v8938_v13 = vld [vmem:[#allocation16_spill] sm:$0xff] }
 0x1b0   : > { %v5753_v42 = vpop.f32.mrf.mxu1  ;;  %6048 = vmatmul.mubr.msk.f32.gmra.mxu1 %vm610_vm1, %v8935_v43  ;;  %v2779_v14 = vpop.f32.mrf.mxu0 }
 0x1b1   : > { %6050 = vmatprep.mubr.msk.f32.mxu1 %vm610_vm1, %v8936_v11 }
 0x1b2   : > { %v2440_v28 = vpop.f32.mrf.mxu1  ;;  %v5830_v27 = vpop.f32.mrf.mxu0  ;;  %6125 = vmatmul.mubr.msk.f32.gmra.mxu0 %vm610_vm1, %v8872_v52  ;;  %v8941_v52 = vld [vmem:[#allocation75_spill] sm:$0xff] }
 0x1b3   : > { %v2575_v30 = vadd.f32 %v2440_v28, %v8937_v20  ;;  %6127 = vmatprep.mubr.msk.f32.mxu0 %vm610_vm1, %v8874_v1  ;;  %v8942_v1 = vld [vmem:[#allocation62_spill] sm:$0xff]  ;;  %v8948_v28 = vld [vmem:[#allocation25_spill] sm:$0xff] }
 0x1b4   : > { %v5756_v45 = vpop.f32.mrf.mxu1  ;;  %6051 = vmatmul.mubr.msk.f32.gmra.mxu1 %vm610_vm1, %v8938_v13  ;;  %v2788_v57 = vpop.f32.mrf.mxu0 }
 0x1b5   : > { %v8137_v33 = vadd.f32 %v2779_v14, %v2575_v30  ;;  %v2577_v63 = vadd.f32 %v5756_v45, %v8939_v54  ;;  %6053 = vmatprep.mubr.msk.f32.mxu1 %vm610_vm1, %v8940_v59  ;;  %v8947_v14 = vld [vmem:[#allocation24_spill] sm:$0xff]  ;;  %v8951_v54 = vld [vmem:[#allocation65_spill] sm:$0xff] }
 0x1b6   : > { %v2449_v29 = vpop.f32.mrf.mxu1  ;;  %v5833_v55 = vpop.f32.mrf.mxu0  ;;  %6128 = vmatmul.mubr.msk.f32.gmra.mxu0 %vm610_vm1, %v8941_v52  ;;  %v8949_v30 = vld [vmem:[#allocation64_spill] sm:$0xff]  ;;  %v8952_v59 = vld [vmem:[#allocation29_spill] sm:$0xff] }
 0x1b7   : > { %v8144_v15 = vadd.f32 %v5830_v27, %v2577_v63  ;;  %v2576_v10 = vadd.f32 %v2449_v29, %v8942_v1  ;;  %6130 = vmatprep.mubr.msk.f32.mxu0 %vm610_vm1, %v8943_v41  ;;  %v8954_v1 = vld [vmem:[#allocation82_spill] sm:$0xff]  ;;  %v8955_v41 = vld [vmem:[#allocation32_spill] sm:$0xff] }
 0x1b8   : > { %v5759_v12 = vpop.f32.mrf.mxu1  ;;  %6054 = vmatmul.mubr.msk.f32.gmra.mxu1 %vm610_vm1, %v8944_v44  ;;  %v2798_v24 = vpop.f32.mrf.mxu0 }
 0x1b9   : > { %v8151_v2 = vadd.f32 %v2788_v57, %v2576_v10  ;;  %v2578_v5 = vadd.f32 %v5759_v12, %v8945_v47  ;;  %6056 = vmatprep.mubr.msk.f32.mxu1 %vm610_vm1, %v8946_v38  ;;  %v8956_v24 = vld [vmem:[#allocation67_spill] sm:$0xff] }
 0x1ba   : > { %v2459_v17 = vpop.f32.mrf.mxu1  ;;  %v5836_v53 = vpop.f32.mrf.mxu0  ;;  %6131 = vmatmul.mubr.msk.f32.gmra.mxu0 %vm610_vm1, %v8878_v46 }
 0x1bb   : > { %v8158_v42 = vadd.f32 %v5833_v55, %v2578_v5  ;;  %6133 = vmatprep.mubr.msk.f32.mxu0 %vm610_vm1, %v8880_v35  ;;  %v8950_v35 = vld [vmem:[#allocation28_spill] sm:$0xff]  ;;  %v8957_v5 = vld [vmem:[#allocation33_spill] sm:$0xff] }
 0x1bc   : > { %v5762_v43 = vpop.f32.mrf.mxu1  ;;  %6057 = vmatmul.mubr.msk.f32.gmra.mxu1 %vm610_vm1, %v8947_v14  ;;  %v2807_v11 = vpop.f32.mrf.mxu0 }
 0x1bd   : > { %6059 = vmatprep.mubr.msk.f32.mxu1 %vm610_vm1, %v8948_v28  ;;  %v8958_v43 = vld [vmem:[#allocation38_spill] sm:$0xff] }
 0x1be   : > { %v2468_v27 = vpop.f32.mrf.mxu1  ;;  %v5839_v20 = vpop.f32.mrf.mxu0  ;;  %6134 = vmatmul.mubr.msk.f32.gmra.mxu0 %vm610_vm1, %v8882_v49 }
 0x1bf   : > { %v2579_v46 = vadd.f32 %v2468_v27, %v8949_v30  ;;  %6136 = vmatprep.mubr.msk.f32.mxu0 %vm610_vm1, %v8884_v50  ;;  %v8953_v50 = vld [vmem:[#allocation66_spill] sm:$0xff] }
 0x1c0   : > { %v5765_v45 = vpop.f32.mrf.mxu1  ;;  %6060 = vmatmul.mubr.msk.f32.gmra.mxu1 %vm610_vm1, %v8950_v35  ;;  %v2816_v13 = vpop.f32.mrf.mxu0  ;;  %v8961_v35 = vld [vmem:[#allocation44_spill] sm:$0xff] }
 0x1c1   : > { %v8173_v57 = vadd.f32 %v2807_v11, %v2579_v46  ;;  %v2581_v63 = vadd.f32 %v5765_v45, %v8951_v54  ;;  %6062 = vmatprep.mubr.msk.f32.mxu1 %vm610_vm1, %v8952_v59  ;;  %v8959_v11 = vld [vmem:[#allocation39_spill] sm:$0xff] }
 0x1c2   : > { %v2477_v29 = vpop.f32.mrf.mxu1  ;;  %v5842_v55 = vpop.f32.mrf.mxu0  ;;  %6137 = vmatmul.mubr.msk.f32.gmra.mxu0 %vm610_vm1, %v8885_v3 }
 0x1c3   : > { %v8180_v49 = vadd.f32 %v5839_v20, %v2581_v63  ;;  %v2580_v52 = vadd.f32 %v2477_v29, %v8953_v50  ;;  %6139 = vmatprep.mubr.msk.f32.mxu0 %vm610_vm1, %v8954_v1  ;;  %v8963_v63 = vld [vmem:[#allocation36_spill] sm:$0xff]  ;;  %v8964_v29 = vld [vmem:[#allocation47_spill] sm:$0xff]  ;;  %v8965_v50 = vld [vmem:[#allocation69_spill] sm:$0xff] }
 0x1c4   : > { %v5768_v10 = vpop.f32.mrf.mxu1  ;;  %6063 = vmatmul.mubr.msk.f32.gmra.mxu1 %vm610_vm1, %v8955_v41  ;;  %v2826_v12 = vpop.f32.mrf.mxu0  ;;  %v8966_v1 = vld [vmem:[#allocation48_spill] sm:$0xff]  ;;  %v8967_v41 = vld [vmem:[#allocation41_spill] sm:$0xff] }
 0x1c5   : > { %v8187_v44 = vadd.f32 %v2816_v13, %v2580_v52  ;;  %v2582_v47 = vadd.f32 %v5768_v10, %v8956_v24  ;;  %6065 = vmatprep.mubr.msk.f32.mxu1 %vm610_vm1, %v8957_v5  ;;  %v3944_v12 = vrot.slane %v7939_v61, 2  ;;  %v8968_v5 = vld [vmem:[#allocation50_spill] sm:$0xff] }
 0x1c6   : > { %v2487_v3 = vpop.f32.mrf.mxu1  ;;  %v5845_v38 = vpop.f32.mrf.mxu0  ;;  %6140 = vmatmul.mubr.msk.f32.gmra.mxu0 %vm610_vm1, %v7346_v16 }
 0x1c7   : > { %v8194_v17 = vadd.f32 %v5842_v55, %v2582_v47  ;;  %6142 = vmatprep.mubr.msk.f32.mxu0 %vm610_vm1, %v8887_v8  ;;  %v8960_v8 = vld [vmem:[#allocation43_spill] sm:$0xff]  ;;  %v3946_v38 = vrot.slane %v7962_v18, 2 }
 0x1c8   : > { %v5771_v53 = vpop.f32.mrf.mxu1  ;;  %6066 = vmatmul.mubr.msk.f32.gmra.mxu1 %vm610_vm1, %v8958_v43  ;;  %v2835_v14 = vpop.f32.mrf.mxu0  ;;  %v3606_v43 = vrot.slane %v7939_v61, 1 }
 0x1c9   : > { %6068 = vmatprep.mubr.msk.f32.mxu1 %vm610_vm1, %v8959_v11  ;;  %v810_v53 = vld [vmem:[#allocation2 + $0x1b0] sm:$0xff] }
 0x1ca   : > { %v2496_v28 = vpop.f32.mrf.mxu1  ;;  %v5848_v27 = vpop.f32.mrf.mxu0  ;;  %6143 = vmatmul.mubr.msk.f32.gmra.mxu0 %vm610_vm1, %v7362_v40  ;;  %v3948_v61 = vrot.slane %v810_v53, 2 }
 0x1cb   : > { %v2583_v16 = vadd.f32 %v2496_v28, %v7905_v62  ;;  %6145 = vmatprep.mubr.msk.f32.mxu0 %vm610_vm1, %v7368_v22  ;;  %v8962_v22 = vld [vmem:[#allocation68_spill] sm:$0xff] }
 0x1cc   : > { %v5774_v20 = vpop.f32.mrf.mxu1  ;;  %6069 = vmatmul.mubr.msk.f32.gmra.mxu1 %vm610_vm1, %v8960_v8  ;;  %v2844_v30 = vpop.f32.mrf.mxu0 }
 0x1cd   : > { %v8209_v46 = vadd.f32 %v2835_v14, %v2583_v16  ;;  %v2585_v45 = vadd.f32 %v5774_v20, %v7911_v37  ;;  %6071 = vmatprep.mubr.msk.f32.mxu1 %vm610_vm1, %v8961_v35  ;;  %v8969_v14 = vld [vmem:[#allocation7_spill] sm:$0xff]  ;;  %v8971_v20 = vrot.slane %v8893_v21, 2 }
 0x1ce   : > { %v2505_v13 = vpop.f32.mrf.mxu1  ;;  %v5851_v54 = vpop.f32.mrf.mxu0  ;;  %6146 = vmatmul.mubr.msk.f32.gmra.mxu0 %vm610_vm1, %v7378_v23 }
 0x1cf   : > { %v8216_v40 = vadd.f32 %v5848_v27, %v2585_v45  ;;  %v2584_v62 = vadd.f32 %v2505_v13, %v8962_v22  ;;  %6148 = vmatprep.mubr.msk.f32.mxu0 %vm610_vm1, %v8963_v63  ;;  %v8970_v27 = vld [vmem:[#allocation71_spill] sm:$0xff]  ;;  %v3945_v8 = vsel %vm1740_vm5, %v8971_v20, %v3944_v12  ;;  %v8972_v45 = vld [vmem:[#allocation10_spill] sm:$0xff]  ;;  %v3947_v13 = vsel %vm1740_vm5, %v3944_v12, %v3946_v38  ;;  %v8974_v22 = vld [vmem:[#allocation84_spill] sm:$0xff] }
 0x1d0   : > { %v5777_v59 = vpop.f32.mrf.mxu1  ;;  %6072 = vmatmul.mubr.msk.f32.gmra.mxu1 %vm610_vm1, %v8964_v29  ;;  %v2854_v37 = vpop.f32.mrf.mxu0  ;;  %v3610_v63 = vrot.slane %v810_v53, 1  ;;  %v8977_v12 = vld [vmem:[#allocation74_spill] sm:$0xff] }
 0x1d1   : > { %v8223_v55 = vadd.f32 %v2844_v30, %v2584_v62  ;;  %v2586_v52 = vadd.f32 %v5777_v59, %v8965_v50  ;;  %6074 = vmatprep.mubr.msk.f32.mxu1 %vm610_vm1, %v8966_v1 }
 0x1d2   : > { %v2515_v23 = vpop.f32.mrf.mxu1  ;;  %v5854_v10 = vpop.f32.mrf.mxu0  ;;  %6149 = vmatmul.mubr.msk.f32.gmra.mxu0 %vm610_vm1, %v8967_v41 }
 0x1d3   : > { %v8231_v24 = vadd.f32 %v5851_v54, %v2586_v52  ;;  %6151 = vmatprep.mubr.msk.f32.mxu0 %vm610_vm1, %v7949_v32  ;;  %v3608_v32 = vrot.slane %v7962_v18, 1  ;;  %v8973_v18 = vld [vmem:[#allocation72_spill] sm:$0xff]  ;;  %v8976_v52 = vld [vmem:[#allocation73_spill] sm:$0xff]  ;;  %v3949_v23 = vsel %vm1740_vm5, %v3946_v38, %v3948_v61 }
 0x1d4   : > { %v5780_v47 = vpop.f32.mrf.mxu1  ;;  %6075 = vmatmul.mubr.msk.f32.gmra.mxu1 %vm610_vm1, %v8968_v5  ;;  %v2863_v3 = vpop.f32.mrf.mxu0 }
 0x1d5   : > { %6077 = vmatprep.mubr.msk.f32.mxu1 %vm610_vm1, %v8969_v14  ;;  %v3609_v37 = vsel %vm863_vm4, %v3606_v43, %v3608_v32  ;;  %v3611_v5 = vsel %vm863_vm4, %v3608_v32, %v3610_v63 }
 0x1d6   : > { %v2524_v11 = vpop.f32.mrf.mxu1  ;;  %v5857_v28 = vpop.f32.mrf.mxu0  ;;  %6152 = vmatmul.mubr.msk.f32.gmra.mxu0 %vm610_vm1, %v7955_v9 }
 0x1d7   : > { %v2587_v16 = vadd.f32 %v2524_v11, %v8970_v27  ;;  %6154 = vmatprep.mubr.msk.f32.mxu0 %vm610_vm1, %v7974_v58  ;;  %v8975_v58 = vrot.slane %v8893_v21, 1  ;;  %v8978_v27 = vld [vmem:[#allocation77_spill] sm:$0xff] }
 0x1d8   : > { %v5783_v30 = vpop.f32.mrf.mxu1  ;;  %6078 = vmatmul.mubr.msk.f32.gmra.mxu1 %vm610_vm1, %v8972_v45  ;;  %v2872_v35 = vpop.f32.mrf.mxu0 }
 0x1d9   : > { %v8253_v9 = vadd.f32 %v2863_v3, %v2587_v16  ;;  %v2589_v54 = vadd.f32 %v5783_v30, %v8973_v18  ;;  %6080 = vmatprep.mubr.msk.f32.mxu1 %vm610_vm1, %v8974_v22  ;;  %v3607_v62 = vsel %vm863_vm4, %v8975_v58, %v3606_v43 }
 0x1da   : > { %v2533_v59 = vpop.f32.mrf.mxu1  ;;  %v5860_v29 = vpop.f32.mrf.mxu0  ;;  %6155 = vmatmul.mubr.msk.f32.gmra.mxu0 %vm610_vm1, %v3945_v8 }
 0x1db   : > { %v8263_v50 = vadd.f32 %v5857_v28, %v2589_v54  ;;  %v2588_v1 = vadd.f32 %v2533_v59, %v8976_v52  ;;  %6157 = vmatprep.mubr.msk.f32.mxu0 %vm610_vm1, %v3947_v13 }
 0x1dc   : > { %v5786_v10 = vpop.f32.mrf.mxu1  ;;  %6081 = vmatmul.mubr.msk.f32.gmra.mxu1 %vm610_vm1, %v3607_v62  ;;  %v2882_v21 = vpop.f32.mrf.mxu0 }
 0x1dd   : > { %v8269_v41 = vadd.f32 %v2872_v35, %v2588_v1  ;;  %v2590_v47 = vadd.f32 %v5786_v10, %v8977_v12  ;;  %6083 = vmatprep.mubr.msk.f32.mxu1 %vm610_vm1, %v3609_v37 }
 0x1de   : > { %v2543_v3 = vpop.f32.mrf.mxu1  ;;  %v5863_v53 = vpop.f32.mrf.mxu0  ;;  %6158 = vmatmul.mubr.msk.f32.gmra.mxu0 %vm610_vm1, %v3949_v23 }
 0x1df   : > { %v8275_v43 = vadd.f32 %v5860_v29, %v2590_v47 }
 0x1e0   : > { %v5789_v14 = vpop.f32.mrf.mxu1  ;;  %6084 = vmatmul.mubr.msk.f32.gmra.mxu1 %vm610_vm1, %v3611_v5  ;;  %v2891_v38 = vpop.f32.mrf.mxu0 }
 0x1e2   : > { %v2552_v11 = vpop.f32.mrf.mxu1  ;;  %v5942_v28 = vpop.f32.mrf.mxu0 }
 0x1e3   : > { %v2591_v16 = vadd.f32 %v2552_v11, %v8978_v27 }
 0x1e4   : > { %v5868_v20 = vpop.f32.mrf.mxu1  ;;  %v3348_v8 = vpop.f32.mrf.mxu0 }
 0x1e5   : > { %v8279_v61 = vadd.f32 %v2891_v38, %v2591_v16  ;;  %v3238_v32 = vadd.f32 %v5868_v20, %v8000_v56 }
 0x1e6   : > { %v3014_v30 = vpop.f32.mrf.mxu1  ;;  %v5945_v45 = vpop.f32.mrf.mxu0 }
 0x1e7   : > { %v8282_v35 = vadd.f32 %v5942_v28, %v3238_v32  ;;  %v3237_v13 = vadd.f32 %v3014_v30, %v8007_v4 }
 0x1e8   : > { %v5871_v18 = vpop.f32.mrf.mxu1  ;;  %v3358_v54 = vpop.f32.mrf.mxu0 }
 0x1e9   : > { %v8285_v22 = vadd.f32 %v3348_v8, %v3237_v13  ;;  %v3239_v58 = vadd.f32 %v5871_v18, %v8014_v31 }
 0x1ea   : > { %v3024_v62 = vpop.f32.mrf.mxu1  ;;  %v5948_v63 = vpop.f32.mrf.mxu0 }
 0x1eb   : > { %v8288_v59 = vadd.f32 %v5945_v45, %v3239_v58 }
 0x1ec   : > { %v5874_v29 = vpop.f32.mrf.mxu1  ;;  %v3367_v37 = vpop.f32.mrf.mxu0 }
 0x1ee   : > { %v3033_v52 = vpop.f32.mrf.mxu1  ;;  %v5951_v56 = vpop.f32.mrf.mxu0 }
 0x1ef   : > { %v3240_v1 = vadd.f32 %v3033_v52, %v8029_v6 }
 0x1f0   : > { %v5877_v23 = vpop.f32.mrf.mxu1  ;;  %v3376_v10 = vpop.f32.mrf.mxu0 }
 0x1f1   : > { %v8291_v21 = vadd.f32 %v3367_v37, %v3240_v1  ;;  %v3242_v4 = vadd.f32 %v5877_v23, %v8036_v36 }
 0x1f2   : > { %v3042_v12 = vpop.f32.mrf.mxu1  ;;  %v5954_v47 = vpop.f32.mrf.mxu0 }
 0x1f3   : > { %v8294_v5 = vadd.f32 %v5951_v56, %v3242_v4  ;;  %v3241_v31 = vadd.f32 %v3042_v12, %v8043_v0 }
 0x1f4   : > { %v5880_v3 = vpop.f32.mrf.mxu1  ;;  %v3386_v53 = vpop.f32.mrf.mxu0 }
 0x1f5   : > { %v8297_v14 = vadd.f32 %v3376_v10, %v3241_v31  ;;  %v3243_v38 = vadd.f32 %v5880_v3, %v8050_v60 }
 0x1f6   : > { %v3052_v11 = vpop.f32.mrf.mxu1  ;;  %v5957_v6 = vpop.f32.mrf.mxu0 }
 0x1f7   : > { %v8300_v28 = vadd.f32 %v5954_v47, %v3243_v38 }
 0x1f8   : > { %v5883_v27 = vpop.f32.mrf.mxu1  ;;  %v3395_v16 = vpop.f32.mrf.mxu0 }
 0x1fa   : > { %v3061_v20 = vpop.f32.mrf.mxu1  ;;  %v5960_v36 = vpop.f32.mrf.mxu0 }
 0x1fb   : > { %v3244_v8 = vadd.f32 %v3061_v20, %v8065_v48 }
 0x1fc   : > { %v5886_v32 = vpop.f32.mrf.mxu1  ;;  %v3404_v30 = vpop.f32.mrf.mxu0 }
 0x1fd   : > { %v8303_v45 = vadd.f32 %v3395_v16, %v3244_v8  ;;  %v3246_v0 = vadd.f32 %v5886_v32, %v8072_v39 }
 0x1fe   : > { %v3070_v13 = vpop.f32.mrf.mxu1  ;;  %v5963_v18 = vpop.f32.mrf.mxu0 }
 0x1ff   : > { %v8306_v54 = vadd.f32 %v5960_v36, %v3246_v0  ;;  %v3245_v60 = vadd.f32 %v3070_v13, %v8079_v51 }
 0x200   : > { %v5889_v58 = vpop.f32.mrf.mxu1  ;;  %v3414_v62 = vpop.f32.mrf.mxu0 }
 0x201   : > { %v8309_v63 = vadd.f32 %v3404_v30, %v3245_v60  ;;  %v3247_v29 = vadd.f32 %v5889_v58, %v8086_v26 }
 0x202   : > { %v3080_v37 = vpop.f32.mrf.mxu1  ;;  %v5966_v48 = vpop.f32.mrf.mxu0 }
 0x203   : > { %v8312_v52 = vadd.f32 %v5963_v18, %v3247_v29 }
 0x204   : > { %v5892_v56 = vpop.f32.mrf.mxu1  ;;  %v3423_v1 = vpop.f32.mrf.mxu0 }
 0x206   : > { %v3089_v23 = vpop.f32.mrf.mxu1  ;;  %v5969_v39 = vpop.f32.mrf.mxu0 }
 0x207   : > { %v3248_v10 = vadd.f32 %v3089_v23, %v8101_v34 }
 0x208   : > { %v5895_v4 = vpop.f32.mrf.mxu1  ;;  %v3432_v12 = vpop.f32.mrf.mxu0 }
 0x209   : > { %v8315_v47 = vadd.f32 %v3423_v1, %v3248_v10  ;;  %v3250_v51 = vadd.f32 %v5895_v4, %v8108_v19 }
 0x20a   : > { %v3098_v31 = vpop.f32.mrf.mxu1  ;;  %v5972_v3 = vpop.f32.mrf.mxu0 }
 0x20b   : > { %v8318_v53 = vadd.f32 %v5969_v39, %v3250_v51  ;;  %v3249_v26 = vadd.f32 %v3098_v31, %v8115_v25 }
 0x20c   : > { %v5898_v38 = vpop.f32.mrf.mxu1  ;;  %v3442_v11 = vpop.f32.mrf.mxu0 }
 0x20d   : > { %v8321_v6 = vadd.f32 %v3432_v12, %v3249_v26  ;;  %v3251_v27 = vadd.f32 %v5898_v38, %v8122_v7 }
 0x20e   : > { %v3108_v16 = vpop.f32.mrf.mxu1  ;;  %v5975_v34 = vpop.f32.mrf.mxu0 }
 0x20f   : > { %v8324_v20 = vadd.f32 %v5972_v3, %v3251_v27 }
 0x210   : > { %v5901_v36 = vpop.f32.mrf.mxu1  ;;  %v3451_v8 = vpop.f32.mrf.mxu0 }
 0x212   : > { %v3117_v32 = vpop.f32.mrf.mxu1  ;;  %v5978_v19 = vpop.f32.mrf.mxu0 }
 0x213   : > { %v3252_v30 = vadd.f32 %v3117_v32, %v8137_v33 }
 0x214   : > { %v5904_v0 = vpop.f32.mrf.mxu1  ;;  %v3460_v13 = vpop.f32.mrf.mxu0 }
 0x215   : > { %v8327_v18 = vadd.f32 %v3451_v8, %v3252_v30  ;;  %v3254_v25 = vadd.f32 %v5904_v0, %v8144_v15 }
 0x216   : > { %v3126_v60 = vpop.f32.mrf.mxu1  ;;  %v5981_v58 = vpop.f32.mrf.mxu0 }
 0x217   : > { %v8330_v62 = vadd.f32 %v5978_v19, %v3254_v25  ;;  %v3253_v7 = vadd.f32 %v3126_v60, %v8151_v2 }
 0x218   : > { %v5907_v29 = vpop.f32.mrf.mxu1  ;;  %v3470_v37 = vpop.f32.mrf.mxu0 }
 0x219   : > { %v8333_v48 = vadd.f32 %v3460_v13, %v3253_v7  ;;  %v3255_v56 = vadd.f32 %v5907_v29, %v8158_v42 }
 0x21a   : > { %v3136_v1 = vpop.f32.mrf.mxu1  ;;  %v5984_v33 = vpop.f32.mrf.mxu0 }
 0x21b   : > { %v8336_v23 = vadd.f32 %v5981_v58, %v3255_v56 }
 0x21c   : > { %v5910_v39 = vpop.f32.mrf.mxu1  ;;  %v3479_v10 = vpop.f32.mrf.mxu0 }
 0x21e   : > { %v3145_v4 = vpop.f32.mrf.mxu1  ;;  %v5987_v15 = vpop.f32.mrf.mxu0 }
 0x21f   : > { %v3256_v12 = vadd.f32 %v3145_v4, %v8173_v57 }
 0x220   : > { %v5913_v51 = vpop.f32.mrf.mxu1  ;;  %v3488_v31 = vpop.f32.mrf.mxu0 }
 0x221   : > { %v8339_v3 = vadd.f32 %v3479_v10, %v3256_v12  ;;  %v3258_v2 = vadd.f32 %v5913_v51, %v8180_v49 }
 0x222   : > { %v3154_v26 = vpop.f32.mrf.mxu1  ;;  %v5990_v38 = vpop.f32.mrf.mxu0 }
 0x223   : > { %v8342_v11 = vadd.f32 %v5987_v15, %v3258_v2  ;;  %v3257_v42 = vadd.f32 %v3154_v26, %v8187_v44 }
 0x224   : > { %v5916_v27 = vpop.f32.mrf.mxu1  ;;  %v3498_v16 = vpop.f32.mrf.mxu0 }
 0x225   : > { %v8345_v34 = vadd.f32 %v3488_v31, %v3257_v42  ;;  %v3259_v36 = vadd.f32 %v5916_v27, %v8194_v17 }
 0x226   : > { %v3164_v8 = vpop.f32.mrf.mxu1  ;;  %v5993_v57 = vpop.f32.mrf.mxu0 }
 0x227   : > { %v8348_v32 = vadd.f32 %v5990_v38, %v3259_v36 }
 0x228   : > { %v5919_v19 = vpop.f32.mrf.mxu1  ;;  %v3507_v30 = vpop.f32.mrf.mxu0 }
 0x22a   : > { %v3173_v0 = vpop.f32.mrf.mxu1  ;;  %v5996_v49 = vpop.f32.mrf.mxu0 }
 0x22b   : > { %v3260_v13 = vadd.f32 %v3173_v0, %v8209_v46 }
 0x22c   : > { %v5922_v25 = vpop.f32.mrf.mxu1  ;;  %v3516_v60 = vpop.f32.mrf.mxu0 }
 0x22d   : > { %v8351_v58 = vadd.f32 %v3507_v30, %v3260_v13  ;;  %v3262_v44 = vadd.f32 %v5922_v25, %v8216_v40 }
 0x22e   : > { %v3182_v7 = vpop.f32.mrf.mxu1  ;;  %v5999_v29 = vpop.f32.mrf.mxu0 }
 0x22f   : > { %v8354_v37 = vadd.f32 %v5996_v49, %v3262_v44  ;;  %v3261_v17 = vadd.f32 %v3182_v7, %v8223_v55 }
 0x230   : > { %v5925_v56 = vpop.f32.mrf.mxu1  ;;  %v3526_v1 = vpop.f32.mrf.mxu0 }
 0x231   : > { %v8357_v33 = vadd.f32 %v3516_v60, %v3261_v17  ;;  %v3263_v39 = vadd.f32 %v5925_v56, %v8231_v24 }
 0x232   : > { %v3192_v10 = vpop.f32.mrf.mxu1  ;;  %v6002_v46 = vpop.f32.mrf.mxu0 }
 0x233   : > { %v8360_v4 = vadd.f32 %v5999_v29, %v3263_v39 }
 0x234   : > { %v5928_v15 = vpop.f32.mrf.mxu1  ;;  %v3535_v12 = vpop.f32.mrf.mxu0 }
 0x236   : > { %v3201_v51 = vpop.f32.mrf.mxu1  ;;  %v6005_v40 = vpop.f32.mrf.mxu0 }
 0x237   : > { %v3264_v31 = vadd.f32 %v3201_v51, %v8253_v9 }
 0x238   : > { %v5931_v2 = vpop.f32.mrf.mxu1  ;;  %v3544_v26 = vpop.f32.mrf.mxu0 }
 0x239   : > { %v8363_v38 = vadd.f32 %v3535_v12, %v3264_v31  ;;  %v3266_v55 = vadd.f32 %v5931_v2, %v8263_v50 }
 0x23a   : > { %v3210_v42 = vpop.f32.mrf.mxu1  ;;  %v6008_v27 = vpop.f32.mrf.mxu0 }
 0x23b   : > { %v8366_v16 = vadd.f32 %v6005_v40, %v3266_v55  ;;  %v3265_v24 = vadd.f32 %v3210_v42, %v8269_v41 }
 0x23c   : > { %v5934_v36 = vpop.f32.mrf.mxu1  ;;  %v3554_v8 = vpop.f32.mrf.mxu0 }
 0x23d   : > { %v8369_v57 = vadd.f32 %v3544_v26, %v3265_v24  ;;  %v3267_v19 = vadd.f32 %v5934_v36, %v8275_v43  ;;  %v8381_v43 = vld [vmem:[%s8529_s4] ss:$0 sm:$0xff] }
 0x23e   : > { %v3220_v30 = vpop.f32.mrf.mxu1  ;;  %v6011_v9 = vpop.f32.mrf.mxu0 }
 0x23f   : > { %v8372_v0 = vadd.f32 %v6008_v27, %v3267_v19 }
 0x240   : > { %v5937_v49 = vpop.f32.mrf.mxu1  ;;  %v3563_v13 = vpop.f32.mrf.mxu0 }
 0x242   : > { %v3229_v25 = vpop.f32.mrf.mxu1  ;;  %v6090_v50 = vpop.f32.mrf.mxu0 }
 0x243   : > { %v3268_v60 = vadd.f32 %v3229_v25, %v8279_v61 }
 0x244   : > { %v6016_v44 = vpop.f32.mrf.mxu1  ;;  %v4025_v7 = vpop.f32.mrf.mxu0 }
 0x245   : > { %v8375_v41 = vadd.f32 %v3563_v13, %v3268_v60  ;;  %v3911_v29 = vadd.f32 %v6016_v44, %v8282_v35 }
 0x246   : > { %v3687_v17 = vpop.f32.mrf.mxu1  ;;  %v6093_v56 = vpop.f32.mrf.mxu0 }
 0x247   : > { %v4249_v1 = vadd.f32 %v6090_v50, %v3911_v29  ;;  %v3910_v39 = vadd.f32 %v3687_v17, %v8285_v22 }
 0x248   : > { %v6019_v10 = vpop.f32.mrf.mxu1  ;;  %v4035_v46 = vpop.f32.mrf.mxu0 }
 0x249   : > { %v4288_v61 = vadd.f32 %v8381_v43, %v4249_v1  ;;  %v4248_v15 = vadd.f32 %v4025_v7, %v3910_v39  ;;  %v3912_v12 = vadd.f32 %v6019_v10, %v8288_v59 }
 0x24a   : > { %v3697_v35 = vpop.f32.mrf.mxu1  ;;  %v6096_v51 = vpop.f32.mrf.mxu0 }
 0x24b   : > { %v4320_v40 = vmax.f32 %v4288_v61, 0.0  ;;  %v4287_v22 = vadd.f32 %v8381_v43, %v4248_v15  ;;  %v4250_v31 = vadd.f32 %v6093_v56, %v3912_v12 }
 0x24c   : > { %v6022_v2 = vpop.f32.mrf.mxu1  ;;  %v4044_v26 = vpop.f32.mrf.mxu0 }
 0x24d   : > { %4353 = vst.msk [vmem:[%s8390_s20 + $0x8] sm:$0xff] %vm4351_vm6, %v4320_v40  ;;  %v4319_v59 = vmax.f32 %v4287_v22, 0.0  ;;  %v4289_v55 = vadd.f32 %v8381_v43, %v4250_v31 }
 0x24e   : > { %v3706_v42 = vpop.f32.mrf.mxu1  ;;  %v6099_v27 = vpop.f32.mrf.mxu0 }
 0x24f   : > { %4352 = vst.msk [vmem:[%s8390_s20] sm:$0xff] %vm4351_vm6, %v4319_v59  ;;  %v4321_v24 = vmax.f32 %v4289_v55, 0.0  ;;  %v3913_v36 = vadd.f32 %v3706_v42, %v8291_v21 }
 0x250   : > { %v6025_v8 = vpop.f32.mrf.mxu1  ;;  %v4053_v19 = vpop.f32.mrf.mxu0 }
 0x251   : > { %4354 = vst.msk [vmem:[%s8390_s20 + $0x10] sm:$0xff] %vm4351_vm6, %v4321_v24  ;;  %v4251_v30 = vadd.f32 %v4044_v26, %v3913_v36  ;;  %v3915_v9 = vadd.f32 %v6025_v8, %v8294_v5 }
 0x252   : > { %v3715_v49 = vpop.f32.mrf.mxu1  ;;  %v6102_v13 = vpop.f32.mrf.mxu0 }
 0x253   : > { %v4290_v25 = vadd.f32 %v8381_v43, %v4251_v30  ;;  %v4253_v50 = vadd.f32 %v6099_v27, %v3915_v9  ;;  %v3914_v60 = vadd.f32 %v3715_v49, %v8297_v14 }
 0x254   : > { %v6028_v44 = vpop.f32.mrf.mxu1  ;;  %v4063_v7 = vpop.f32.mrf.mxu0 }
 0x255   : > { %v4322_v29 = vmax.f32 %v4290_v25, 0.0  ;;  %v4292_v21 = vadd.f32 %v8381_v43, %v4253_v50  ;;  %v4252_v17 = vadd.f32 %v4053_v19, %v3914_v60  ;;  %v3916_v56 = vadd.f32 %v6028_v44, %v8300_v28 }
 0x256   : > { %v3725_v1 = vpop.f32.mrf.mxu1  ;;  %v6105_v39 = vpop.f32.mrf.mxu0 }
 0x257   : > { %4355 = vst.msk [vmem:[%s8390_s20 + $0x18] sm:$0xff] %vm4351_vm6, %v4322_v29  ;;  %v4324_v5 = vmax.f32 %v4292_v21, 0.0  ;;  %v4291_v10 = vadd.f32 %v8381_v43, %v4252_v17  ;;  %v4254_v46 = vadd.f32 %v6102_v13, %v3916_v56 }
 0x258   : > { %v6031_v61 = vpop.f32.mrf.mxu1  ;;  %v4072_v14 = vpop.f32.mrf.mxu0 }
 0x259   : > { %4357 = vst.msk [vmem:[%s8390_s20 + $0x28] sm:$0xff] %vm4351_vm6, %v4324_v5  ;;  %v4323_v15 = vmax.f32 %v4291_v10, 0.0  ;;  %v4293_v12 = vadd.f32 %v8381_v43, %v4254_v46 }
 0x25a   : > { %v3734_v35 = vpop.f32.mrf.mxu1  ;;  %v6108_v51 = vpop.f32.mrf.mxu0 }
 0x25b   : > { %4356 = vst.msk [vmem:[%s8390_s20 + $0x20] sm:$0xff] %vm4351_vm6, %v4323_v15  ;;  %v4325_v28 = vmax.f32 %v4293_v12, 0.0  ;;  %v3917_v40 = vadd.f32 %v3734_v35, %v8303_v45 }
 0x25c   : > { %v6034_v22 = vpop.f32.mrf.mxu1  ;;  %v4081_v31 = vpop.f32.mrf.mxu0 }
 0x25d   : > { %4358 = vst.msk [vmem:[%s8390_s20 + $0x30] sm:$0xff] %vm4351_vm6, %v4325_v28  ;;  %v4255_v2 = vadd.f32 %v4072_v14, %v3917_v40  ;;  %v3919_v26 = vadd.f32 %v6034_v22, %v8306_v54 }
 0x25e   : > { %v3743_v59 = vpop.f32.mrf.mxu1  ;;  %v6111_v55 = vpop.f32.mrf.mxu0 }
 0x25f   : > { %v4294_v42 = vadd.f32 %v8381_v43, %v4255_v2  ;;  %v4257_v27 = vadd.f32 %v6108_v51, %v3919_v26  ;;  %v3918_v24 = vadd.f32 %v3743_v59, %v8309_v63 }
 0x260   : > { %v6037_v36 = vpop.f32.mrf.mxu1  ;;  %v4091_v8 = vpop.f32.mrf.mxu0 }
 0x261   : > { %v4326_v19 = vmax.f32 %v4294_v42, 0.0  ;;  %v4296_v45 = vadd.f32 %v8381_v43, %v4257_v27  ;;  %v4256_v30 = vadd.f32 %v4081_v31, %v3918_v24  ;;  %v3920_v9 = vadd.f32 %v6037_v36, %v8312_v52 }
 0x262   : > { %v3753_v49 = vpop.f32.mrf.mxu1  ;;  %v6114_v13 = vpop.f32.mrf.mxu0 }
 0x263   : > { %4359 = vst.msk [vmem:[%s8390_s20 + $0x38] sm:$0xff] %vm4351_vm6, %v4326_v19  ;;  %v4328_v54 = vmax.f32 %v4296_v45, 0.0  ;;  %v4295_v25 = vadd.f32 %v8381_v43, %v4256_v30  ;;  %v4258_v50 = vadd.f32 %v6111_v55, %v3920_v9 }
 0x264   : > { %v6040_v60 = vpop.f32.mrf.mxu1  ;;  %v4100_v63 = vpop.f32.mrf.mxu0 }
 0x265   : > { %4361 = vst.msk [vmem:[%s8390_s20 + $0x48] sm:$0xff] %vm4351_vm6, %v4328_v54  ;;  %v4327_v44 = vmax.f32 %v4295_v25, 0.0  ;;  %v4297_v7 = vadd.f32 %v8381_v43, %v4258_v50 }
 0x266   : > { %v3762_v29 = vpop.f32.mrf.mxu1  ;;  %v6117_v21 = vpop.f32.mrf.mxu0 }
 0x267   : > { %4360 = vst.msk [vmem:[%s8390_s20 + $0x40] sm:$0xff] %vm4351_vm6, %v4327_v44  ;;  %v4329_v52 = vmax.f32 %v4297_v7, 0.0  ;;  %v3921_v17 = vadd.f32 %v3762_v29, %v8315_v47 }
 0x268   : > { %v6043_v56 = vpop.f32.mrf.mxu1  ;;  %v4109_v1 = vpop.f32.mrf.mxu0 }
 0x269   : > { %4362 = vst.msk [vmem:[%s8390_s20 + $0x50] sm:$0xff] %vm4351_vm6, %v4329_v52  ;;  %v4259_v39 = vadd.f32 %v4100_v63, %v3921_v17  ;;  %v3923_v5 = vadd.f32 %v6043_v56, %v8318_v53 }
 0x26a   : > { %v3771_v10 = vpop.f32.mrf.mxu1  ;;  %v6120_v46 = vpop.f32.mrf.mxu0 }
 0x26b   : > { %v4298_v61 = vadd.f32 %v8381_v43, %v4259_v39  ;;  %v4261_v14 = vadd.f32 %v6117_v21, %v3923_v5  ;;  %v3922_v15 = vadd.f32 %v3771_v10, %v8321_v6 }
 0x26c   : > { %v6046_v12 = vpop.f32.mrf.mxu1  ;;  %v4119_v35 = vpop.f32.mrf.mxu0 }
 0x26d   : > { %v4330_v51 = vmax.f32 %v4298_v61, 0.0  ;;  %v4300_v47 = vadd.f32 %v8381_v43, %v4261_v14  ;;  %v4260_v28 = vadd.f32 %v4109_v1, %v3922_v15  ;;  %v3924_v40 = vadd.f32 %v6046_v12, %v8324_v20 }
 0x26e   : > { %v3781_v22 = vpop.f32.mrf.mxu1  ;;  %v6123_v31 = vpop.f32.mrf.mxu0 }
 0x26f   : > { %4363 = vst.msk [vmem:[%s8390_s20 + $0x58] sm:$0xff] %vm4351_vm6, %v4330_v51  ;;  %v4332_v53 = vmax.f32 %v4300_v47, 0.0  ;;  %v4299_v2 = vadd.f32 %v8381_v43, %v4260_v28  ;;  %v4262_v26 = vadd.f32 %v6120_v46, %v3924_v40 }
 0x270   : > { %v6049_v59 = vpop.f32.mrf.mxu1  ;;  %v4128_v6 = vpop.f32.mrf.mxu0 }
 0x271   : > { %4365 = vst.msk [vmem:[%s8390_s20 + $0x68] sm:$0xff] %vm4351_vm6, %v4332_v53  ;;  %v4331_v55 = vmax.f32 %v4299_v2, 0.0  ;;  %v4301_v42 = vadd.f32 %v8381_v43, %v4262_v26 }
 0x272   : > { %v3790_v27 = vpop.f32.mrf.mxu1  ;;  %v6126_v24 = vpop.f32.mrf.mxu0 }
 0x273   : > { %4364 = vst.msk [vmem:[%s8390_s20 + $0x60] sm:$0xff] %vm4351_vm6, %v4331_v55  ;;  %v4333_v20 = vmax.f32 %v4301_v42, 0.0  ;;  %v3925_v36 = vadd.f32 %v3790_v27, %v8327_v18 }
 0x274   : > { %v6052_v8 = vpop.f32.mrf.mxu1  ;;  %v4137_v19 = vpop.f32.mrf.mxu0 }
 0x275   : > { %4366 = vst.msk [vmem:[%s8390_s20 + $0x70] sm:$0xff] %vm4351_vm6, %v4333_v20  ;;  %v4263_v45 = vadd.f32 %v4128_v6, %v3925_v36  ;;  %v3927_v30 = vadd.f32 %v6052_v8, %v8330_v62 }
 0x276   : > { %v3799_v9 = vpop.f32.mrf.mxu1  ;;  %v6129_v49 = vpop.f32.mrf.mxu0 }
 0x277   : > { %v4302_v13 = vadd.f32 %v8381_v43, %v4263_v45  ;;  %v4265_v54 = vadd.f32 %v6126_v24, %v3927_v30  ;;  %v3926_v25 = vadd.f32 %v3799_v9, %v8333_v48 }
 0x278   : > { %v6055_v50 = vpop.f32.mrf.mxu1  ;;  %v4147_v60 = vpop.f32.mrf.mxu0 }
 0x279   : > { %v4334_v63 = vmax.f32 %v4302_v13, 0.0  ;;  %v4304_v18 = vadd.f32 %v8381_v43, %v4265_v54  ;;  %v4264_v44 = vadd.f32 %v4137_v19, %v3926_v25  ;;  %v3928_v7 = vadd.f32 %v6055_v50, %v8336_v23 }
 0x27a   : > { %v3809_v29 = vpop.f32.mrf.mxu1  ;;  %v6132_v21 = vpop.f32.mrf.mxu0 }
 0x27b   : > { %4367 = vst.msk [vmem:[%s8390_s20 + $0x78] sm:$0xff] %vm4351_vm6, %v4334_v63  ;;  %v4336_v62 = vmax.f32 %v4304_v18, 0.0  ;;  %v4303_v52 = vadd.f32 %v8381_v43, %v4264_v44  ;;  %v4266_v17 = vadd.f32 %v6129_v49, %v3928_v7 }
 0x27c   : > { %v6058_v56 = vpop.f32.mrf.mxu1  ;;  %v4156_v48 = vpop.f32.mrf.mxu0 }
 0x27d   : > { %4369 = vst.msk [vmem:[%s8390_s20 + $0x88] sm:$0xff] %vm4351_vm6, %v4336_v62  ;;  %v4335_v1 = vmax.f32 %v4303_v52, 0.0  ;;  %v4305_v39 = vadd.f32 %v8381_v43, %v4266_v17 }
 0x27e   : > { %v3818_v5 = vpop.f32.mrf.mxu1  ;;  %v6135_v10 = vpop.f32.mrf.mxu0 }
 0x27f   : > { %4368 = vst.msk [vmem:[%s8390_s20 + $0x80] sm:$0xff] %vm4351_vm6, %v4335_v1  ;;  %v4337_v23 = vmax.f32 %v4305_v39, 0.0  ;;  %v3929_v46 = vadd.f32 %v3818_v5, %v8339_v3 }
 0x280   : > { %v6061_v61 = vpop.f32.mrf.mxu1  ;;  %v4165_v14 = vpop.f32.mrf.mxu0 }
 0x281   : > { %4370 = vst.msk [vmem:[%s8390_s20 + $0x90] sm:$0xff] %vm4351_vm6, %v4337_v23  ;;  %v4267_v15 = vadd.f32 %v4156_v48, %v3929_v46  ;;  %v3931_v12 = vadd.f32 %v6061_v61, %v8342_v11 }
 0x282   : > { %v3827_v35 = vpop.f32.mrf.mxu1  ;;  %v6138_v51 = vpop.f32.mrf.mxu0 }
 0x283   : > { %v4306_v47 = vadd.f32 %v8381_v43, %v4267_v15  ;;  %v4269_v28 = vadd.f32 %v6135_v10, %v3931_v12  ;;  %v3930_v40 = vadd.f32 %v3827_v35, %v8345_v34 }
 0x284   : > { %v6064_v22 = vpop.f32.mrf.mxu1  ;;  %v4175_v31 = vpop.f32.mrf.mxu0 }
 0x285   : > { %v4338_v53 = vmax.f32 %v4306_v47, 0.0  ;;  %v4308_v3 = vadd.f32 %v8381_v43, %v4269_v28  ;;  %v4268_v2 = vadd.f32 %v4165_v14, %v3930_v40  ;;  %v3932_v26 = vadd.f32 %v6064_v22, %v8348_v32 }
 0x286   : > { %v3837_v59 = vpop.f32.mrf.mxu1  ;;  %v6141_v6 = vpop.f32.mrf.mxu0 }
 0x287   : > { %4371 = vst.msk [vmem:[%s8390_s20 + $0x98] sm:$0xff] %vm4351_vm6, %v4338_v53  ;;  %v4340_v11 = vmax.f32 %v4308_v3, 0.0  ;;  %v4307_v55 = vadd.f32 %v8381_v43, %v4268_v2  ;;  %v4270_v42 = vadd.f32 %v6138_v51, %v3932_v26 }
 0x288   : > { %v6067_v27 = vpop.f32.mrf.mxu1  ;;  %v4184_v34 = vpop.f32.mrf.mxu0 }
 0x289   : > { %4373 = vst.msk [vmem:[%s8390_s20 + $0xa8] sm:$0xff] %vm4351_vm6, %v4340_v11  ;;  %v4339_v24 = vmax.f32 %v4307_v55, 0.0  ;;  %v4309_v20 = vadd.f32 %v8381_v43, %v4270_v42 }
 0x28a   : > { %v3846_v36 = vpop.f32.mrf.mxu1  ;;  %v6144_v8 = vpop.f32.mrf.mxu0 }
 0x28b   : > { %4372 = vst.msk [vmem:[%s8390_s20 + $0xa0] sm:$0xff] %vm4351_vm6, %v4339_v24  ;;  %v4341_v32 = vmax.f32 %v4309_v20, 0.0  ;;  %v3933_v19 = vadd.f32 %v3846_v36, %v8351_v58 }
 0x28c   : > { %v6070_v45 = vpop.f32.mrf.mxu1  ;;  %v4193_v30 = vpop.f32.mrf.mxu0 }
 0x28d   : > { %4374 = vst.msk [vmem:[%s8390_s20 + $0xb0] sm:$0xff] %vm4351_vm6, %v4341_v32  ;;  %v4271_v9 = vadd.f32 %v4184_v34, %v3933_v19  ;;  %v3935_v49 = vadd.f32 %v6070_v45, %v8354_v37 }
 0x28e   : > { %v3855_v13 = vpop.f32.mrf.mxu1  ;;  %v6147_v54 = vpop.f32.mrf.mxu0 }
 0x28f   : > { %v4310_v25 = vadd.f32 %v8381_v43, %v4271_v9  ;;  %v4273_v50 = vadd.f32 %v6144_v8, %v3935_v49  ;;  %v3934_v60 = vadd.f32 %v3855_v13, %v8357_v33 }
 0x290   : > { %v6073_v63 = vpop.f32.mrf.mxu1  ;;  %v4203_v18 = vpop.f32.mrf.mxu0 }
 0x291   : > { %v4342_v44 = vmax.f32 %v4310_v25, 0.0  ;;  %v4312_v58 = vadd.f32 %v8381_v43, %v4273_v50  ;;  %v4272_v7 = vadd.f32 %v4193_v30, %v3934_v60  ;;  %v3936_v29 = vadd.f32 %v6073_v63, %v8360_v4 }
 0x292   : > { %v3865_v21 = vpop.f32.mrf.mxu1  ;;  %v6150_v62 = vpop.f32.mrf.mxu0 }
 0x293   : > { %4375 = vst.msk [vmem:[%s8390_s20 + $0xb8] sm:$0xff] %vm4351_vm6, %v4342_v44  ;;  %v4344_v37 = vmax.f32 %v4312_v58, 0.0  ;;  %v4311_v52 = vadd.f32 %v8381_v43, %v4272_v7  ;;  %v4274_v17 = vadd.f32 %v6147_v54, %v3936_v29 }
 0x294   : > { %v6076_v56 = vpop.f32.mrf.mxu1  ;;  %v4212_v33 = vpop.f32.mrf.mxu0 }
 0x295   : > { %4377 = vst.msk [vmem:[%s8390_s20 + $0xc8] sm:$0xff] %vm4351_vm6, %v4344_v37  ;;  %v4343_v48 = vmax.f32 %v4311_v52, 0.0  ;;  %v4313_v1 = vadd.f32 %v8381_v43, %v4274_v17 }
 0x296   : > { %v3874_v39 = vpop.f32.mrf.mxu1  ;;  %v6153_v5 = vpop.f32.mrf.mxu0 }
 0x297   : > { %4376 = vst.msk [vmem:[%s8390_s20 + $0xc0] sm:$0xff] %vm4351_vm6, %v4343_v48  ;;  %v4345_v4 = vmax.f32 %v4313_v1, 0.0  ;;  %v3937_v10 = vadd.f32 %v3874_v39, %v8363_v38 }
 0x298   : > { %v6079_v23 = vpop.f32.mrf.mxu1  ;;  %v4221_v46 = vpop.f32.mrf.mxu0 }
 0x299   : > { %4378 = vst.msk [vmem:[%s8390_s20 + $0xd0] sm:$0xff] %vm4351_vm6, %v4345_v4  ;;  %v4275_v61 = vadd.f32 %v4212_v33, %v3937_v10  ;;  %v3939_v14 = vadd.f32 %v6079_v23, %v8366_v16 }
 0x29a   : > { %v3883_v15 = vpop.f32.mrf.mxu1  ;;  %v6156_v12 = vpop.f32.mrf.mxu0 }
 0x29b   : > { %v4314_v35 = vadd.f32 %v8381_v43, %v4275_v61  ;;  %v4277_v51 = vadd.f32 %v6153_v5, %v3939_v14  ;;  %v3938_v47 = vadd.f32 %v3883_v15, %v8369_v57 }
 0x29c   : > { %v6082_v28 = vpop.f32.mrf.mxu1  ;;  %v4231_v40 = vpop.f32.mrf.mxu0 }
 0x29d   : > { %v4346_v38 = vmax.f32 %v4314_v35, 0.0  ;;  %v4316_v22 = vadd.f32 %v8381_v43, %v4277_v51  ;;  %v4276_v31 = vadd.f32 %v4221_v46, %v3938_v47  ;;  %v3940_v53 = vadd.f32 %v6082_v28, %v8372_v0 }
 0x29e   : > { %v3893_v3 = vpop.f32.mrf.mxu1  ;;  %v6159_v16 = vpop.f32.mrf.mxu0 }
 0x29f   : > { %4379 = vst.msk [vmem:[%s8390_s20 + $0xd8] sm:$0xff] %vm4351_vm6, %v4346_v38  ;;  %v4348_v2 = vmax.f32 %v4316_v22, 0.0  ;;  %v4315_v26 = vadd.f32 %v8381_v43, %v4276_v31  ;;  %v4278_v59 = vadd.f32 %v6156_v12, %v3940_v53 }
 0x2a0   : > { %v6085_v57 = vpop.f32.mrf.mxu1  ;;  %v4240_v27 = vpop.f32.mrf.mxu0 }
 0x2a1   : > { %4381 = vst.msk [vmem:[%s8390_s20 + $0xe8] sm:$0xff] %vm4351_vm6, %v4348_v2  ;;  %v4347_v6 = vmax.f32 %v4315_v26, 0.0  ;;  %v4317_v11 = vadd.f32 %v8381_v43, %v4278_v59 }
 0x2a2   : > { %v3902_v55 = vpop.f32.mrf.mxu1 }
 0x2a3   : > { %4380 = vst.msk [vmem:[%s8390_s20 + $0xe0] sm:$0xff] %vm4351_vm6, %v4347_v6  ;;  %v4349_v0 = vmax.f32 %v4317_v11, 0.0  ;;  %v3941_v42 = vadd.f32 %v3902_v55, %v8375_v41 }
 0x2a5   : > { %4382 = vst.msk [vmem:[%s8390_s20 + $0xf0] sm:$0xff] %vm4351_vm6, %v4349_v0  ;;  %v4279_v34 = vadd.f32 %v4240_v27, %v3941_v42 }
 0x2a7   : > { %v4318_v24 = vadd.f32 %v8381_v43, %v4279_v34 }
 0x2a9   : > { %v4350_v20 = vmax.f32 %v4318_v24, 0.0 }
 0x2ab   : > { %4383 = vst.msk [vmem:[%s8390_s20 + $0xf8] sm:$0xff] %vm4351_vm6, %v4350_v20 }
 0x2ac PF: > { %s19_s27 = sadd.s32 1, %s6246_s27   ;;  %s8979_s26 = smov %s6242_s2 }
 0x2ad   : > { %p16_p5 = scmp.ge.s32.totalorder %s19_s27, 4   ;;  %s8980_s2 = smov %s8982_s28 }
 0x2af   :  { %18 = sbr.rel (!%p16_p5) target bundleno = 2 (0x2), region = 124 }

</bundles_post_ra>
